<compile_context>
chip_gen: v7x
topology: tpu7x:2x2x1
jax: 0.10.0
libtpu: 0.0.40
codegen_flags: <defaults>
</compile_context>

<pallas_src>
import functools

import jax
import jax.numpy as jnp
from jax.experimental import pallas as pl
from jax.experimental.pallas import tpu as pltpu


_VMEM_LIMIT = 48 * 1024 * 1024   # fits v5e/v6e (128 MiB) and v7x (64 MiB) physical VMEM


# ------------------------------ tiling helper ------------------------------ #

def _pick_tile(dim, target, align):
    """Largest tile <= target that divides `dim` and is a multiple of `align`,
    else the full dim (full-extent blocks are always legal)."""
    if dim <= target:
        return dim
    t = (target // align) * align
    while t >= align:
        if dim % t == 0:
            return t
        t -= align
    return dim


def _gelu_exact(y):
    # exact (erf) GELU, matching torch.nn.GELU default; computed in f32
    return 0.5 * y * (1.0 + jax.lax.erf(y * 0.7071067811865476))


# ---------------- weight-resident linear (+ fused epilogue) ----------------- #

def _linear_resident_kernel(*refs, act, fuse_res):
    if fuse_res:
        x_ref, w_ref, b_ref, res_ref, o_ref = refs
    else:
        x_ref, w_ref, b_ref, o_ref = refs
        res_ref = None

    xv = x_ref[...]
    if xv.dtype != jnp.bfloat16:             # activations cast to bf16 for the MXU
        xv = xv.astype(jnp.bfloat16)
    y = jnp.dot(xv, w_ref[...], preferred_element_type=jnp.float32) + b_ref[...]
    if act == "gelu":
        y = _gelu_exact(y)
    if fuse_res:
        y = y + res_ref[...].astype(jnp.float32)
    o_ref[...] = y.astype(o_ref.dtype)


# -------------------- tiled fallback linear (3D grid) ----------------------- #

def _linear_tiled_kernel(*refs, act, fuse_res):
    if fuse_res:
        x_ref, w_ref, b_ref, res_ref, o_ref, acc_ref = refs
    else:
        x_ref, w_ref, b_ref, o_ref, acc_ref = refs
        res_ref = None

    k = pl.program_id(2)

    @pl.when(k == 0)
    def _init():
        acc_ref[...] = jnp.zeros(acc_ref.shape, jnp.float32)

    xv = x_ref[...]
    if xv.dtype != jnp.bfloat16:
        xv = xv.astype(jnp.bfloat16)
    acc_ref[...] += jnp.dot(xv, w_ref[...], preferred_element_type=jnp.float32)

    @pl.when(k == pl.num_programs(2) - 1)
    def _store():
        y = acc_ref[...] + b_ref[...]
        if act == "gelu":
            y = _gelu_exact(y)
        if fuse_res:
            y = y + res_ref[...].astype(jnp.float32)
        o_ref[...] = y.astype(o_ref.dtype)


def linear_pallas(x, w, b=None, *, act=None, residual=None, out_dtype=jnp.float32,
                  tm_target=512, tn_target=512, tk_target=512,
                  weight_resident_bytes=16 * 1024 * 1024):
    """x: (M, K), w: (K, N) [stored bf16], b: (N,) or None -> (M, N).
    Optionally fuses exact GELU and a residual add into the epilogue.
    Uses a weight-resident kernel (weight DMA'd once) when the bf16 weight fits
    `weight_resident_bytes`, otherwise a 3D-tiled accumulating kernel."""
    M, K = x.shape
    K2, N = w.shape
    assert K == K2
    if w.dtype != jnp.bfloat16:
        w = w.astype(jnp.bfloat16)
    if b is None:
        b = jnp.zeros((N,), jnp.float32)
    b2 = b.astype(jnp.float32).reshape(1, N)
    fuse_res = residual is not None

    if K * N * 2 <= weight_resident_bytes:
        # ---- weight-resident path: grid over M only, full (K, N) weight block.
        tm = _pick_tile(M, tm_target, 8)
        in_specs = [
            pl.BlockSpec((tm, K), lambda i: (i, 0)),
            pl.BlockSpec((K, N), lambda i: (0, 0)),      # resident (constant index)
            pl.BlockSpec((1, N), lambda i: (0, 0)),
        ]
        args = [x, w, b2]
        if fuse_res:
            in_specs.append(pl.BlockSpec((tm, N), lambda i: (i, 0)))
            args.append(residual)
        return pl.pallas_call(
            functools.partial(_linear_resident_kernel, act=act, fuse_res=fuse_res),
            out_shape=jax.ShapeDtypeStruct((M, N), out_dtype),
            grid=(M // tm,),
            in_specs=in_specs,
            out_specs=pl.BlockSpec((tm, N), lambda i: (i, 0)),
            compiler_params=pltpu.CompilerParams(
                dimension_semantics=("parallel",),
                vmem_limit_bytes=_VMEM_LIMIT),
        )(*args)

    # ---- fallback: 3D tiled accumulation (large weights).
    tm = _pick_tile(M, tm_target, 8)
    tn = _pick_tile(N, tn_target, 128)
    tk = _pick_tile(K, tk_target, 128)
    grid = (M // tm, N // tn, K // tk)
    in_specs = [
        pl.BlockSpec((tm, tk), lambda i, j, k: (i, k)),
        pl.BlockSpec((tk, tn), lambda i, j, k: (k, j)),
        pl.BlockSpec((1, tn), lambda i, j, k: (0, j)),
    ]
    args = [x, w, b2]
    if fuse_res:
        in_specs.append(pl.BlockSpec((tm, tn), lambda i, j, k: (i, j)))
        args.append(residual)
    return pl.pallas_call(
        functools.partial(_linear_tiled_kernel, act=act, fuse_res=fuse_res),
        out_shape=jax.ShapeDtypeStruct((M, N), out_dtype),
        grid_spec=pltpu.PrefetchScalarGridSpec(
            num_scalar_prefetch=0,
            grid=grid,
            in_specs=in_specs,
            out_specs=pl.BlockSpec((tm, tn), lambda i, j, k: (i, j)),
            scratch_shapes=[pltpu.VMEM((tm, tn), jnp.float32)],
        ),
        compiler_params=pltpu.CompilerParams(
            dimension_semantics=("parallel", "parallel", "arbitrary"),
            vmem_limit_bytes=_VMEM_LIMIT),
    )(*args)


# ------------------------------ LayerNorm ----------------------------------- #

def _layernorm_kernel(x_ref, g_ref, b_ref, o_ref, *, eps):
    v = x_ref[...].astype(jnp.float32)
    mu = jnp.mean(v, axis=-1, keepdims=True)
    c = v - mu
    var = jnp.mean(c * c, axis=-1, keepdims=True)
    y = c * jax.lax.rsqrt(var + eps) * g_ref[...] + b_ref[...]
    o_ref[...] = y.astype(o_ref.dtype)


def layernorm_pallas(x, g, b, eps, *, out_dtype=jnp.float32, tm_target=1024):
    """LayerNorm over the last dim of a 2D (rows, features) array, row-tiled."""
    M, D = x.shape
    tm = _pick_tile(M, tm_target, 8)
    return pl.pallas_call(
        functools.partial(_layernorm_kernel, eps=eps),
        out_shape=jax.ShapeDtypeStruct((M, D), out_dtype),
        grid=(M // tm,),
        in_specs=[
            pl.BlockSpec((tm, D), lambda i: (i, 0)),
            pl.BlockSpec((1, D), lambda i: (0, 0)),
            pl.BlockSpec((1, D), lambda i: (0, 0)),
        ],
        out_specs=pl.BlockSpec((tm, D), lambda i: (i, 0)),
        compiler_params=pltpu.CompilerParams(
            dimension_semantics=("parallel",),
            vmem_limit_bytes=_VMEM_LIMIT),
    )(x, g.astype(jnp.float32).reshape(1, D), b.astype(jnp.float32).reshape(1, D))


# ---------- flash attention: head-major layout, K/V resident in VMEM -------- #

def _flash_attention_kernel(q_ref, k_ref, v_ref, o_ref, *, tk, nk):
    # q_ref: (1,1,tq,hd), k_ref/v_ref: (1,1,T,hd) resident, o_ref: (1,1,tq,hd)
    q = q_ref[0, 0]                              # (tq, hd) bf16
    tq, hd = q.shape

    def body(i, carry):
        m, l, acc = carry
        start = pl.multiple_of(i * tk, tk)
        kc = k_ref[0, 0, pl.ds(start, tk), :]    # (tk, hd) bf16 (VMEM-resident)
        vc = v_ref[0, 0, pl.ds(start, tk), :]
        # contract last dims directly (no explicit k.T / XLU transpose);
        # attention scale is already folded into the q projection weights.
        s = jax.lax.dot_general(q, kc, (((1,), (1,)), ((), ())),
                                preferred_element_type=jnp.float32)   # (tq, tk)
        m_new = jnp.maximum(m, jnp.max(s, axis=-1, keepdims=True))
        alpha = jnp.exp(m - m_new)
        p = jnp.exp(s - m_new)
        l_new = alpha * l + jnp.sum(p, axis=-1, keepdims=True)
        acc_new = alpha * acc + jnp.dot(p.astype(vc.dtype), vc,
                                        preferred_element_type=jnp.float32)
        return m_new, l_new, acc_new

    m0 = jnp.full((tq, 1), -jnp.inf, jnp.float32)
    l0 = jnp.zeros((tq, 1), jnp.float32)
    acc0 = jnp.zeros((tq, hd), jnp.float32)
    m, l, acc = jax.lax.fori_loop(0, nk, body, (m0, l0, acc0))
    o_ref[0, 0] = (acc / l).astype(o_ref.dtype)   # exact normalization


def attention_pallas(q, k, v, *, tq_target=256, tk_target=256):
    """q,k,v: (B, nH, T, hd) bf16 (head-major) -> (B, nH, T, hd) bf16.
    K/V stay resident in VMEM across the whole q-tile axis for each (b, h)."""
    B, nH, T, hd = q.shape
    tq = _pick_tile(T, tq_target, 8)
    tk = _pick_tile(T, tk_target, 8)
    nk = T // tk
    grid = (B, nH, T // tq)

    q_spec = pl.BlockSpec((1, 1, tq, hd), lambda b, h, qi: (b, h, qi, 0))
    kv_spec = pl.BlockSpec((1, 1, T, hd), lambda b, h, qi: (b, h, 0, 0))   # resident
    o_spec = pl.BlockSpec((1, 1, tq, hd), lambda b, h, qi: (b, h, qi, 0))

    return pl.pallas_call(
        functools.partial(_flash_attention_kernel, tk=tk, nk=nk),
        out_shape=jax.ShapeDtypeStruct((B, nH, T, hd), jnp.bfloat16),
        grid=grid,
        in_specs=[q_spec, kv_spec, kv_spec],
        out_specs=o_spec,
        compiler_params=pltpu.CompilerParams(
            dimension_semantics=("parallel", "parallel", "arbitrary"),
            vmem_limit_bytes=_VMEM_LIMIT),
    )(q, k, v)


# -------------- neck 3x3 conv: R output rows per step, 9 matmuls ------------ #

def _conv3x3_kernel(r0_ref, r1_ref, r2_ref, w_ref, o_ref, *, rr, wp):
    n_out = o_ref.shape[-1]
    acc = jnp.zeros((rr * wp, n_out), jnp.float32)
    bands = (r0_ref, r1_ref, r2_ref)
    for dy in range(3):
        band = bands[dy][0]                                 # (R, Wp+2, Cin) bf16
        for dx in range(3):
            tap = band[:, dx:dx + wp, :].reshape(rr * wp, -1)
            acc = acc + jnp.dot(tap, w_ref[dy * 3 + dx],
                                preferred_element_type=jnp.float32)
    o_ref[0] = acc.reshape(rr, wp, n_out).astype(o_ref.dtype)


def conv3x3_pallas(y, w, *, rows_target=8):
    """3x3 conv, padding=1, no bias. y: (B, Hp, Wp, Cin) f32, w: (9, Cin, Cout) bf16."""
    B, Hp, Wp, Cin = y.shape
    Cout = w.shape[-1]
    if w.dtype != jnp.bfloat16:
        w = w.astype(jnp.bfloat16)
    ypad = jnp.pad(y.astype(jnp.bfloat16), ((0, 0), (1, 1), (1, 1), (0, 0)))
    # three dy-shifted views -> every (b, i) block is a plain aligned R-row band
    shifted = [jax.lax.slice_in_dim(ypad, dy, dy + Hp, axis=1) for dy in range(3)]
    R = _pick_tile(Hp, rows_target, 1)

    band_spec = pl.BlockSpec((1, R, Wp + 2, Cin), lambda b, i: (b, i, 0, 0))
    return pl.pallas_call(
        functools.partial(_conv3x3_kernel, rr=R, wp=Wp),
        out_shape=jax.ShapeDtypeStruct((B, Hp, Wp, Cout), jnp.float32),
        grid=(B, Hp // R),
        in_specs=[band_spec, band_spec, band_spec,
                  pl.BlockSpec((9, Cin, Cout), lambda b, i: (0, 0, 0))],
        out_specs=pl.BlockSpec((1, R, Wp, Cout), lambda b, i: (b, i, 0, 0)),
        compiler_params=pltpu.CompilerParams(
            dimension_semantics=("parallel", "parallel"),
            vmem_limit_bytes=_VMEM_LIMIT),
    )(shifted[0], shifted[1], shifted[2], w)


# ------------------------------ parameters ---------------------------------- #

def init_params(key, cfg):
    D = cfg["embed_dim"]
    C = cfg["in_chans"]
    ps = cfg["patch_size"]
    O = cfg["out_chans"]
    nH = cfg["num_heads"]
    hidden = int(D * cfg["mlp_ratio"])
    Hp = cfg["img_size"] // ps
    scale = (D // nH) ** -0.5
    keys = iter(jax.random.split(key, 256))

    def w(shape, s=0.02):
        # weights stored bf16 (MXU-native); f32 accumulation happens in-kernel
        return (s * jax.random.normal(next(keys), shape, jnp.float32)).astype(jnp.bfloat16)

    params = dict(
        # Conv2d(k=ps, stride=ps) == patchify + linear; rows flattened in (c,py,px) order
        patch_w=w((C * ps * ps, D)),
        patch_b=jnp.zeros((D,), jnp.float32),
        pos_embed=0.02 * jax.random.normal(next(keys), (1, Hp, Hp, D), jnp.float32),
        blocks=[],
        neck_conv1_w=w((D, O)),                    # 1x1 conv, no bias
        neck_ln1_g=jnp.ones((O,), jnp.float32),
        neck_ln1_b=jnp.zeros((O,), jnp.float32),
        neck_conv2_w=w((9, O, O)),                 # 3x3 conv taps, (dy*3+dx, Cin, Cout)
        neck_ln2_g=jnp.ones((O,), jnp.float32),
        neck_ln2_b=jnp.zeros((O,), jnp.float32),
    )
    for _ in range(cfg["depth"]):
        # fused qkv projection weight (D, 3D); the 1/sqrt(hd) attention scale is
        # folded into the q columns (do the same when porting a torch checkpoint).
        w_qkv = 0.02 * jax.random.normal(next(keys), (D, 3 * D), jnp.float32)
        w_qkv = w_qkv.at[:, :D].multiply(scale)
        params["blocks"].append(dict(
            ln1_g=jnp.ones((D,), jnp.float32), ln1_b=jnp.zeros((D,), jnp.float32),
            qkv_w=w_qkv.astype(jnp.bfloat16),
            qkv_b=jnp.zeros((3 * D,), jnp.float32),
            proj_w=w((D, D)), proj_b=jnp.zeros((D,), jnp.float32),
            ln2_g=jnp.ones((D,), jnp.float32), ln2_b=jnp.zeros((D,), jnp.float32),
            fc1_w=w((D, hidden)), fc1_b=jnp.zeros((hidden,), jnp.float32),
            fc2_w=w((hidden, D)), fc2_b=jnp.zeros((D,), jnp.float32),
        ))
    return params


# ------------------------------ forward pass -------------------------------- #

def image_encoder_vit(x_nchw, params, *, cfg):
    B, C, H, W = x_nchw.shape
    ps = cfg["patch_size"]
    D = cfg["embed_dim"]
    nH = cfg["num_heads"]
    O = cfg["out_chans"]
    Hp, Wp = H // ps, W // ps
    T = Hp * Wp
    hd = D // nH

    # ---- patch embed: Conv2d(k=ps, stride=ps) == patchify (XLA glue) + Pallas matmul
    patches = (
        x_nchw.reshape(B, C, Hp, ps, Wp, ps)
        .transpose(0, 2, 4, 1, 3, 5)
        .reshape(B * T, C * ps * ps)
    )
    x = linear_pallas(patches, params["patch_w"], params["patch_b"])   # (B*T, D) f32
    x = x.reshape(B, Hp, Wp, D) + params["pos_embed"]                  # abs pos embed

    interm_embeddings = []
    for blk in params["blocks"]:
        x_flat = x.reshape(B * T, D)                                   # f32 residual stream

        # attention branch: LN -> fused qkv -> flash SDPA (head-major, KV-resident)
        # -> proj (+ fused residual)
        h1 = layernorm_pallas(x_flat, blk["ln1_g"], blk["ln1_b"], 1e-5,
                              out_dtype=jnp.bfloat16)
        qkv = linear_pallas(h1, blk["qkv_w"], blk["qkv_b"],
                            out_dtype=jnp.bfloat16)                    # (B*T, 3D)
        qkv = qkv.reshape(B, T, 3, nH, hd).transpose(2, 0, 3, 1, 4)    # (3,B,nH,T,hd)
        q, k, v = qkv[0], qkv[1], qkv[2]
        attn = attention_pallas(q, k, v)                               # (B,nH,T,hd) bf16
        attn = attn.transpose(0, 2, 1, 3).reshape(B * T, D)            # back to (B*T, D)
        x_flat = linear_pallas(attn, blk["proj_w"], blk["proj_b"],
                               residual=x_flat)                        # x + proj(attn), f32

        # MLP branch: LN -> fc1+GELU -> fc2 (+ fused residual)
        h2 = layernorm_pallas(x_flat, blk["ln2_g"], blk["ln2_b"], 1e-5,
                              out_dtype=jnp.bfloat16)
        hm = linear_pallas(h2, blk["fc1_w"], blk["fc1_b"], act="gelu",
                           out_dtype=jnp.bfloat16)
        x_flat = linear_pallas(hm, blk["fc2_w"], blk["fc2_b"], residual=x_flat)

        x = x_flat.reshape(B, Hp, Wp, D)
        # window_size == 0 for every block in this config -> every block is a
        # global-attention block and its output is collected (matches the module).
        interm_embeddings.append(x)

    # ---- neck: 1x1 conv -> LayerNorm2d -> 3x3 conv (pad=1) -> LayerNorm2d
    xf = x.reshape(B * T, D)
    y = linear_pallas(xf, params["neck_conv1_w"], None)                 # 1x1 conv, no bias
    y = layernorm_pallas(y, params["neck_ln1_g"], params["neck_ln1_b"], 1e-6)
    y = y.reshape(B, Hp, Wp, O)
    y = conv3x3_pallas(y, params["neck_conv2_w"])                       # 3x3 conv, no bias
    y = layernorm_pallas(y.reshape(B * T, O),
                         params["neck_ln2_g"], params["neck_ln2_b"], 1e-6)
    y = y.reshape(B, Hp, Wp, O).transpose(0, 3, 1, 2)                   # NCHW like PyTorch
    return y, interm_embeddings


# --------------------------------- main ------------------------------------- #

if __name__ == "__main__":
    # small but lane-dense test config (D=128 so the main stores stay 128-lane aligned)
    cfg = dict(
        img_size=32, patch_size=8, in_chans=3, embed_dim=128, depth=2,
        num_heads=4, mlp_ratio=4.0, out_chans=128,
    )
    key = jax.random.PRNGKey(0)
    kx, kp = jax.random.split(key)
    x = jax.random.normal(
        kx, (2, cfg["in_chans"], cfg["img_size"], cfg["img_size"]), jnp.float32
    )
    params = init_params(kp, cfg)

    fwd = jax.jit(functools.partial(image_encoder_vit, cfg=cfg))
    y, interm = fwd(x, params)
    jax.block_until_ready(y)
    jax.block_until_ready(interm)

    Hp = cfg["img_size"] // cfg["patch_size"]
    assert y.shape == (2, cfg["out_chans"], Hp, Hp)
    assert len(interm) == cfg["depth"]
    assert all(e.shape == (2, Hp, Hp, cfg["embed_dim"]) for e in interm)
    print("KERNEL_OK")
</pallas_src>

<mosaic_0001>
module attributes {stable_mosaic.version = 11 : i64} {
  func.func @_linear_resident_kernel(%arg0: i32, %arg1: memref<32x192xf32, #tpu.memory_space<vmem>>, %arg2: memref<192x128xbf16, #tpu.memory_space<vmem>>, %arg3: memref<1x128xf32, #tpu.memory_space<vmem>>, %arg4: memref<32x128xf32, #tpu.memory_space<vmem>>) attributes {dimension_semantics = [#tpu.dimension_semantics<parallel>], iteration_bounds = array<i64: 1>, scalar_prefetch = 0 : i64, scratch_operands = 0 : i64, tpu.core_type = #tpu.core_type<tc>, window_params = [{transform_indices = @transform_0, window_bounds = array<i64: 32, 192>}, {pipeline_mode = #tpu.pipeline_mode<synchronous>, transform_indices = @transform_1, window_bounds = array<i64: 192, 128>}, {pipeline_mode = #tpu.pipeline_mode<synchronous>, transform_indices = @transform_2, window_bounds = array<i64: 1, 128>}, {transform_indices = @transform_3, window_bounds = array<i64: 32, 128>}]} {
    %c0 = arith.constant 0 : index
    %c0_0 = arith.constant 0 : index
    %0 = vector.load %arg1[%c0, %c0_0] : memref<32x192xf32, #tpu.memory_space<vmem>>, vector<32x192xf32>
    %1 = arith.truncf %0 : vector<32x192xf32> to vector<32x192xbf16>
    %c0_1 = arith.constant 0 : index
    %c0_2 = arith.constant 0 : index
    %2 = vector.load %arg2[%c0_1, %c0_2] : memref<192x128xbf16, #tpu.memory_space<vmem>>, vector<192x128xbf16>
    %cst = arith.constant dense<0.000000e+00> : vector<32x128xf32>
    %3 = tpu.matmul %1, %2, %cst {dimension_numbers = #tpu.dot_dimension_numbers<[1], [0], [0], [1], [0, 0, 1, 1], [], []>} : vector<32x192xbf16>, vector<192x128xbf16>, vector<32x128xf32> -> vector<32x128xf32>
    %c0_3 = arith.constant 0 : index
    %c0_4 = arith.constant 0 : index
    %4 = vector.load %arg3[%c0_3, %c0_4] : memref<1x128xf32, #tpu.memory_space<vmem>>, vector<1x128xf32>
    %5 = vector.broadcast %4 : vector<1x128xf32> to vector<32x128xf32>
    %6 = arith.addf %3, %5 : vector<32x128xf32>
    %c0_5 = arith.constant 0 : index
    %c0_6 = arith.constant 0 : index
    %7 = vector.load %arg4[%c0_5, %c0_6] : memref<32x128xf32, #tpu.memory_space<vmem>>, vector<32x128xf32>
    tpu.vector_store %arg4[%c0_5, %c0_6], %6 {strides = array<i32>} : memref<32x128xf32, #tpu.memory_space<vmem>>, vector<32x128xf32>,
    return
  }
  func.func @transform_0(%arg0: i32) -> (i32, i32) {
    %c0_i32 = arith.constant 0 : i32
    %c0_i32_0 = arith.constant 0 : i32
    return %arg0, %c0_i32 : i32, i32
  }
  func.func @transform_1(%arg0: i32) -> (i32, i32) {
    %c0_i32 = arith.constant 0 : i32
    %c0_i32_0 = arith.constant 0 : i32
    %c0_i32_1 = arith.constant 0 : i32
    return %c0_i32, %c0_i32_0 : i32, i32
  }
  func.func @transform_2(%arg0: i32) -> (i32, i32) {
    %c0_i32 = arith.constant 0 : i32
    %c0_i32_0 = arith.constant 0 : i32
    %c0_i32_1 = arith.constant 0 : i32
    return %c0_i32, %c0_i32_0 : i32, i32
  }
  func.func @transform_3(%arg0: i32) -> (i32, i32) {
    %c0_i32 = arith.constant 0 : i32
    %c0_i32_0 = arith.constant 0 : i32
    return %arg0, %c0_i32 : i32, i32
  }
}

module attributes {stable_mosaic.version = 11 : i64} {
  func.func @_layernorm_kernel(%arg0: i32, %arg1: memref<32x128xf32, #tpu.memory_space<vmem>>, %arg2: memref<1x128xf32, #tpu.memory_space<vmem>>, %arg3: memref<1x128xf32, #tpu.memory_space<vmem>>, %arg4: memref<32x128xbf16, #tpu.memory_space<vmem>>) attributes {dimension_semantics = [#tpu.dimension_semantics<parallel>], iteration_bounds = array<i64: 1>, scalar_prefetch = 0 : i64, scratch_operands = 0 : i64, tpu.core_type = #tpu.core_type<tc>, window_params = [{transform_indices = @transform_0, window_bounds = array<i64: 32, 128>}, {pipeline_mode = #tpu.pipeline_mode<synchronous>, transform_indices = @transform_1, window_bounds = array<i64: 1, 128>}, {pipeline_mode = #tpu.pipeline_mode<synchronous>, transform_indices = @transform_2, window_bounds = array<i64: 1, 128>}, {transform_indices = @transform_3, window_bounds = array<i64: 32, 128>}]} {
    %c0 = arith.constant 0 : index
    %c0_0 = arith.constant 0 : index
    %0 = vector.load %arg1[%c0, %c0_0] : memref<32x128xf32, #tpu.memory_space<vmem>>, vector<32x128xf32>
    %cst = arith.constant dense<0.000000e+00> : vector<32xf32>
    %1 = vector.multi_reduction <add>, %0, %cst [1] : vector<32x128xf32> to vector<32xf32>
    %2 = vector.shape_cast %1 : vector<32xf32> to vector<32x1xf32>
    %cst_1 = arith.constant 1.280000e+02 : f32
    %3 = vector.broadcast %cst_1 : f32 to vector<32x1xf32>
    %4 = arith.divf %2, %3 : vector<32x1xf32>
    %5 = vector.broadcast %4 : vector<32x1xf32> to vector<32x128xf32>
    %6 = arith.subf %0, %5 : vector<32x128xf32>
    %7 = arith.mulf %6, %6 : vector<32x128xf32>
    %cst_2 = arith.constant dense<0.000000e+00> : vector<32xf32>
    %8 = vector.multi_reduction <add>, %7, %cst_2 [1] : vector<32x128xf32> to vector<32xf32>
    %9 = vector.shape_cast %8 : vector<32xf32> to vector<32x1xf32>
    %cst_3 = arith.constant 1.280000e+02 : f32
    %10 = vector.broadcast %cst_3 : f32 to vector<32x1xf32>
    %11 = arith.divf %9, %10 : vector<32x1xf32>
    %cst_4 = arith.constant 9.99999974E-6 : f32
    %12 = vector.broadcast %cst_4 : f32 to vector<32x1xf32>
    %13 = arith.addf %11, %12 : vector<32x1xf32>
    %14 = math.rsqrt %13 : vector<32x1xf32>
    %15 = vector.broadcast %14 : vector<32x1xf32> to vector<32x128xf32>
    %16 = arith.mulf %6, %15 : vector<32x128xf32>
    %c0_5 = arith.constant 0 : index
    %c0_6 = arith.constant 0 : index
    %17 = vector.load %arg2[%c0_5, %c0_6] : memref<1x128xf32, #tpu.memory_space<vmem>>, vector<1x128xf32>
    %18 = vector.broadcast %17 : vector<1x128xf32> to vector<32x128xf32>
    %19 = arith.mulf %16, %18 : vector<32x128xf32>
    %c0_7 = arith.constant 0 : index
    %c0_8 = arith.constant 0 : index
    %20 = vector.load %arg3[%c0_7, %c0_8] : memref<1x128xf32, #tpu.memory_space<vmem>>, vector<1x128xf32>
    %21 = vector.broadcast %20 : vector<1x128xf32> to vector<32x128xf32>
    %22 = arith.addf %19, %21 : vector<32x128xf32>
    %23 = arith.truncf %22 : vector<32x128xf32> to vector<32x128xbf16>
    %c0_9 = arith.constant 0 : index
    %c0_10 = arith.constant 0 : index
    %24 = vector.load %arg4[%c0_9, %c0_10] : memref<32x128xbf16, #tpu.memory_space<vmem>>, vector<32x128xbf16>
    tpu.vector_store %arg4[%c0_9, %c0_10], %23 {strides = array<i32>} : memref<32x128xbf16, #tpu.memory_space<vmem>>, vector<32x128xbf16>,
    return
  }
  func.func @transform_0(%arg0: i32) -> (i32, i32) {
    %c0_i32 = arith.constant 0 : i32
    %c0_i32_0 = arith.constant 0 : i32
    return %arg0, %c0_i32 : i32, i32
  }
  func.func @transform_1(%arg0: i32) -> (i32, i32) {
    %c0_i32 = arith.constant 0 : i32
    %c0_i32_0 = arith.constant 0 : i32
    %c0_i32_1 = arith.constant 0 : i32
    return %c0_i32, %c0_i32_0 : i32, i32
  }
  func.func @transform_2(%arg0: i32) -> (i32, i32) {
    %c0_i32 = arith.constant 0 : i32
    %c0_i32_0 = arith.constant 0 : i32
    %c0_i32_1 = arith.constant 0 : i32
    return %c0_i32, %c0_i32_0 : i32, i32
  }
  func.func @transform_3(%arg0: i32) -> (i32, i32) {
    %c0_i32 = arith.constant 0 : i32
    %c0_i32_0 = arith.constant 0 : i32
    return %arg0, %c0_i32 : i32, i32
  }
}

module attributes {stable_mosaic.version = 11 : i64} {
  func.func @_linear_resident_kernel(%arg0: i32, %arg1: memref<32x128xbf16, #tpu.memory_space<vmem>>, %arg2: memref<128x384xbf16, #tpu.memory_space<vmem>>, %arg3: memref<1x384xf32, #tpu.memory_space<vmem>>, %arg4: memref<32x384xbf16, #tpu.memory_space<vmem>>) attributes {dimension_semantics = [#tpu.dimension_semantics<parallel>], iteration_bounds = array<i64: 1>, scalar_prefetch = 0 : i64, scratch_operands = 0 : i64, tpu.core_type = #tpu.core_type<tc>, window_params = [{transform_indices = @transform_0, window_bounds = array<i64: 32, 128>}, {pipeline_mode = #tpu.pipeline_mode<synchronous>, transform_indices = @transform_1, window_bounds = array<i64: 128, 384>}, {pipeline_mode = #tpu.pipeline_mode<synchronous>, transform_indices = @transform_2, window_bounds = array<i64: 1, 384>}, {transform_indices = @transform_3, window_bounds = array<i64: 32, 384>}]} {
    %c0 = arith.constant 0 : index
    %c0_0 = arith.constant 0 : index
    %0 = vector.load %arg1[%c0, %c0_0] : memref<32x128xbf16, #tpu.memory_space<vmem>>, vector<32x128xbf16>
    %c0_1 = arith.constant 0 : index
    %c0_2 = arith.constant 0 : index
    %1 = vector.load %arg2[%c0_1, %c0_2] : memref<128x384xbf16, #tpu.memory_space<vmem>>, vector<128x384xbf16>
    %cst = arith.constant dense<0.000000e+00> : vector<32x384xf32>
    %2 = tpu.matmul %0, %1, %cst {dimension_numbers = #tpu.dot_dimension_numbers<[1], [0], [0], [1], [0, 0, 1, 1], [], []>} : vector<32x128xbf16>, vector<128x384xbf16>, vector<32x384xf32> -> vector<32x384xf32>
    %c0_3 = arith.constant 0 : index
    %c0_4 = arith.constant 0 : index
    %3 = vector.load %arg3[%c0_3, %c0_4] : memref<1x384xf32, #tpu.memory_space<vmem>>, vector<1x384xf32>
    %4 = vector.broadcast %3 : vector<1x384xf32> to vector<32x384xf32>
    %5 = arith.addf %2, %4 : vector<32x384xf32>
    %6 = arith.truncf %5 : vector<32x384xf32> to vector<32x384xbf16>
    %c0_5 = arith.constant 0 : index
    %c0_6 = arith.constant 0 : index
    %7 = vector.load %arg4[%c0_5, %c0_6] : memref<32x384xbf16, #tpu.memory_space<vmem>>, vector<32x384xbf16>
    tpu.vector_store %arg4[%c0_5, %c0_6], %6 {strides = array<i32>} : memref<32x384xbf16, #tpu.memory_space<vmem>>, vector<32x384xbf16>,
    return
  }
  func.func @transform_0(%arg0: i32) -> (i32, i32) {
    %c0_i32 = arith.constant 0 : i32
    %c0_i32_0 = arith.constant 0 : i32
    return %arg0, %c0_i32 : i32, i32
  }
  func.func @transform_1(%arg0: i32) -> (i32, i32) {
    %c0_i32 = arith.constant 0 : i32
    %c0_i32_0 = arith.constant 0 : i32
    %c0_i32_1 = arith.constant 0 : i32
    return %c0_i32, %c0_i32_0 : i32, i32
  }
  func.func @transform_2(%arg0: i32) -> (i32, i32) {
    %c0_i32 = arith.constant 0 : i32
    %c0_i32_0 = arith.constant 0 : i32
    %c0_i32_1 = arith.constant 0 : i32
    return %c0_i32, %c0_i32_0 : i32, i32
  }
  func.func @transform_3(%arg0: i32) -> (i32, i32) {
    %c0_i32 = arith.constant 0 : i32
    %c0_i32_0 = arith.constant 0 : i32
    return %arg0, %c0_i32 : i32, i32
  }
}

module attributes {stable_mosaic.version = 11 : i64} {
  func.func @_flash_attention_kernel(%arg0: i32, %arg1: i32, %arg2: i32, %arg3: memref<1x1x16x32xbf16, #tpu.memory_space<vmem>>, %arg4: memref<1x1x16x32xbf16, #tpu.memory_space<vmem>>, %arg5: memref<1x1x16x32xbf16, #tpu.memory_space<vmem>>, %arg6: memref<1x1x16x32xbf16, #tpu.memory_space<vmem>>) attributes {dimension_semantics = [#tpu.dimension_semantics<parallel>, #tpu.dimension_semantics<parallel>, #tpu.dimension_semantics<arbitrary>], iteration_bounds = array<i64: 2, 4, 1>, scalar_prefetch = 0 : i64, scratch_operands = 0 : i64, tpu.core_type = #tpu.core_type<tc>, window_params = [{transform_indices = @transform_0, window_bounds = array<i64: 1, 1, 16, 32>}, {transform_indices = @transform_1, window_bounds = array<i64: 1, 1, 16, 32>}, {transform_indices = @transform_2, window_bounds = array<i64: 1, 1, 16, 32>}, {transform_indices = @transform_3, window_bounds = array<i64: 1, 1, 16, 32>}]} {
    %c0 = arith.constant 0 : index
    %c0_0 = arith.constant 0 : index
    %c0_1 = arith.constant 0 : index
    %c0_2 = arith.constant 0 : index
    %0 = vector.load %arg3[%c0, %c0_0, %c0_1, %c0_2] : memref<1x1x16x32xbf16, #tpu.memory_space<vmem>>, vector<1x1x16x32xbf16>
    %1 = vector.shape_cast %0 : vector<1x1x16x32xbf16> to vector<16x32xbf16>
    %cst = arith.constant 0xFF800000 : f32
    %2 = vector.broadcast %cst : f32 to vector<16x1xf32>
    %cst_3 = arith.constant 0.000000e+00 : f32
    %3 = vector.broadcast %cst_3 : f32 to vector<16x1xf32>
    %cst_4 = arith.constant 0.000000e+00 : f32
    %4 = vector.broadcast %cst_4 : f32 to vector<16x32xf32>
    %c0_i32 = arith.constant 0 : i32
    %c16_i32 = arith.constant 16 : i32
    %5 = arith.muli %c0_i32, %c16_i32 : i32
    %6 = tpu.assume_multiple %5, 16 : i32
    %c0_5 = arith.constant 0 : index
    %c0_6 = arith.constant 0 : index
    %7 = arith.index_cast %6 : i32 to index
    %c0_7 = arith.constant 0 : index
    %8 = vector.load %arg4[%c0_5, %c0_6, %7, %c0_7] : memref<1x1x16x32xbf16, #tpu.memory_space<vmem>>, vector<1x1x16x32xbf16>
    %9 = vector.shape_cast %8 : vector<1x1x16x32xbf16> to vector<16x32xbf16>
    %c0_8 = arith.constant 0 : index
    %c0_9 = arith.constant 0 : index
    %10 = arith.index_cast %6 : i32 to index
    %c0_10 = arith.constant 0 : index
    %11 = vector.load %arg5[%c0_8, %c0_9, %10, %c0_10] : memref<1x1x16x32xbf16, #tpu.memory_space<vmem>>, vector<1x1x16x32xbf16>
    %12 = vector.shape_cast %11 : vector<1x1x16x32xbf16> to vector<16x32xbf16>
    %cst_11 = arith.constant dense<0.000000e+00> : vector<16x16xf32>
    %13 = tpu.matmul %1, %9, %cst_11 {dimension_numbers = #tpu.dot_dimension_numbers<[1], [1], [0], [0], [0, 0, 1, 0], [], []>} : vector<16x32xbf16>, vector<16x32xbf16>, vector<16x16xf32> -> vector<16x16xf32>
    %cst_12 = arith.constant dense<0xFF800000> : vector<16xf32>
    %14 = vector.multi_reduction <maximumf>, %13, %cst_12 [1] : vector<16x16xf32> to vector<16xf32>
    %15 = vector.shape_cast %14 : vector<16xf32> to vector<16x1xf32>
    %16 = arith.maximumf %2, %15 : vector<16x1xf32>
    %17 = arith.subf %2, %16 : vector<16x1xf32>
    %18 = math.exp %17 : vector<16x1xf32>
    %19 = vector.broadcast %16 : vector<16x1xf32> to vector<16x16xf32>
    %20 = arith.subf %13, %19 : vector<16x16xf32>
    %21 = math.exp %20 : vector<16x16xf32>
    %22 = arith.mulf %18, %3 : vector<16x1xf32>
    %cst_13 = arith.constant dense<0.000000e+00> : vector<16xf32>
    %23 = vector.multi_reduction <add>, %21, %cst_13 [1] : vector<16x16xf32> to vector<16xf32>
    %24 = vector.shape_cast %23 : vector<16xf32> to vector<16x1xf32>
    %25 = arith.addf %22, %24 : vector<16x1xf32>
    %26 = vector.broadcast %18 : vector<16x1xf32> to vector<16x32xf32>
    %27 = arith.mulf %26, %4 : vector<16x32xf32>
    %28 = arith.truncf %21 : vector<16x16xf32> to vector<16x16xbf16>
    %cst_14 = arith.constant dense<0.000000e+00> : vector<16x32xf32>
    %29 = tpu.matmul %28, %12, %cst_14 {dimension_numbers = #tpu.dot_dimension_numbers<[1], [0], [0], [1], [0, 0, 1, 1], [], []>} : vector<16x16xbf16>, vector<16x32xbf16>, vector<16x32xf32> -> vector<16x32xf32>
    %30 = arith.addf %27, %29 : vector<16x32xf32>
    %c1_i32 = arith.constant 1 : i32
    %31 = vector.broadcast %25 : vector<16x1xf32> to vector<16x32xf32>
    %32 = arith.divf %30, %31 : vector<16x32xf32>
    %33 = arith.truncf %32 : vector<16x32xf32> to vector<16x32xbf16>
    %c0_15 = arith.constant 0 : index
    %c0_16 = arith.constant 0 : index
    %c0_17 = arith.constant 0 : index
    %c0_18 = arith.constant 0 : index
    %34 = vector.load %arg6[%c0_15, %c0_16, %c0_17, %c0_18] : memref<1x1x16x32xbf16, #tpu.memory_space<vmem>>, vector<1x1x16x32xbf16>
    %35 = vector.shape_cast %34 : vector<1x1x16x32xbf16> to vector<16x32xbf16>
    %36 = vector.shape_cast %33 : vector<16x32xbf16> to vector<1x1x16x32xbf16>
    tpu.vector_store %arg6[%c0_15, %c0_16, %c0_17, %c0_18], %36 {strides = array<i32>} : memref<1x1x16x32xbf16, #tpu.memory_space<vmem>>, vector<1x1x16x32xbf16>,
    return
  }
  func.func @transform_0(%arg0: i32, %arg1: i32, %arg2: i32) -> (i32, i32, i32, i32) {
    %c0_i32 = arith.constant 0 : i32
    %c0_i32_0 = arith.constant 0 : i32
    return %arg0, %arg1, %arg2, %c0_i32 : i32, i32, i32, i32
  }
  func.func @transform_1(%arg0: i32, %arg1: i32, %arg2: i32) -> (i32, i32, i32, i32) {
    %c0_i32 = arith.constant 0 : i32
    %c0_i32_0 = arith.constant 0 : i32
    %c0_i32_1 = arith.constant 0 : i32
    return %arg0, %arg1, %c0_i32, %c0_i32_0 : i32, i32, i32, i32
  }
  func.func @transform_2(%arg0: i32, %arg1: i32, %arg2: i32) -> (i32, i32, i32, i32) {
    %c0_i32 = arith.constant 0 : i32
    %c0_i32_0 = arith.constant 0 : i32
    %c0_i32_1 = arith.constant 0 : i32
    return %arg0, %arg1, %c0_i32, %c0_i32_0 : i32, i32, i32, i32
  }
  func.func @transform_3(%arg0: i32, %arg1: i32, %arg2: i32) -> (i32, i32, i32, i32) {
    %c0_i32 = arith.constant 0 : i32
    %c0_i32_0 = arith.constant 0 : i32
    return %arg0, %arg1, %arg2, %c0_i32 : i32, i32, i32, i32
  }
}

module attributes {stable_mosaic.version = 11 : i64} {
  func.func @_linear_resident_kernel(%arg0: i32, %arg1: memref<32x128xbf16, #tpu.memory_space<vmem>>, %arg2: memref<128x512xbf16, #tpu.memory_space<vmem>>, %arg3: memref<1x512xf32, #tpu.memory_space<vmem>>, %arg4: memref<32x512xbf16, #tpu.memory_space<vmem>>) attributes {dimension_semantics = [#tpu.dimension_semantics<parallel>], iteration_bounds = array<i64: 1>, scalar_prefetch = 0 : i64, scratch_operands = 0 : i64, tpu.core_type = #tpu.core_type<tc>, window_params = [{transform_indices = @transform_0, window_bounds = array<i64: 32, 128>}, {pipeline_mode = #tpu.pipeline_mode<synchronous>, transform_indices = @transform_1, window_bounds = array<i64: 128, 512>}, {pipeline_mode = #tpu.pipeline_mode<synchronous>, transform_indices = @transform_2, window_bounds = array<i64: 1, 512>}, {transform_indices = @transform_3, window_bounds = array<i64: 32, 512>}]} {
    %c0 = arith.constant 0 : index
    %c0_0 = arith.constant 0 : index
    %0 = vector.load %arg1[%c0, %c0_0] : memref<32x128xbf16, #tpu.memory_space<vmem>>, vector<32x128xbf16>
    %c0_1 = arith.constant 0 : index
    %c0_2 = arith.constant 0 : index
    %1 = vector.load %arg2[%c0_1, %c0_2] : memref<128x512xbf16, #tpu.memory_space<vmem>>, vector<128x512xbf16>
    %cst = arith.constant dense<0.000000e+00> : vector<32x512xf32>
    %2 = tpu.matmul %0, %1, %cst {dimension_numbers = #tpu.dot_dimension_numbers<[1], [0], [0], [1], [0, 0, 1, 1], [], []>} : vector<32x128xbf16>, vector<128x512xbf16>, vector<32x512xf32> -> vector<32x512xf32>
    %c0_3 = arith.constant 0 : index
    %c0_4 = arith.constant 0 : index
    %3 = vector.load %arg3[%c0_3, %c0_4] : memref<1x512xf32, #tpu.memory_space<vmem>>, vector<1x512xf32>
    %4 = vector.broadcast %3 : vector<1x512xf32> to vector<32x512xf32>
    %5 = arith.addf %2, %4 : vector<32x512xf32>
    %cst_5 = arith.constant 5.000000e-01 : f32
    %6 = vector.broadcast %cst_5 : f32 to vector<32x512xf32>
    %7 = arith.mulf %6, %5 : vector<32x512xf32>
    %cst_6 = arith.constant 0.707106769 : f32
    %8 = vector.broadcast %cst_6 : f32 to vector<32x512xf32>
    %9 = arith.mulf %5, %8 : vector<32x512xf32>
    %10 = math.erf %9 : vector<32x512xf32>
    %cst_7 = arith.constant 1.000000e+00 : f32
    %11 = vector.broadcast %cst_7 : f32 to vector<32x512xf32>
    %12 = arith.addf %11, %10 : vector<32x512xf32>
    %13 = arith.mulf %7, %12 : vector<32x512xf32>
    %14 = arith.truncf %13 : vector<32x512xf32> to vector<32x512xbf16>
    %c0_8 = arith.constant 0 : index
    %c0_9 = arith.constant 0 : index
    %15 = vector.load %arg4[%c0_8, %c0_9] : memref<32x512xbf16, #tpu.memory_space<vmem>>, vector<32x512xbf16>
    tpu.vector_store %arg4[%c0_8, %c0_9], %14 {strides = array<i32>} : memref<32x512xbf16, #tpu.memory_space<vmem>>, vector<32x512xbf16>,
    return
  }
  func.func @transform_0(%arg0: i32) -> (i32, i32) {
    %c0_i32 = arith.constant 0 : i32
    %c0_i32_0 = arith.constant 0 : i32
    return %arg0, %c0_i32 : i32, i32
  }
  func.func @transform_1(%arg0: i32) -> (i32, i32) {
    %c0_i32 = arith.constant 0 : i32
    %c0_i32_0 = arith.constant 0 : i32
    %c0_i32_1 = arith.constant 0 : i32
    return %c0_i32, %c0_i32_0 : i32, i32
  }
  func.func @transform_2(%arg0: i32) -> (i32, i32) {
    %c0_i32 = arith.constant 0 : i32
    %c0_i32_0 = arith.constant 0 : i32
    %c0_i32_1 = arith.constant 0 : i32
    return %c0_i32, %c0_i32_0 : i32, i32
  }
  func.func @transform_3(%arg0: i32) -> (i32, i32) {
    %c0_i32 = arith.constant 0 : i32
    %c0_i32_0 = arith.constant 0 : i32
    return %arg0, %c0_i32 : i32, i32
  }
}

module attributes {stable_mosaic.version = 11 : i64} {
  func.func @_linear_resident_kernel(%arg0: i32, %arg1: memref<32x128xbf16, #tpu.memory_space<vmem>>, %arg2: memref<128x128xbf16, #tpu.memory_space<vmem>>, %arg3: memref<1x128xf32, #tpu.memory_space<vmem>>, %arg4: memref<32x128xf32, #tpu.memory_space<vmem>>, %arg5: memref<32x128xf32, #tpu.memory_space<vmem>>) attributes {dimension_semantics = [#tpu.dimension_semantics<parallel>], iteration_bounds = array<i64: 1>, scalar_prefetch = 0 : i64, scratch_operands = 0 : i64, tpu.core_type = #tpu.core_type<tc>, window_params = [{transform_indices = @transform_0, window_bounds = array<i64: 32, 128>}, {pipeline_mode = #tpu.pipeline_mode<synchronous>, transform_indices = @transform_1, window_bounds = array<i64: 128, 128>}, {pipeline_mode = #tpu.pipeline_mode<synchronous>, transform_indices = @transform_2, window_bounds = array<i64: 1, 128>}, {transform_indices = @transform_3, window_bounds = array<i64: 32, 128>}, {transform_indices = @transform_4, window_bounds = array<i64: 32, 128>}]} {
    %c0 = arith.constant 0 : index
    %c0_0 = arith.constant 0 : index
    %0 = vector.load %arg1[%c0, %c0_0] : memref<32x128xbf16, #tpu.memory_space<vmem>>, vector<32x128xbf16>
    %c0_1 = arith.constant 0 : index
    %c0_2 = arith.constant 0 : index
    %1 = vector.load %arg2[%c0_1, %c0_2] : memref<128x128xbf16, #tpu.memory_space<vmem>>, vector<128x128xbf16>
    %cst = arith.constant dense<0.000000e+00> : vector<32x128xf32>
    %2 = tpu.matmul %0, %1, %cst {dimension_numbers = #tpu.dot_dimension_numbers<[1], [0], [0], [1], [0, 0, 1, 1], [], []>} : vector<32x128xbf16>, vector<128x128xbf16>, vector<32x128xf32> -> vector<32x128xf32>
    %c0_3 = arith.constant 0 : index
    %c0_4 = arith.constant 0 : index
    %3 = vector.load %arg3[%c0_3, %c0_4] : memref<1x128xf32, #tpu.memory_space<vmem>>, vector<1x128xf32>
    %4 = vector.broadcast %3 : vector<1x128xf32> to vector<32x128xf32>
    %5 = arith.addf %2, %4 : vector<32x128xf32>
    %c0_5 = arith.constant 0 : index
    %c0_6 = arith.constant 0 : index
    %6 = vector.load %arg4[%c0_5, %c0_6] : memref<32x128xf32, #tpu.memory_space<vmem>>, vector<32x128xf32>
    %7 = arith.addf %5, %6 : vector<32x128xf32>
    %c0_7 = arith.constant 0 : index
    %c0_8 = arith.constant 0 : index
    %8 = vector.load %arg5[%c0_7, %c0_8] : memref<32x128xf32, #tpu.memory_space<vmem>>, vector<32x128xf32>
    tpu.vector_store %arg5[%c0_7, %c0_8], %7 {strides = array<i32>} : memref<32x128xf32, #tpu.memory_space<vmem>>, vector<32x128xf32>,
    return
  }
  func.func @transform_0(%arg0: i32) -> (i32, i32) {
    %c0_i32 = arith.constant 0 : i32
    %c0_i32_0 = arith.constant 0 : i32
    return %arg0, %c0_i32 : i32, i32
  }
  func.func @transform_1(%arg0: i32) -> (i32, i32) {
    %c0_i32 = arith.constant 0 : i32
    %c0_i32_0 = arith.constant 0 : i32
    %c0_i32_1 = arith.constant 0 : i32
    return %c0_i32, %c0_i32_0 : i32, i32
  }
  func.func @transform_2(%arg0: i32) -> (i32, i32) {
    %c0_i32 = arith.constant 0 : i32
    %c0_i32_0 = arith.constant 0 : i32
    %c0_i32_1 = arith.constant 0 : i32
    return %c0_i32, %c0_i32_0 : i32, i32
  }
  func.func @transform_3(%arg0: i32) -> (i32, i32) {
    %c0_i32 = arith.constant 0 : i32
    %c0_i32_0 = arith.constant 0 : i32
    return %arg0, %c0_i32 : i32, i32
  }
  func.func @transform_4(%arg0: i32) -> (i32, i32) {
    %c0_i32 = arith.constant 0 : i32
    %c0_i32_0 = arith.constant 0 : i32
    return %arg0, %c0_i32 : i32, i32
  }
}

module attributes {stable_mosaic.version = 11 : i64} {
  func.func @_linear_resident_kernel(%arg0: i32, %arg1: memref<32x512xbf16, #tpu.memory_space<vmem>>, %arg2: memref<512x128xbf16, #tpu.memory_space<vmem>>, %arg3: memref<1x128xf32, #tpu.memory_space<vmem>>, %arg4: memref<32x128xf32, #tpu.memory_space<vmem>>, %arg5: memref<32x128xf32, #tpu.memory_space<vmem>>) attributes {dimension_semantics = [#tpu.dimension_semantics<parallel>], iteration_bounds = array<i64: 1>, scalar_prefetch = 0 : i64, scratch_operands = 0 : i64, tpu.core_type = #tpu.core_type<tc>, window_params = [{transform_indices = @transform_0, window_bounds = array<i64: 32, 512>}, {pipeline_mode = #tpu.pipeline_mode<synchronous>, transform_indices = @transform_1, window_bounds = array<i64: 512, 128>}, {pipeline_mode = #tpu.pipeline_mode<synchronous>, transform_indices = @transform_2, window_bounds = array<i64: 1, 128>}, {transform_indices = @transform_3, window_bounds = array<i64: 32, 128>}, {transform_indices = @transform_4, window_bounds = array<i64: 32, 128>}]} {
    %c0 = arith.constant 0 : index
    %c0_0 = arith.constant 0 : index
    %0 = vector.load %arg1[%c0, %c0_0] : memref<32x512xbf16, #tpu.memory_space<vmem>>, vector<32x512xbf16>
    %c0_1 = arith.constant 0 : index
    %c0_2 = arith.constant 0 : index
    %1 = vector.load %arg2[%c0_1, %c0_2] : memref<512x128xbf16, #tpu.memory_space<vmem>>, vector<512x128xbf16>
    %cst = arith.constant dense<0.000000e+00> : vector<32x128xf32>
    %2 = tpu.matmul %0, %1, %cst {dimension_numbers = #tpu.dot_dimension_numbers<[1], [0], [0], [1], [0, 0, 1, 1], [], []>} : vector<32x512xbf16>, vector<512x128xbf16>, vector<32x128xf32> -> vector<32x128xf32>
    %c0_3 = arith.constant 0 : index
    %c0_4 = arith.constant 0 : index
    %3 = vector.load %arg3[%c0_3, %c0_4] : memref<1x128xf32, #tpu.memory_space<vmem>>, vector<1x128xf32>
    %4 = vector.broadcast %3 : vector<1x128xf32> to vector<32x128xf32>
    %5 = arith.addf %2, %4 : vector<32x128xf32>
    %c0_5 = arith.constant 0 : index
    %c0_6 = arith.constant 0 : index
    %6 = vector.load %arg4[%c0_5, %c0_6] : memref<32x128xf32, #tpu.memory_space<vmem>>, vector<32x128xf32>
    %7 = arith.addf %5, %6 : vector<32x128xf32>
    %c0_7 = arith.constant 0 : index
    %c0_8 = arith.constant 0 : index
    %8 = vector.load %arg5[%c0_7, %c0_8] : memref<32x128xf32, #tpu.memory_space<vmem>>, vector<32x128xf32>
    tpu.vector_store %arg5[%c0_7, %c0_8], %7 {strides = array<i32>} : memref<32x128xf32, #tpu.memory_space<vmem>>, vector<32x128xf32>,
    return
  }
  func.func @transform_0(%arg0: i32) -> (i32, i32) {
    %c0_i32 = arith.constant 0 : i32
    %c0_i32_0 = arith.constant 0 : i32
    return %arg0, %c0_i32 : i32, i32
  }
  func.func @transform_1(%arg0: i32) -> (i32, i32) {
    %c0_i32 = arith.constant 0 : i32
    %c0_i32_0 = arith.constant 0 : i32
    %c0_i32_1 = arith.constant 0 : i32
    return %c0_i32, %c0_i32_0 : i32, i32
  }
  func.func @transform_2(%arg0: i32) -> (i32, i32) {
    %c0_i32 = arith.constant 0 : i32
    %c0_i32_0 = arith.constant 0 : i32
    %c0_i32_1 = arith.constant 0 : i32
    return %c0_i32, %c0_i32_0 : i32, i32
  }
  func.func @transform_3(%arg0: i32) -> (i32, i32) {
    %c0_i32 = arith.constant 0 : i32
    %c0_i32_0 = arith.constant 0 : i32
    return %arg0, %c0_i32 : i32, i32
  }
  func.func @transform_4(%arg0: i32) -> (i32, i32) {
    %c0_i32 = arith.constant 0 : i32
    %c0_i32_0 = arith.constant 0 : i32
    return %arg0, %c0_i32 : i32, i32
  }
}

module attributes {stable_mosaic.version = 11 : i64} {
  func.func @_linear_resident_kernel(%arg0: i32, %arg1: memref<32x128xf32, #tpu.memory_space<vmem>>, %arg2: memref<128x128xbf16, #tpu.memory_space<vmem>>, %arg3: memref<1x128xf32, #tpu.memory_space<vmem>>, %arg4: memref<32x128xf32, #tpu.memory_space<vmem>>) attributes {dimension_semantics = [#tpu.dimension_semantics<parallel>], iteration_bounds = array<i64: 1>, scalar_prefetch = 0 : i64, scratch_operands = 0 : i64, tpu.core_type = #tpu.core_type<tc>, window_params = [{transform_indices = @transform_0, window_bounds = array<i64: 32, 128>}, {pipeline_mode = #tpu.pipeline_mode<synchronous>, transform_indices = @transform_1, window_bounds = array<i64: 128, 128>}, {pipeline_mode = #tpu.pipeline_mode<synchronous>, transform_indices = @transform_2, window_bounds = array<i64: 1, 128>}, {transform_indices = @transform_3, window_bounds = array<i64: 32, 128>}]} {
    %c0 = arith.constant 0 : index
    %c0_0 = arith.constant 0 : index
    %0 = vector.load %arg1[%c0, %c0_0] : memref<32x128xf32, #tpu.memory_space<vmem>>, vector<32x128xf32>
    %1 = arith.truncf %0 : vector<32x128xf32> to vector<32x128xbf16>
    %c0_1 = arith.constant 0 : index
    %c0_2 = arith.constant 0 : index
    %2 = vector.load %arg2[%c0_1, %c0_2] : memref<128x128xbf16, #tpu.memory_space<vmem>>, vector<128x128xbf16>
    %cst = arith.constant dense<0.000000e+00> : vector<32x128xf32>
    %3 = tpu.matmul %1, %2, %cst {dimension_numbers = #tpu.dot_dimension_numbers<[1], [0], [0], [1], [0, 0, 1, 1], [], []>} : vector<32x128xbf16>, vector<128x128xbf16>, vector<32x128xf32> -> vector<32x128xf32>
    %c0_3 = arith.constant 0 : index
    %c0_4 = arith.constant 0 : index
    %4 = vector.load %arg3[%c0_3, %c0_4] : memref<1x128xf32, #tpu.memory_space<vmem>>, vector<1x128xf32>
    %5 = vector.broadcast %4 : vector<1x128xf32> to vector<32x128xf32>
    %6 = arith.addf %3, %5 : vector<32x128xf32>
    %c0_5 = arith.constant 0 : index
    %c0_6 = arith.constant 0 : index
    %7 = vector.load %arg4[%c0_5, %c0_6] : memref<32x128xf32, #tpu.memory_space<vmem>>, vector<32x128xf32>
    tpu.vector_store %arg4[%c0_5, %c0_6], %6 {strides = array<i32>} : memref<32x128xf32, #tpu.memory_space<vmem>>, vector<32x128xf32>,
    return
  }
  func.func @transform_0(%arg0: i32) -> (i32, i32) {
    %c0_i32 = arith.constant 0 : i32
    %c0_i32_0 = arith.constant 0 : i32
    return %arg0, %c0_i32 : i32, i32
  }
  func.func @transform_1(%arg0: i32) -> (i32, i32) {
    %c0_i32 = arith.constant 0 : i32
    %c0_i32_0 = arith.constant 0 : i32
    %c0_i32_1 = arith.constant 0 : i32
    return %c0_i32, %c0_i32_0 : i32, i32
  }
  func.func @transform_2(%arg0: i32) -> (i32, i32) {
    %c0_i32 = arith.constant 0 : i32
    %c0_i32_0 = arith.constant 0 : i32
    %c0_i32_1 = arith.constant 0 : i32
    return %c0_i32, %c0_i32_0 : i32, i32
  }
  func.func @transform_3(%arg0: i32) -> (i32, i32) {
    %c0_i32 = arith.constant 0 : i32
    %c0_i32_0 = arith.constant 0 : i32
    return %arg0, %c0_i32 : i32, i32
  }
}

module attributes {stable_mosaic.version = 11 : i64} {
  func.func @_layernorm_kernel(%arg0: i32, %arg1: memref<32x128xf32, #tpu.memory_space<vmem>>, %arg2: memref<1x128xf32, #tpu.memory_space<vmem>>, %arg3: memref<1x128xf32, #tpu.memory_space<vmem>>, %arg4: memref<32x128xf32, #tpu.memory_space<vmem>>) attributes {dimension_semantics = [#tpu.dimension_semantics<parallel>], iteration_bounds = array<i64: 1>, scalar_prefetch = 0 : i64, scratch_operands = 0 : i64, tpu.core_type = #tpu.core_type<tc>, window_params = [{transform_indices = @transform_0, window_bounds = array<i64: 32, 128>}, {pipeline_mode = #tpu.pipeline_mode<synchronous>, transform_indices = @transform_1, window_bounds = array<i64: 1, 128>}, {pipeline_mode = #tpu.pipeline_mode<synchronous>, transform_indices = @transform_2, window_bounds = array<i64: 1, 128>}, {transform_indices = @transform_3, window_bounds = array<i64: 32, 128>}]} {
    %c0 = arith.constant 0 : index
    %c0_0 = arith.constant 0 : index
    %0 = vector.load %arg1[%c0, %c0_0] : memref<32x128xf32, #tpu.memory_space<vmem>>, vector<32x128xf32>
    %cst = arith.constant dense<0.000000e+00> : vector<32xf32>
    %1 = vector.multi_reduction <add>, %0, %cst [1] : vector<32x128xf32> to vector<32xf32>
    %2 = vector.shape_cast %1 : vector<32xf32> to vector<32x1xf32>
    %cst_1 = arith.constant 1.280000e+02 : f32
    %3 = vector.broadcast %cst_1 : f32 to vector<32x1xf32>
    %4 = arith.divf %2, %3 : vector<32x1xf32>
    %5 = vector.broadcast %4 : vector<32x1xf32> to vector<32x128xf32>
    %6 = arith.subf %0, %5 : vector<32x128xf32>
    %7 = arith.mulf %6, %6 : vector<32x128xf32>
    %cst_2 = arith.constant dense<0.000000e+00> : vector<32xf32>
    %8 = vector.multi_reduction <add>, %7, %cst_2 [1] : vector<32x128xf32> to vector<32xf32>
    %9 = vector.shape_cast %8 : vector<32xf32> to vector<32x1xf32>
    %cst_3 = arith.constant 1.280000e+02 : f32
    %10 = vector.broadcast %cst_3 : f32 to vector<32x1xf32>
    %11 = arith.divf %9, %10 : vector<32x1xf32>
    %cst_4 = arith.constant 9.99999997E-7 : f32
    %12 = vector.broadcast %cst_4 : f32 to vector<32x1xf32>
    %13 = arith.addf %11, %12 : vector<32x1xf32>
    %14 = math.rsqrt %13 : vector<32x1xf32>
    %15 = vector.broadcast %14 : vector<32x1xf32> to vector<32x128xf32>
    %16 = arith.mulf %6, %15 : vector<32x128xf32>
    %c0_5 = arith.constant 0 : index
    %c0_6 = arith.constant 0 : index
    %17 = vector.load %arg2[%c0_5, %c0_6] : memref<1x128xf32, #tpu.memory_space<vmem>>, vector<1x128xf32>
    %18 = vector.broadcast %17 : vector<1x128xf32> to vector<32x128xf32>
    %19 = arith.mulf %16, %18 : vector<32x128xf32>
    %c0_7 = arith.constant 0 : index
    %c0_8 = arith.constant 0 : index
    %20 = vector.load %arg3[%c0_7, %c0_8] : memref<1x128xf32, #tpu.memory_space<vmem>>, vector<1x128xf32>
    %21 = vector.broadcast %20 : vector<1x128xf32> to vector<32x128xf32>
    %22 = arith.addf %19, %21 : vector<32x128xf32>
    %c0_9 = arith.constant 0 : index
    %c0_10 = arith.constant 0 : index
    %23 = vector.load %arg4[%c0_9, %c0_10] : memref<32x128xf32, #tpu.memory_space<vmem>>, vector<32x128xf32>
    tpu.vector_store %arg4[%c0_9, %c0_10], %22 {strides = array<i32>} : memref<32x128xf32, #tpu.memory_space<vmem>>, vector<32x128xf32>,
    return
  }
  func.func @transform_0(%arg0: i32) -> (i32, i32) {
    %c0_i32 = arith.constant 0 : i32
    %c0_i32_0 = arith.constant 0 : i32
    return %arg0, %c0_i32 : i32, i32
  }
  func.func @transform_1(%arg0: i32) -> (i32, i32) {
    %c0_i32 = arith.constant 0 : i32
    %c0_i32_0 = arith.constant 0 : i32
    %c0_i32_1 = arith.constant 0 : i32
    return %c0_i32, %c0_i32_0 : i32, i32
  }
  func.func @transform_2(%arg0: i32) -> (i32, i32) {
    %c0_i32 = arith.constant 0 : i32
    %c0_i32_0 = arith.constant 0 : i32
    %c0_i32_1 = arith.constant 0 : i32
    return %c0_i32, %c0_i32_0 : i32, i32
  }
  func.func @transform_3(%arg0: i32) -> (i32, i32) {
    %c0_i32 = arith.constant 0 : i32
    %c0_i32_0 = arith.constant 0 : i32
    return %arg0, %c0_i32 : i32, i32
  }
}

module attributes {stable_mosaic.version = 11 : i64} {
  func.func @_conv3x3_kernel(%arg0: i32, %arg1: i32, %arg2: memref<1x4x6x128xbf16, #tpu.memory_space<vmem>>, %arg3: memref<1x4x6x128xbf16, #tpu.memory_space<vmem>>, %arg4: memref<1x4x6x128xbf16, #tpu.memory_space<vmem>>, %arg5: memref<9x128x128xbf16, #tpu.memory_space<vmem>>, %arg6: memref<1x4x4x128xf32, #tpu.memory_space<vmem>>) attributes {dimension_semantics = [#tpu.dimension_semantics<parallel>, #tpu.dimension_semantics<parallel>], iteration_bounds = array<i64: 2, 1>, scalar_prefetch = 0 : i64, scratch_operands = 0 : i64, tpu.core_type = #tpu.core_type<tc>, window_params = [{transform_indices = @transform_0, window_bounds = array<i64: 1, 4, 6, 128>}, {transform_indices = @transform_1, window_bounds = array<i64: 1, 4, 6, 128>}, {transform_indices = @transform_2, window_bounds = array<i64: 1, 4, 6, 128>}, {pipeline_mode = #tpu.pipeline_mode<synchronous>, transform_indices = @transform_3, window_bounds = array<i64: 9, 128, 128>}, {transform_indices = @transform_4, window_bounds = array<i64: 1, 4, 4, 128>}]} {
    %cst = arith.constant 0.000000e+00 : f32
    %0 = vector.broadcast %cst : f32 to vector<16x128xf32>
    %c0 = arith.constant 0 : index
    %c0_0 = arith.constant 0 : index
    %c0_1 = arith.constant 0 : index
    %c0_2 = arith.constant 0 : index
    %1 = vector.load %arg2[%c0, %c0_0, %c0_1, %c0_2] : memref<1x4x6x128xbf16, #tpu.memory_space<vmem>>, vector<1x4x6x128xbf16>
    %2 = vector.shape_cast %1 : vector<1x4x6x128xbf16> to vector<4x6x128xbf16>
    %3 = vector.extract_strided_slice %2 {offsets = [0, 0, 0], sizes = [4, 4, 128], strides = [1, 1, 1]} : vector<4x6x128xbf16> to vector<4x4x128xbf16>
    %4 = vector.shape_cast %3 : vector<4x4x128xbf16> to vector<16x128xbf16>
    %c0_3 = arith.constant 0 : index
    %c0_4 = arith.constant 0 : index
    %c0_5 = arith.constant 0 : index
    %5 = vector.load %arg5[%c0_3, %c0_4, %c0_5] : memref<9x128x128xbf16, #tpu.memory_space<vmem>>, vector<1x128x128xbf16>
    %6 = vector.shape_cast %5 : vector<1x128x128xbf16> to vector<128x128xbf16>
    %cst_6 = arith.constant dense<0.000000e+00> : vector<16x128xf32>
    %7 = tpu.matmul %4, %6, %cst_6 {dimension_numbers = #tpu.dot_dimension_numbers<[1], [0], [0], [1], [0, 0, 1, 1], [], []>} : vector<16x128xbf16>, vector<128x128xbf16>, vector<16x128xf32> -> vector<16x128xf32>
    %8 = arith.addf %0, %7 : vector<16x128xf32>
    %9 = vector.extract_strided_slice %2 {offsets = [0, 1, 0], sizes = [4, 4, 128], strides = [1, 1, 1]} : vector<4x6x128xbf16> to vector<4x4x128xbf16>
    %10 = vector.shape_cast %9 : vector<4x4x128xbf16> to vector<16x128xbf16>
    %c1 = arith.constant 1 : index
    %c0_7 = arith.constant 0 : index
    %c0_8 = arith.constant 0 : index
    %11 = vector.load %arg5[%c1, %c0_7, %c0_8] : memref<9x128x128xbf16, #tpu.memory_space<vmem>>, vector<1x128x128xbf16>
    %12 = vector.shape_cast %11 : vector<1x128x128xbf16> to vector<128x128xbf16>
    %cst_9 = arith.constant dense<0.000000e+00> : vector<16x128xf32>
    %13 = tpu.matmul %10, %12, %cst_9 {dimension_numbers = #tpu.dot_dimension_numbers<[1], [0], [0], [1], [0, 0, 1, 1], [], []>} : vector<16x128xbf16>, vector<128x128xbf16>, vector<16x128xf32> -> vector<16x128xf32>
    %14 = arith.addf %8, %13 : vector<16x128xf32>
    %15 = vector.extract_strided_slice %2 {offsets = [0, 2, 0], sizes = [4, 4, 128], strides = [1, 1, 1]} : vector<4x6x128xbf16> to vector<4x4x128xbf16>
    %16 = vector.shape_cast %15 : vector<4x4x128xbf16> to vector<16x128xbf16>
    %c2 = arith.constant 2 : index
    %c0_10 = arith.constant 0 : index
    %c0_11 = arith.constant 0 : index
    %17 = vector.load %arg5[%c2, %c0_10, %c0_11] : memref<9x128x128xbf16, #tpu.memory_space<vmem>>, vector<1x128x128xbf16>
    %18 = vector.shape_cast %17 : vector<1x128x128xbf16> to vector<128x128xbf16>
    %cst_12 = arith.constant dense<0.000000e+00> : vector<16x128xf32>
    %19 = tpu.matmul %16, %18, %cst_12 {dimension_numbers = #tpu.dot_dimension_numbers<[1], [0], [0], [1], [0, 0, 1, 1], [], []>} : vector<16x128xbf16>, vector<128x128xbf16>, vector<16x128xf32> -> vector<16x128xf32>
    %20 = arith.addf %14, %19 : vector<16x128xf32>
    %c0_13 = arith.constant 0 : index
    %c0_14 = arith.constant 0 : index
    %c0_15 = arith.constant 0 : index
    %c0_16 = arith.constant 0 : index
    %21 = vector.load %arg3[%c0_13, %c0_14, %c0_15, %c0_16] : memref<1x4x6x128xbf16, #tpu.memory_space<vmem>>, vector<1x4x6x128xbf16>
    %22 = vector.shape_cast %21 : vector<1x4x6x128xbf16> to vector<4x6x128xbf16>
    %23 = vector.extract_strided_slice %22 {offsets = [0, 0, 0], sizes = [4, 4, 128], strides = [1, 1, 1]} : vector<4x6x128xbf16> to vector<4x4x128xbf16>
    %24 = vector.shape_cast %23 : vector<4x4x128xbf16> to vector<16x128xbf16>
    %c3 = arith.constant 3 : index
    %c0_17 = arith.constant 0 : index
    %c0_18 = arith.constant 0 : index
    %25 = vector.load %arg5[%c3, %c0_17, %c0_18] : memref<9x128x128xbf16, #tpu.memory_space<vmem>>, vector<1x128x128xbf16>
    %26 = vector.shape_cast %25 : vector<1x128x128xbf16> to vector<128x128xbf16>
    %cst_19 = arith.constant dense<0.000000e+00> : vector<16x128xf32>
    %27 = tpu.matmul %24, %26, %cst_19 {dimension_numbers = #tpu.dot_dimension_numbers<[1], [0], [0], [1], [0, 0, 1, 1], [], []>} : vector<16x128xbf16>, vector<128x128xbf16>, vector<16x128xf32> -> vector<16x128xf32>
    %28 = arith.addf %20, %27 : vector<16x128xf32>
    %29 = vector.extract_strided_slice %22 {offsets = [0, 1, 0], sizes = [4, 4, 128], strides = [1, 1, 1]} : vector<4x6x128xbf16> to vector<4x4x128xbf16>
    %30 = vector.shape_cast %29 : vector<4x4x128xbf16> to vector<16x128xbf16>
    %c4 = arith.constant 4 : index
    %c0_20 = arith.constant 0 : index
    %c0_21 = arith.constant 0 : index
    %31 = vector.load %arg5[%c4, %c0_20, %c0_21] : memref<9x128x128xbf16, #tpu.memory_space<vmem>>, vector<1x128x128xbf16>
    %32 = vector.shape_cast %31 : vector<1x128x128xbf16> to vector<128x128xbf16>
    %cst_22 = arith.constant dense<0.000000e+00> : vector<16x128xf32>
    %33 = tpu.matmul %30, %32, %cst_22 {dimension_numbers = #tpu.dot_dimension_numbers<[1], [0], [0], [1], [0, 0, 1, 1], [], []>} : vector<16x128xbf16>, vector<128x128xbf16>, vector<16x128xf32> -> vector<16x128xf32>
    %34 = arith.addf %28, %33 : vector<16x128xf32>
    %35 = vector.extract_strided_slice %22 {offsets = [0, 2, 0], sizes = [4, 4, 128], strides = [1, 1, 1]} : vector<4x6x128xbf16> to vector<4x4x128xbf16>
    %36 = vector.shape_cast %35 : vector<4x4x128xbf16> to vector<16x128xbf16>
    %c5 = arith.constant 5 : index
    %c0_23 = arith.constant 0 : index
    %c0_24 = arith.constant 0 : index
    %37 = vector.load %arg5[%c5, %c0_23, %c0_24] : memref<9x128x128xbf16, #tpu.memory_space<vmem>>, vector<1x128x128xbf16>
    %38 = vector.shape_cast %37 : vector<1x128x128xbf16> to vector<128x128xbf16>
    %cst_25 = arith.constant dense<0.000000e+00> : vector<16x128xf32>
    %39 = tpu.matmul %36, %38, %cst_25 {dimension_numbers = #tpu.dot_dimension_numbers<[1], [0], [0], [1], [0, 0, 1, 1], [], []>} : vector<16x128xbf16>, vector<128x128xbf16>, vector<16x128xf32> -> vector<16x128xf32>
    %40 = arith.addf %34, %39 : vector<16x128xf32>
    %c0_26 = arith.constant 0 : index
    %c0_27 = arith.constant 0 : index
    %c0_28 = arith.constant 0 : index
    %c0_29 = arith.constant 0 : index
    %41 = vector.load %arg4[%c0_26, %c0_27, %c0_28, %c0_29] : memref<1x4x6x128xbf16, #tpu.memory_space<vmem>>, vector<1x4x6x128xbf16>
    %42 = vector.shape_cast %41 : vector<1x4x6x128xbf16> to vector<4x6x128xbf16>
    %43 = vector.extract_strided_slice %42 {offsets = [0, 0, 0], sizes = [4, 4, 128], strides = [1, 1, 1]} : vector<4x6x128xbf16> to vector<4x4x128xbf16>
    %44 = vector.shape_cast %43 : vector<4x4x128xbf16> to vector<16x128xbf16>
    %c6 = arith.constant 6 : index
    %c0_30 = arith.constant 0 : index
    %c0_31 = arith.constant 0 : index
    %45 = vector.load %arg5[%c6, %c0_30, %c0_31] : memref<9x128x128xbf16, #tpu.memory_space<vmem>>, vector<1x128x128xbf16>
    %46 = vector.shape_cast %45 : vector<1x128x128xbf16> to vector<128x128xbf16>
    %cst_32 = arith.constant dense<0.000000e+00> : vector<16x128xf32>
    %47 = tpu.matmul %44, %46, %cst_32 {dimension_numbers = #tpu.dot_dimension_numbers<[1], [0], [0], [1], [0, 0, 1, 1], [], []>} : vector<16x128xbf16>, vector<128x128xbf16>, vector<16x128xf32> -> vector<16x128xf32>
    %48 = arith.addf %40, %47 : vector<16x128xf32>
    %49 = vector.extract_strided_slice %42 {offsets = [0, 1, 0], sizes = [4, 4, 128], strides = [1, 1, 1]} : vector<4x6x128xbf16> to vector<4x4x128xbf16>
    %50 = vector.shape_cast %49 : vector<4x4x128xbf16> to vector<16x128xbf16>
    %c7 = arith.constant 7 : index
    %c0_33 = arith.constant 0 : index
    %c0_34 = arith.constant 0 : index
    %51 = vector.load %arg5[%c7, %c0_33, %c0_34] : memref<9x128x128xbf16, #tpu.memory_space<vmem>>, vector<1x128x128xbf16>
    %52 = vector.shape_cast %51 : vector<1x128x128xbf16> to vector<128x128xbf16>
    %cst_35 = arith.constant dense<0.000000e+00> : vector<16x128xf32>
    %53 = tpu.matmul %50, %52, %cst_35 {dimension_numbers = #tpu.dot_dimension_numbers<[1], [0], [0], [1], [0, 0, 1, 1], [], []>} : vector<16x128xbf16>, vector<128x128xbf16>, vector<16x128xf32> -> vector<16x128xf32>
    %54 = arith.addf %48, %53 : vector<16x128xf32>
    %55 = vector.extract_strided_slice %42 {offsets = [0, 2, 0], sizes = [4, 4, 128], strides = [1, 1, 1]} : vector<4x6x128xbf16> to vector<4x4x128xbf16>
    %56 = vector.shape_cast %55 : vector<4x4x128xbf16> to vector<16x128xbf16>
    %c8 = arith.constant 8 : index
    %c0_36 = arith.constant 0 : index
    %c0_37 = arith.constant 0 : index
    %57 = vector.load %arg5[%c8, %c0_36, %c0_37] : memref<9x128x128xbf16, #tpu.memory_space<vmem>>, vector<1x128x128xbf16>
    %58 = vector.shape_cast %57 : vector<1x128x128xbf16> to vector<128x128xbf16>
    %cst_38 = arith.constant dense<0.000000e+00> : vector<16x128xf32>
    %59 = tpu.matmul %56, %58, %cst_38 {dimension_numbers = #tpu.dot_dimension_numbers<[1], [0], [0], [1], [0, 0, 1, 1], [], []>} : vector<16x128xbf16>, vector<128x128xbf16>, vector<16x128xf32> -> vector<16x128xf32>
    %60 = arith.addf %54, %59 : vector<16x128xf32>
    %61 = vector.shape_cast %60 : vector<16x128xf32> to vector<4x4x128xf32>
    %c0_39 = arith.constant 0 : index
    %c0_40 = arith.constant 0 : index
    %c0_41 = arith.constant 0 : index
    %c0_42 = arith.constant 0 : index
    %62 = vector.load %arg6[%c0_39, %c0_40, %c0_41, %c0_42] : memref<1x4x4x128xf32, #tpu.memory_space<vmem>>, vector<1x4x4x128xf32>
    %63 = vector.shape_cast %62 : vector<1x4x4x128xf32> to vector<4x4x128xf32>
    %64 = vector.shape_cast %61 : vector<4x4x128xf32> to vector<1x4x4x128xf32>
    tpu.vector_store %arg6[%c0_39, %c0_40, %c0_41, %c0_42], %64 {strides = array<i32>} : memref<1x4x4x128xf32, #tpu.memory_space<vmem>>, vector<1x4x4x128xf32>,
    return
  }
  func.func @transform_0(%arg0: i32, %arg1: i32) -> (i32, i32, i32, i32) {
    %c0_i32 = arith.constant 0 : i32
    %c0_i32_0 = arith.constant 0 : i32
    %c0_i32_1 = arith.constant 0 : i32
    return %arg0, %arg1, %c0_i32, %c0_i32_0 : i32, i32, i32, i32
  }
  func.func @transform_1(%arg0: i32, %arg1: i32) -> (i32, i32, i32, i32) {
    %c0_i32 = arith.constant 0 : i32
    %c0_i32_0 = arith.constant 0 : i32
    %c0_i32_1 = arith.constant 0 : i32
    return %arg0, %arg1, %c0_i32, %c0_i32_0 : i32, i32, i32, i32
  }
  func.func @transform_2(%arg0: i32, %arg1: i32) -> (i32, i32, i32, i32) {
    %c0_i32 = arith.constant 0 : i32
    %c0_i32_0 = arith.constant 0 : i32
    %c0_i32_1 = arith.constant 0 : i32
    return %arg0, %arg1, %c0_i32, %c0_i32_0 : i32, i32, i32, i32
  }
  func.func @transform_3(%arg0: i32, %arg1: i32) -> (i32, i32, i32) {
    %c0_i32 = arith.constant 0 : i32
    %c0_i32_0 = arith.constant 0 : i32
    %c0_i32_1 = arith.constant 0 : i32
    %c0_i32_2 = arith.constant 0 : i32
    return %c0_i32, %c0_i32_0, %c0_i32_1 : i32, i32, i32
  }
  func.func @transform_4(%arg0: i32, %arg1: i32) -> (i32, i32, i32, i32) {
    %c0_i32 = arith.constant 0 : i32
    %c0_i32_0 = arith.constant 0 : i32
    %c0_i32_1 = arith.constant 0 : i32
    return %arg0, %arg1, %c0_i32, %c0_i32_0 : i32, i32, i32, i32
  }
}

module attributes {stable_mosaic.version = 11 : i64} {
  func.func @_layernorm_kernel(%arg0: i32, %arg1: memref<32x128xf32, #tpu.memory_space<vmem>>, %arg2: memref<1x128xf32, #tpu.memory_space<vmem>>, %arg3: memref<1x128xf32, #tpu.memory_space<vmem>>, %arg4: memref<32x128xf32, #tpu.memory_space<vmem>>) attributes {dimension_semantics = [#tpu.dimension_semantics<parallel>], iteration_bounds = array<i64: 1>, scalar_prefetch = 0 : i64, scratch_operands = 0 : i64, tpu.core_type = #tpu.core_type<tc>, window_params = [{transform_indices = @transform_0, window_bounds = array<i64: 32, 128>}, {pipeline_mode = #tpu.pipeline_mode<synchronous>, transform_indices = @transform_1, window_bounds = array<i64: 1, 128>}, {pipeline_mode = #tpu.pipeline_mode<synchronous>, transform_indices = @transform_2, window_bounds = array<i64: 1, 128>}, {transform_indices = @transform_3, window_bounds = array<i64: 32, 128>}]} {
    %c0 = arith.constant 0 : index
    %c0_0 = arith.constant 0 : index
    %0 = vector.load %arg1[%c0, %c0_0] : memref<32x128xf32, #tpu.memory_space<vmem>>, vector<32x128xf32>
    %cst = arith.constant dense<0.000000e+00> : vector<32xf32>
    %1 = vector.multi_reduction <add>, %0, %cst [1] : vector<32x128xf32> to vector<32xf32>
    %2 = vector.shape_cast %1 : vector<32xf32> to vector<32x1xf32>
    %cst_1 = arith.constant 1.280000e+02 : f32
    %3 = vector.broadcast %cst_1 : f32 to vector<32x1xf32>
    %4 = arith.divf %2, %3 : vector<32x1xf32>
    %5 = vector.broadcast %4 : vector<32x1xf32> to vector<32x128xf32>
    %6 = arith.subf %0, %5 : vector<32x128xf32>
    %7 = arith.mulf %6, %6 : vector<32x128xf32>
    %cst_2 = arith.constant dense<0.000000e+00> : vector<32xf32>
    %8 = vector.multi_reduction <add>, %7, %cst_2 [1] : vector<32x128xf32> to vector<32xf32>
    %9 = vector.shape_cast %8 : vector<32xf32> to vector<32x1xf32>
    %cst_3 = arith.constant 1.280000e+02 : f32
    %10 = vector.broadcast %cst_3 : f32 to vector<32x1xf32>
    %11 = arith.divf %9, %10 : vector<32x1xf32>
    %cst_4 = arith.constant 9.99999997E-7 : f32
    %12 = vector.broadcast %cst_4 : f32 to vector<32x1xf32>
    %13 = arith.addf %11, %12 : vector<32x1xf32>
    %14 = math.rsqrt %13 : vector<32x1xf32>
    %15 = vector.broadcast %14 : vector<32x1xf32> to vector<32x128xf32>
    %16 = arith.mulf %6, %15 : vector<32x128xf32>
    %c0_5 = arith.constant 0 : index
    %c0_6 = arith.constant 0 : index
    %17 = vector.load %arg2[%c0_5, %c0_6] : memref<1x128xf32, #tpu.memory_space<vmem>>, vector<1x128xf32>
    %18 = vector.broadcast %17 : vector<1x128xf32> to vector<32x128xf32>
    %19 = arith.mulf %16, %18 : vector<32x128xf32>
    %c0_7 = arith.constant 0 : index
    %c0_8 = arith.constant 0 : index
    %20 = vector.load %arg3[%c0_7, %c0_8] : memref<1x128xf32, #tpu.memory_space<vmem>>, vector<1x128xf32>
    %21 = vector.broadcast %20 : vector<1x128xf32> to vector<32x128xf32>
    %22 = arith.addf %19, %21 : vector<32x128xf32>
    %c0_9 = arith.constant 0 : index
    %c0_10 = arith.constant 0 : index
    %23 = vector.load %arg4[%c0_9, %c0_10] : memref<32x128xf32, #tpu.memory_space<vmem>>, vector<32x128xf32>
    tpu.vector_store %arg4[%c0_9, %c0_10], %22 {strides = array<i32>} : memref<32x128xf32, #tpu.memory_space<vmem>>, vector<32x128xf32>,
    return
  }
  func.func @transform_0(%arg0: i32) -> (i32, i32) {
    %c0_i32 = arith.constant 0 : i32
    %c0_i32_0 = arith.constant 0 : i32
    return %arg0, %c0_i32 : i32, i32
  }
  func.func @transform_1(%arg0: i32) -> (i32, i32) {
    %c0_i32 = arith.constant 0 : i32
    %c0_i32_0 = arith.constant 0 : i32
    %c0_i32_1 = arith.constant 0 : i32
    return %c0_i32, %c0_i32_0 : i32, i32
  }
  func.func @transform_2(%arg0: i32) -> (i32, i32) {
    %c0_i32 = arith.constant 0 : i32
    %c0_i32_0 = arith.constant 0 : i32
    %c0_i32_1 = arith.constant 0 : i32
    return %c0_i32, %c0_i32_0 : i32, i32
  }
  func.func @transform_3(%arg0: i32) -> (i32, i32) {
    %c0_i32 = arith.constant 0 : i32
    %c0_i32_0 = arith.constant 0 : i32
    return %arg0, %c0_i32 : i32, i32
  }
}

</mosaic_0001>

<bundles_post_ra>
// kernel: image_encoder_vit.19
= control target key start
LH: loop header
LB: loop body
LE: loop exit
PB: predicated region body
PF: predicated region fallthrough
CT: control target
= control target key end

     0   :  { %v246_v0 = vmov 0   ;;  %vm130_vm0 = vcmask 523264   ;;  %s366_s1 = inlined_call_operand.vmem [shape: bf16[192,128], index: 1, kind: input, shape index: {}]   ;;  %s367_s0 = inlined_call_operand.vmem [shape: f32[32,192], index: 0, kind: input, shape index: {}]   ;;  %s368_s2 = inlined_call_operand.vmem [shape: f32[1,128], index: 2, kind: input, shape index: {}]   ;;  %s369_s3 = inlined_call_operand.vmem [shape: f32[32,128], index: 3, kind: output, shape index: {}]  }
   0x1   :  { %137 = vmatprep.subr.bf16.mxu0 %v246_v0  ;;  %209 = vmatprep.subr.bf16.mxu1 %v246_v0  ;;  %v234_v1 = vld [vmem:[%s366_s1] sm:$0xff]   ;;  %v235_v2 = vld [vmem:[%s366_s1 + $0x8] sm:$0xff]   ;;  %v236_v3 = vld [vmem:[%s366_s1 + $0x10] sm:$0xff]  }
   0x2   :  { %138 = vmatpush1.bf16.msra.mxu0 %v234_v1  ;;  %221 = vmatpush1.bf16.msra.mxu1 %v234_v1  ;;  %v237_v4 = vld [vmem:[%s366_s1 + $0x18] sm:$0xff]   ;;  %v16_v5 = vld [vmem:[%s367_s0 + $0x8] sm:$0xff]  ;;  %v238_v10 = vld [vmem:[%s366_s1 + $0x20] sm:$0xff]  }
   0x3   :  { %139 = vmatprep.subr.bf16.mxu0 %v246_v0  ;;  %210 = vmatprep.subr.bf16.mxu1 %v246_v0  ;;  %v18_v6 = vld [vmem:[%s367_s0 + $0x18] sm:$0xff]  ;;  %v20_v7 = vld [vmem:[%s367_s0 + $0x28] sm:$0xff]  ;;  %v240_v13 = vld [vmem:[%s366_s1 + $0x30] sm:$0xff]  }
   0x4   :  { %v24_v8 = vpack.c.bf16 %v18_v6, %v16_v5  ;;  %v22_v9 = vld [vmem:[%s367_s0 + $0x38] sm:$0xff]  ;;  %v239_v12 = vld [vmem:[%s366_s1 + $0x28] sm:$0xff]   ;;  %v242_v15 = vld [vmem:[%s366_s1 + $0x40] sm:$0xff]  }
   0x5   :  { %v26_v11 = vpack.c.bf16 %v22_v9, %v20_v7  ;;  %v241_v14 = vld [vmem:[%s366_s1 + $0x38] sm:$0xff]   ;;  %v243_v16 = vld [vmem:[%s366_s1 + $0x48] sm:$0xff]   ;;  %v244_v17 = vld [vmem:[%s366_s1 + $0x50] sm:$0xff]  }
   0x6   :  { %140 = vmatpush1.bf16.msra.mxu0 %v235_v2  ;;  %222 = vmatpush1.bf16.msra.mxu1 %v235_v2  ;;  %v245_v18 = vld [vmem:[%s366_s1 + $0x58] sm:$0xff]   ;;  %v15_v19 = vld [vmem:[%s367_s0] sm:$0xff]  ;;  %v17_v20 = vld [vmem:[%s367_s0 + $0x10] sm:$0xff] }
   0x7   :  { %141 = vmatprep.subr.bf16.mxu0 %v246_v0  ;;  %211 = vmatprep.subr.bf16.mxu1 %v246_v0  ;;  %v19_v21 = vld [vmem:[%s367_s0 + $0x20] sm:$0xff]  ;;  %v21_v22 = vld [vmem:[%s367_s0 + $0x30] sm:$0xff]  ;;  %v23_v23 = vpack.c.bf16 %v17_v20, %v15_v19 }
   0x8   :  { %207 = vmatprep.mubr.msk.bf16.mxu0 %vm130_vm0, %v24_v8  ;;  %208 = vmatprep.mubr.msk.bf16.mxu1 %vm130_vm0, %v26_v11  ;;  %v25_v24 = vpack.c.bf16 %v21_v22, %v19_v21  ;;  %v194_v25 = vld [vmem:[%s368_s2] ss:$0 sm:$0xff] }
   0xa   :  { %142 = vmatpush1.bf16.msra.mxu0 %v236_v3  ;;  %223 = vmatpush1.bf16.msra.mxu1 %v236_v3 }
   0xb   :  { %143 = vmatprep.subr.bf16.mxu0 %v246_v0  ;;  %212 = vmatprep.subr.bf16.mxu1 %v246_v0 }
   0xe   :  { %144 = vmatpush1.bf16.msra.mxu0 %v237_v4  ;;  %224 = vmatpush1.bf16.msra.mxu1 %v237_v4 }
   0xf   :  { %145 = vmatprep.subr.bf16.mxu0 %v246_v0  ;;  %213 = vmatprep.subr.bf16.mxu1 %v246_v0 }
  0x12   :  { %146 = vmatpush1.bf16.msra.mxu0 %v238_v10  ;;  %225 = vmatpush1.bf16.msra.mxu1 %v238_v10 }
  0x13   :  { %147 = vmatprep.subr.bf16.mxu0 %v246_v0  ;;  %214 = vmatprep.subr.bf16.mxu1 %v246_v0 }
  0x16   :  { %148 = vmatpush1.bf16.msra.mxu0 %v239_v12  ;;  %226 = vmatpush1.bf16.msra.mxu1 %v239_v12 }
  0x17   :  { %149 = vmatprep.subr.bf16.mxu0 %v246_v0  ;;  %215 = vmatprep.subr.bf16.mxu1 %v246_v0 }
  0x1a   :  { %150 = vmatpush1.bf16.msra.mxu0 %v240_v13  ;;  %227 = vmatpush1.bf16.msra.mxu1 %v240_v13 }
  0x1b   :  { %151 = vmatprep.subr.bf16.mxu0 %v246_v0  ;;  %216 = vmatprep.subr.bf16.mxu1 %v246_v0 }
  0x1e   :  { %152 = vmatpush1.bf16.msra.mxu0 %v241_v14  ;;  %228 = vmatpush1.bf16.msra.mxu1 %v241_v14 }
  0x1f   :  { %153 = vmatprep.subr.bf16.mxu0 %v246_v0  ;;  %217 = vmatprep.subr.bf16.mxu1 %v246_v0 }
  0x22   :  { %154 = vmatpush1.bf16.msra.mxu0 %v242_v15  ;;  %229 = vmatpush1.bf16.msra.mxu1 %v242_v15 }
  0x23   :  { %155 = vmatprep.subr.bf16.mxu0 %v246_v0  ;;  %218 = vmatprep.subr.bf16.mxu1 %v246_v0 }
  0x26   :  { %156 = vmatpush1.bf16.msra.mxu0 %v243_v16  ;;  %230 = vmatpush1.bf16.msra.mxu1 %v243_v16 }
  0x27   :  { %157 = vmatprep.subr.bf16.mxu0 %v246_v0  ;;  %219 = vmatprep.subr.bf16.mxu1 %v246_v0 }
  0x2a   :  { %158 = vmatpush1.bf16.msra.mxu0 %v244_v17  ;;  %231 = vmatpush1.bf16.msra.mxu1 %v244_v17 }
  0x2b   :  { %159 = vmatprep.subr.bf16.mxu0 %v246_v0  ;;  %220 = vmatprep.subr.bf16.mxu1 %v246_v0 }
  0x2e   :  { %160 = vmatpush1.bf16.msra.mxu0 %v245_v18  ;;  %232 = vmatpush1.bf16.msra.mxu1 %v245_v18 }
  0x31   :  { %170 = vmatmul.mubr.bf16.vlgmr.msra.gmra.mrb[0].mxu0 %v23_v23  ;;  %178 = vmatmul.mubr.bf16.vlgmr.msra.gmra.mrb[0].mxu1 %v25_v24 }
 0x104   :  { %v171_v26 = vpop.f32.mrb[0].mxu0  ;;  %v179_v27 = vpop.f32.mrb[0].mxu1 }
 0x105   :  { %v172_v28 = vadd.f32 %v194_v25, %v171_v26  ;;  %v180_v29 = vadd.f32 %v194_v25, %v179_v27  ;;  %v173_v30 = vpop.f32.mrb[1].mxu0  ;;  %v181_v31 = vpop.f32.mrb[1].mxu1 }
 0x106   :  { %v174_v32 = vpop.f32.mrb[2].mxu0  ;;  %v182_v33 = vpop.f32.mrb[2].mxu1 }
 0x107   :  { %186 = vst [vmem:[%s369_s3] sm:$0xff] %v172_v28  ;;  %188 = vst [vmem:[%s369_s3 + $0x10] sm:$0xff] %v180_v29  ;;  %v175_v34 = vadd.f32 %v194_v25, %v174_v32  ;;  %v183_v35 = vadd.f32 %v194_v25, %v182_v33  ;;  %v176_v36 = vpop.f32.mrb[3].mxu0  ;;  %v184_v37 = vpop.f32.mrb[3].mxu1 }
 0x109   :  { %187 = vst [vmem:[%s369_s3 + $0x8] sm:$0xff] %v175_v34  ;;  %189 = vst [vmem:[%s369_s3 + $0x18] sm:$0xff] %v183_v35 }

// kernel: image_encoder_vit.20
= control target key start
LH: loop header
LB: loop body
LE: loop exit
PB: predicated region body
PF: predicated region fallthrough
CT: control target
= control target key end

     0   :  { %s182_s0 = inlined_call_operand.vmem [shape: f32[32,128], index: 0, kind: input, shape index: {}]   ;;  %s183_s1 = inlined_call_operand.vmem [shape: f32[1,128], index: 1, kind: input, shape index: {}]   ;;  %s184_s2 = inlined_call_operand.vmem [shape: f32[1,128], index: 2, kind: input, shape index: {}]   ;;  %s185_s3 = inlined_call_operand.vmem [shape: bf16[32,128], index: 3, kind: output, shape index: {}]  }
   0x1   :  { %v14_v0 = vld [vmem:[%s182_s0] sm:$0xff]  ;;  %v16_v1 = vld [vmem:[%s182_s0 + $0x10] sm:$0xff]  ;;  %v15_v2 = vld [vmem:[%s182_s0 + $0x8] sm:$0xff] }
   0x2   :  { %18 = vadd.xlane.f32.xlu0 %v14_v0  ;;  %22 = vadd.xlane.f32.xlu1 %v16_v1  ;;  %v17_v3 = vld [vmem:[%s182_s0 + $0x18] sm:$0xff]  ;;  %v109_v34 = vld [vmem:[%s183_s1] ss:$0 sm:$0xff] }
   0x3   :  { %v110_v39 = vld [vmem:[%s184_s2] ss:$0 sm:$0xff] }
   0x6   :  { %20 = vadd.xlane.f32.xlu0 %v15_v2  ;;  %24 = vadd.xlane.f32.xlu1 %v17_v3 }
  0x8f   :  { %v19_v4 = vpop.xlane.xlu0 %18  ;;  %v23_v5 = vpop.xlane.xlu1 %22 }
  0x90   :  { %v27_v6 = vmul.f32 0.0078125, %v19_v4  ;;  %v29_v7 = vmul.f32 0.0078125, %v23_v5 }
  0x92   :  { %v31_v8 = vsub.f32 %v14_v0, %v27_v6  ;;  %v33_v9 = vsub.f32 %v16_v1, %v29_v7 }
  0x93   :  { %v21_v10 = vpop.xlane.xlu0 %20  ;;  %v25_v11 = vpop.xlane.xlu1 %24 }
  0x94   :  { %v28_v12 = vmul.f32 0.0078125, %v21_v10  ;;  %v35_v13 = vmul.f32 %v31_v8, %v31_v8  ;;  %v30_v14 = vmul.f32 0.0078125, %v25_v11  ;;  %v37_v17 = vmul.f32 %v33_v9, %v33_v9 }
  0x96   :  { %v32_v15 = vsub.f32 %v15_v2, %v28_v12  ;;  %39 = vadd.xlane.f32.xlu0 %v35_v13  ;;  %v34_v16 = vsub.f32 %v17_v3, %v30_v14 }
  0x98   :  { %v36_v18 = vmul.f32 %v32_v15, %v32_v15  ;;  %v38_v19 = vmul.f32 %v34_v16, %v34_v16 }
  0x9a   :  { %43 = vadd.xlane.f32.xlu0 %v37_v17  ;;  %41 = vadd.xlane.f32.xlu1 %v36_v18 }
  0x9e   :  { %45 = vadd.xlane.f32.xlu1 %v38_v19 }
 0x123   :  { %v40_v20 = vpop.xlane.xlu0 %39 }
 0x124   :  { %v47_v21 = vmul.f32 0.0078125, %v40_v20 }
 0x126   :  { %v51_v22 = vadd.f32 1e-05, %v47_v21 }
 0x127   :  { %v42_v23 = vpop.xlane.xlu1 %41  ;;  %v44_v24 = vpop.xlane.xlu0 %43 }
 0x128   :  { %130 = vrsqrt.f32 %v51_v22  ;;  %v48_v25 = vmul.f32 0.0078125, %v42_v23  ;;  %v49_v26 = vmul.f32 0.0078125, %v44_v24 }
 0x12a   :  { %v52_v27 = vadd.f32 1e-05, %v48_v25  ;;  %v53_v28 = vadd.f32 1e-05, %v49_v26 }
 0x12b   :  { %v46_v29 = vpop.xlane.xlu1 %45 }
 0x12c   :  { %132 = vrsqrt.f32 %v52_v27  ;;  %v50_v30 = vmul.f32 0.0078125, %v46_v29 }
 0x12d   :  { %134 = vrsqrt.f32 %v53_v28 }
 0x12e   :  { %v54_v31 = vadd.f32 1e-05, %v50_v30 }
 0x130   :  { %136 = vrsqrt.f32 %v54_v31 }
 0x132   :  { %v131_v32 = vpop.eup %130 }
 0x133   :  { %v59_v33 = vmul.f32 %v131_v32, %v31_v8 }
 0x135   :  { %v70_v37 = vmul.f32 %v109_v34, %v59_v33 }
 0x136   :  { %v133_v35 = vpop.eup %132 }
 0x137   :  { %v135_v36 = vpop.eup %134  ;;  %v60_v38 = vmul.f32 %v133_v35, %v32_v15  ;;  %v81_v43 = vadd.f32 %v110_v39, %v70_v37 }
 0x138   :  { %v61_v40 = vmul.f32 %v135_v36, %v33_v9 }
 0x139   :  { %v71_v41 = vmul.f32 %v109_v34, %v60_v38 }
 0x13a   :  { %v137_v42 = vpop.eup %136  ;;  %v72_v45 = vmul.f32 %v109_v34, %v61_v40 }
 0x13b   :  { %v82_v44 = vadd.f32 %v110_v39, %v71_v41  ;;  %v62_v46 = vmul.f32 %v137_v42, %v34_v16 }
 0x13c   :  { %v83_v49 = vadd.f32 %v110_v39, %v72_v45 }
 0x13d   :  { %v122_v47 = vpack.c.bf16 %v82_v44, %v81_v43  ;;  %v73_v48 = vmul.f32 %v109_v34, %v62_v46 }
 0x13f   :  { %123 = vst [vmem:[%s185_s3] sm:$0xff] %v122_v47   ;;  %v84_v50 = vadd.f32 %v110_v39, %v73_v48 }
 0x141   :  { %v127_v51 = vpack.c.bf16 %v84_v50, %v83_v49 }
 0x143   :  { %129 = vst [vmem:[%s185_s3 + $0x8] sm:$0xff] %v127_v51  }

// kernel: image_encoder_vit.21
= control target key start
LH: loop header
LB: loop body
LE: loop exit
PB: predicated region body
PF: predicated region fallthrough
CT: control target
= control target key end

     0   :  { %v469_v1 = vmov 0   ;;  %v53_v27 = vlaneseq  ;;  %s595_s1 = inlined_call_operand.vmem [shape: bf16[128,384], index: 1, kind: input, shape index: {}]   ;;  %s596_s0 = inlined_call_operand.vmem [shape: bf16[32,128], index: 0, kind: input, shape index: {}]   ;;  %s597_s2 = inlined_call_operand.vmem [shape: f32[1,384], index: 2, kind: input, shape index: {}]   ;;  %s598_s3 = inlined_call_operand.vmem [shape: bf16[32,384], index: 3, kind: output, shape index: {}]  }
   0x1   :  { %v435_v0 = vld [vmem:[%s595_s1 + $0x4] ss:$12 sps:$4 sm:$0xff]   ;;  %240 = vmatprep.mubr.bf16.mxu0 %v469_v1  ;;  %v437_v2 = vld [vmem:[%s595_s1] ss:$12 sps:$4 sm:$0xff]   ;;  %v438_v3 = vld [vmem:[%s595_s1 + $0x1c] ss:$12 sps:$4 sm:$0xff]  }
   0x2   :  { %208 = vmatprep.subr.bf16.mxu0 %v435_v0  ;;  %v440_v4 = vld [vmem:[%s595_s1 + $0x18] ss:$12 sps:$4 sm:$0xff]   ;;  %v441_v5 = vld [vmem:[%s595_s1 + $0x8] ss:$12 sps:$4 sm:$0xff]   ;;  %v445_v7 = vld [vmem:[%s595_s1 + $0x20] ss:$12 sps:$4 sm:$0xff]  }
   0x3   :  { %209 = vmatpush1.bf16.msra.mxu0 %v437_v2  ;;  %v442_v6 = vld [vmem:[%s595_s1 + $0x34] ss:$12 sps:$4 sm:$0xff]   ;;  %414 = vmatprep.subr.bf16.mxu1 %v441_v5  ;;  %v444_v8 = vld [vmem:[%s595_s1 + $0x30] ss:$12 sps:$4 sm:$0xff]   ;;  %v446_v9 = vld [vmem:[%s595_s1 + $0x4c] ss:$12 sps:$4 sm:$0xff]  }
   0x4   :  { %210 = vmatprep.subr.bf16.mxu0 %v438_v3  ;;  %415 = vmatpush3.bf16.msra.mxu1 %v441_v5  ;;  %v449_v10 = vld [vmem:[%s595_s1 + $0x38] ss:$12 sps:$4 sm:$0xff]   ;;  %v448_v11 = vld [vmem:[%s595_s1 + $0x48] ss:$12 sps:$4 sm:$0xff]   ;;  %v453_v12 = vld [vmem:[%s595_s1 + $0x50] ss:$12 sps:$4 sm:$0xff]  }
   0x5   :  { %416 = vmatprep.subr.bf16.mxu1 %v445_v7  ;;  %v450_v13 = vld [vmem:[%s595_s1 + $0x64] ss:$12 sps:$4 sm:$0xff]   ;;  %v452_v14 = vld [vmem:[%s595_s1 + $0x60] ss:$12 sps:$4 sm:$0xff]   ;;  %v457_v15 = vld [vmem:[%s595_s1 + $0x68] ss:$12 sps:$4 sm:$0xff]  }
   0x6   :  { %v454_v16 = vld [vmem:[%s595_s1 + $0x7c] ss:$12 sps:$4 sm:$0xff]   ;;  %v456_v17 = vld [vmem:[%s595_s1 + $0x78] ss:$12 sps:$4 sm:$0xff]   ;;  %v461_v19 = vld [vmem:[%s595_s1 + $0x80] ss:$12 sps:$4 sm:$0xff]  }
   0x7   :  { %211 = vmatpush1.bf16.msra.mxu0 %v440_v4  ;;  %v466_v18 = vld [vmem:[%s596_s0] sm:$0xff]   ;;  %v460_v21 = vld [vmem:[%s595_s1 + $0x90] ss:$12 sps:$4 sm:$0xff]   ;;  %v462_v23 = vld [vmem:[%s595_s1 + $0xac] ss:$12 sps:$4 sm:$0xff]   ;;  %v54_v28 = vshrl.u32 %v53_v27, 7 }
   0x8   :  { %212 = vmatprep.subr.bf16.mxu0 %v442_v6  ;;  %417 = vmatpush3.bf16.msra.mxu1 %v445_v7  ;;  %v458_v20 = vld [vmem:[%s595_s1 + $0x94] ss:$12 sps:$4 sm:$0xff]   ;;  %v465_v22 = vld [vmem:[%s595_s1 + $0x98] ss:$12 sps:$4 sm:$0xff]   ;;  %v467_v25 = vld [vmem:[%s595_s1 + $0xb0] ss:$12 sps:$4 sm:$0xff]  }
   0x9   :  { %418 = vmatprep.subr.bf16.mxu1 %v449_v10  ;;  %430 = vmatprep.mubr.bf16.mxu1 %v466_v18  ;;  %v464_v24 = vld [vmem:[%s595_s1 + $0xa8] ss:$12 sps:$4 sm:$0xff]   ;;  %v55_v29 = vsub.s32 0, %v54_v28  ;;  %v51_v30 = vld [vmem:[%s597_s2] sm:$0x7]  ;;  %v59_v31 = vsub.s32 1, %v54_v28 }
   0xa   :  { %v468_v26 = vld [vmem:[%s596_s0 + $0x8] sm:$0xff]   ;;  %v63_v32 = vsub.s32 2, %v54_v28 }
   0xb   :  { %213 = vmatpush1.bf16.msra.mxu0 %v444_v8  ;;  %v56_v33 = vrot.slane %v51_v30, %v55_v29  ;;  %v60_v34 = vrot.slane %v51_v30, %v59_v31 }
   0xc   :  { %214 = vmatprep.subr.bf16.mxu0 %v446_v9  ;;  %419 = vmatpush3.bf16.msra.mxu1 %v449_v10  ;;  %v64_v36 = vrot.slane %v51_v30, %v63_v32 }
   0xd   :  { %420 = vmatprep.subr.bf16.mxu1 %v453_v12 }
   0xf   :  { %215 = vmatpush1.bf16.msra.mxu0 %v448_v11 }
  0x10   :  { %216 = vmatprep.subr.bf16.mxu0 %v450_v13  ;;  %421 = vmatpush3.bf16.msra.mxu1 %v453_v12 }
  0x11   :  { %422 = vmatprep.subr.bf16.mxu1 %v457_v15 }
  0x13   :  { %217 = vmatpush1.bf16.msra.mxu0 %v452_v14 }
  0x14   :  { %218 = vmatprep.subr.bf16.mxu0 %v454_v16  ;;  %423 = vmatpush3.bf16.msra.mxu1 %v457_v15 }
  0x15   :  { %424 = vmatprep.subr.bf16.mxu1 %v461_v19 }
  0x17   :  { %219 = vmatpush1.bf16.msra.mxu0 %v456_v17 }
  0x18   :  { %220 = vmatprep.subr.bf16.mxu0 %v458_v20  ;;  %425 = vmatpush3.bf16.msra.mxu1 %v461_v19 }
  0x19   :  { %426 = vmatprep.subr.bf16.mxu1 %v465_v22 }
  0x1b   :  { %221 = vmatpush1.bf16.msra.mxu0 %v460_v21 }
  0x1c   :  { %222 = vmatprep.subr.bf16.mxu0 %v462_v23  ;;  %427 = vmatpush3.bf16.msra.mxu1 %v465_v22 }
  0x1d   :  { %428 = vmatprep.subr.bf16.mxu1 %v467_v25 }
  0x1f   :  { %223 = vmatpush1.bf16.msra.mxu0 %v464_v24 }
  0x20   :  { %429 = vmatpush3.bf16.msra.mxu1 %v467_v25 }
  0x22   :  { %241 = vmatmul.mubr.bf16.vlgmr.msra.gmra.mrb[0].mxu0 %v466_v18 }
  0x23   :  { %250 = vmatprep.mubr.bf16.mxu0 %v469_v1  ;;  %431 = vmatmul.mubr.bf16.vlgmr.msra.gmra.mrb[0].mxu1 %v468_v26 }
  0x2a   :  { %251 = vmatmul.mubr.bf16.gmra.mrb[4].mxu0 %v468_v26 }
  0xf5   :  { %v242_v35 = vpop.f32.mrb[0].mxu0 }
  0xf6   :  { %v243_v37 = vadd.f32 %v242_v35, %v56_v33  ;;  %v244_v38 = vpop.f32.mrb[1].mxu0  ;;  %v432_v43 = vpop.f32.mrb[0].mxu1 }
  0xf7   :  { %v245_v39 = vadd.f32 %v244_v38, %v60_v34  ;;  %v246_v40 = vpop.f32.mrb[2].mxu0  ;;  %v304_v46 = vadd.f32 %v432_v43, %v64_v36  ;;  %v295_v47 = vpop.f32.mrb[1].mxu1 }
  0xf8   :  { %v247_v41 = vadd.f32 %v246_v40, %v56_v33  ;;  %v248_v42 = vpop.f32.mrb[3].mxu0  ;;  %v296_v48 = vadd.f32 %v295_v47, %v64_v36  ;;  %v433_v49 = vpop.f32.mrb[2].mxu1 }
  0xf9   :  { %v396_v44 = vpack.c.bf16 %v245_v39, %v243_v37  ;;  %v249_v45 = vadd.f32 %v248_v42, %v60_v34  ;;  %v401_v51 = vpack.c.bf16 %v304_v46, %v304_v46  ;;  %v307_v52 = vadd.f32 %v433_v49, %v64_v36  ;;  %v298_v53 = vpop.f32.mrb[3].mxu1 }
  0xfa   :  { %v397_v54 = vpack.c.bf16 %v296_v48, %v296_v48  ;;  %v299_v55 = vadd.f32 %v298_v53, %v64_v36 }
  0xfb   :  { %350 = vst [vmem:[%s598_s3] sm:$0xff] %v396_v44  ;;  %v398_v50 = vpack.c.bf16 %v249_v45, %v247_v41  ;;  %355 = vst [vmem:[%s598_s3 + $0x20] sm:$0xf] %v401_v51  ;;  %v403_v56 = vpack.c.bf16 %v307_v52, %v307_v52 }
  0xfc   :  { %351 = vst [vmem:[%s598_s3 + $0x8] sm:$0xf] %v397_v54  ;;  %v399_v59 = vpack.c.bf16 %v299_v55, %v299_v55 }
  0xfd   :  { %352 = vst [vmem:[%s598_s3 + $0xc] sm:$0xff] %v398_v50  ;;  %v252_v57 = vpop.f32.mrb[4].mxu0  ;;  %357 = vst [vmem:[%s598_s3 + $0x2c] sm:$0xf] %v403_v56 }
  0xfe   :  { %v253_v58 = vadd.f32 %v252_v57, %v56_v33  ;;  %v254_v60 = vpop.f32.mrb[5].mxu0  ;;  %353 = vst [vmem:[%s598_s3 + $0x14] sm:$0xf] %v399_v59 }
  0xff   :  { %v255_v61 = vadd.f32 %v254_v60, %v60_v34  ;;  %v256_v62 = vpop.f32.mrb[6].mxu0 }
 0x100   :  { %v257_v63 = vadd.f32 %v256_v62, %v56_v33  ;;  %v258_v0 = vpop.f32.mrb[7].mxu0 }
 0x101   :  { %v400_v1 = vpack.c.bf16 %v255_v61, %v253_v58  ;;  %v259_v2 = vadd.f32 %v258_v0, %v60_v34 }
 0x103   :  { %354 = vst [vmem:[%s598_s3 + $0x18] sm:$0xff] %v400_v1  ;;  %v402_v3 = vpack.c.bf16 %v259_v2, %v257_v63 }
 0x105   :  { %356 = vst [vmem:[%s598_s3 + $0x24] sm:$0xff] %v402_v3 }

// kernel: image_encoder_vit.22
= control target key start
LH: loop header
LB: loop body
LE: loop exit
PB: predicated region body
PF: predicated region fallthrough
CT: control target
= control target key end

     0   :  { %s791_s12 = smov 0   ;;  %s793_s13 = smov 0   ;;  %s859_s0 = inlined_call_operand.vmem [shape: bf16[2,4,16,32], index: 0, kind: input, shape index: {}]   ;;  %s860_s1 = inlined_call_operand.vmem [shape: bf16[2,4,16,32], index: 1, kind: input, shape index: {}]   ;;  %s861_s2 = inlined_call_operand.vmem [shape: bf16[2,4,16,32], index: 2, kind: input, shape index: {}]   ;;  %s862_s3 = inlined_call_operand.vmem [shape: bf16[2,4,16,32], index: 3, kind: output, shape index: {}]  }
   0x1   :  { %s795_s14 = smov 0   ;;  %s797_s15 = smov 0  }
   0x2   :  { %s799_s16 = smov 0  }
   0x3 LB: > { %s28_s17 = sadd.s32 1, %s759_s14  ;;  %s32_s18 = sadd.s32 1, %s763_s15  ;;  %s767_s16 = sphi %s799_s16, %s13_s16   ;;  %s763_s15 = sphi %s797_s15, %s866_s15   ;;  %s759_s14 = sphi %s795_s14, %s865_s14   ;;  %s755_s13 = sphi %s793_s13, %s864_s13   ;;  %s751_s12 = sphi %s791_s12, %s863_s12  }
   0x4   : > { %p30_p0 = scmp.ge.s32.totalorder %s28_s17, 4  ;;  %p632_p1 = scmp.ge.s32.totalorder %s767_s16, 1 }
   0x5   : > { %p205_p2 = scmp.lt.s32.totalorder %s767_s16, 9 }
   0x6   : > { %s868_s17 = smov (%p30_p0, %s28_s17), 0  ;;  %s870_s18 = smov (!%p30_p0, %s32_s18), %s763_s15 }
   0x7   : > { %p206_p3 = pnand %p632_p1, %p205_p2  ;;  %p34_p4 = scmp.ge.s32.totalorder %s870_s18, 2 }
   0x8   : > { %p264_p5 = scmp.lt.s32.totalorder (!%p206_p3), %s755_s13, 1  ;;  %p266_p6 = scmp.lt.s32.totalorder (!%p206_p3), %s751_s12, 3  ;;  %v769_v0 = vmov (!%p206_p3), 0.0   ;;  %vm770_vm0 = vmmov (!%p206_p3), 0   ;;  %vm326_vm1 = vcmask (!%p206_p3), 261120   ;;  %vm374_vm2 = vcmask (!%p206_p3), 130048  }
   0x9   : > { %s872_s18 = smov (%p34_p4, %s870_s18), 0  ;;  %209 = sbr.rel (%p206_p3) target bundleno = 627 (0x273), region = 32 }
   0xa   : > { %660 = vmatprep.subr.bf16.mxu0 (!%p206_p3), %v769_v0  ;;  %662 = vmatprep.mubr.msk.bf16.mxu0 (!%p206_p3), %vm770_vm0, %v769_v0  ;;  %vm468_vm3 = vcmask (!%p206_p3), 257024  }
   0xb   : > { %666 = vmatprep.subr.bf16.mxu1 (!%p206_p3), %v769_v0  ;;  %668 = vmatprep.mubr.msk.bf16.mxu1 (!%p206_p3), %vm770_vm0, %v769_v0 }
  0x10   : > { %s874_s13 = smov (!%p264_p5, %s755_s13), 1  ;;  %s876_s12 = smov (!%p266_p6, %s751_s12), 3 }
  0x11   : > { %s634_s19 = sshll.u32 %s874_s13, 3  ;;  %s633_s20 = sshll.u32 %s876_s12, 1 }
  0x12   : > { %s273_s21 = sadd.s32 %s634_s19, %s633_s20 }
  0x13   : > { %s821_s22 = sshll.u32 %s273_s21, 2 }
  0x14   : > { %s285_s25 = scalar_lea.vmem %s860_s1, %s821_s22  ;;  %s275_s28 = scalar_lea.vmem %s859_s0, %s821_s22 }
  0x15   : > { %v714_v1 = vld [vmem:[%s285_s25] sm:$0xff]   ;;  %s294_s4 = scalar_lea.vmem %s861_s2, %s821_s22  ;;  %s307_s7 = scalar_lea.vmem %s862_s3, %s821_s22 }
  0x16   : > { %v331_v2 = vsel %vm326_vm1, %v714_v1, 0  ;;  %v715_v3 = vld [vmem:[%s275_s28] sm:$0xff]  }
  0x17   : > { %661 = vmatpush3.bf16.xpose.msra.mxu0 %v331_v2  ;;  %v716_v10 = vld [vmem:[%s294_s4] sm:$0xff]  }
  0x18   : > { %667 = vmatpush3.bf16.msra.mxu1 %v716_v10 }
  0x1e   : > { %663 = vmatmul.mubr.msk.bf16.vlgmr.msra.gmra.mrb[0].mxu0 %vm326_vm1, %v715_v3 }
  0xf1   : > { %v367_v4 = vpop.f32.mrb[0].mxu0 }
  0xf2   : > { %v664_v5 = vpop.f32.mrb[1].mxu0  ;;  %v375_v6 = vsel %vm374_vm2, %v367_v4, -inf }
  0xf3   : > { %376 = vmax.xlane.f32.xlu0 %v375_v6  ;;  %v370_v7 = vpop.f32.mrb[2].mxu0 }
  0xf4   : > { %v665_v8 = vpop.f32.mrb[3].mxu0  ;;  %v378_v9 = vsel %vm374_vm2, %v370_v7, -inf }
  0xf7   : > { %379 = vmax.xlane.f32.xlu0 %v378_v9 }
 0x180   : > { %v377_v11 = vpop.xlane.xlu0 %376 }
 0x181   : > { %v387_v12 = vsub.f32 %v367_v4, %v377_v11  ;;  %v381_v22 = vsub.f32 -inf, %v377_v11 }
 0x183   : > { %v389_v13 = vmul.f32 1.442695, %v387_v12  ;;  %v383_v24 = vmul.f32 1.442695, %v381_v22 }
 0x184   : > { %v380_v14 = vpop.xlane.xlu0 %379 }
 0x185   : > { %v388_v15 = vsub.f32 %v370_v7, %v380_v14  ;;  %717 = vpow2.f32 %v389_v13  ;;  %v382_v23 = vsub.f32 -inf, %v380_v14 }
 0x187   : > { %v391_v16 = vmul.f32 1.442695, %v388_v15  ;;  %v385_v25 = vmul.f32 1.442695, %v382_v23 }
 0x189   : > { %719 = vpow2.f32 %v391_v16 }
 0x18a   : > { %721 = vpow2.f32 %v383_v24 }
 0x18b   : > { %723 = vpow2.f32 %v385_v25 }
 0x18f   : > { %v718_v17 = vpop.eup %717 }
 0x190   : > { %v395_v18 = vsel %vm374_vm2, %v718_v17, 0.0 }
 0x191   : > { %396 = vadd.xlane.f32.xlu1 %v395_v18 }
 0x193   : > { %v720_v19 = vpop.eup %719 }
 0x194   : > { %v398_v20 = vsel %vm374_vm2, %v720_v19, 0.0  ;;  %v403_v21 = vpack.c.bf16 %v720_v19, %v718_v17  ;;  %v722_v27 = vpop.eup %721 }
 0x195   : > { %399 = vadd.xlane.f32.xlu1 %v398_v20  ;;  %v724_v28 = vpop.eup %723  ;;  %v393_v29 = vmul.f32 0.0, %v722_v27 }
 0x196   : > { %669 = vmatmul.mubr.msk.bf16.vlgmr.msra.gmra.mrb[0].mxu1 %vm374_vm2, %v403_v21  ;;  %v394_v32 = vmul.f32 0.0, %v724_v28 }
 0x21e   : > { %v397_v26 = vpop.xlane.xlu1 %396 }
 0x21f   : > { %v401_v31 = vadd.f32 %v397_v26, %v393_v29 }
 0x221   : > { %725 = vrcp.f32 %v401_v31 }
 0x222   : > { %v400_v30 = vpop.xlane.xlu1 %399 }
 0x223   : > { %v402_v33 = vadd.f32 %v400_v30, %v394_v32 }
 0x225   : > { %727 = vrcp.f32 %v402_v33 }
 0x22b   : > { %v726_v37 = vpop.eup %725 }
 0x22f   : > { %v728_v42 = vpop.eup %727 }
 0x269   : > { %v447_v34 = vpop.f32.mrb[0].mxu1 }
 0x26a   : > { %v454_v35 = vadd.f32 %v447_v34, %v393_v29  ;;  %v670_v36 = vpop.f32.mrb[1].mxu1 }
 0x26b   : > { %v450_v38 = vpop.f32.mrb[2].mxu1 }
 0x26c   : > { %v457_v39 = vmul.f32 %v726_v37, %v454_v35  ;;  %v455_v40 = vadd.f32 %v450_v38, %v394_v32  ;;  %v671_v41 = vpop.f32.mrb[3].mxu1 }
 0x26e   : > { %v654_v43 = vpack.c.bf16 %v457_v39, %v457_v39  ;;  %v459_v44 = vmul.f32 %v728_v42, %v455_v40 }
 0x270   : > { %469 = vst.msk [vmem:[%s307_s7] sm:$0xf] %vm468_vm3, %v654_v43  ;;  %v655_v45 = vpack.c.bf16 %v459_v44, %v459_v44 }
 0x272   : > { %470 = vst.msk [vmem:[%s307_s7 + $0x4] sm:$0xf] %vm468_vm3, %v655_v45 }
 0x273 PF: > { %s13_s16 = sadd.s32 1, %s767_s16   ;;  %s863_s12 = smov %s759_s14 }
 0x274   : > { %p10_p7 = scmp.ge.s32.totalorder %s13_s16, 10   ;;  %s864_s13 = smov %s763_s15 }
 0x275   : > { %s865_s14 = smov %s868_s17  ;;  %s866_s15 = smov %s872_s18 }
 0x276   :  { %12 = sbr.rel (!%p10_p7) target bundleno = 3 (0x3), region = 68 }

// kernel: image_encoder_vit.23
= control target key start
LH: loop header
LB: loop body
LE: loop exit
PB: predicated region body
PF: predicated region fallthrough
CT: control target
= control target key end

     0   :  { %s303_s1 = inlined_call_operand.vmem [shape: bf16[128,128], index: 1, kind: input, shape index: {}]   ;;  %s304_s0 = inlined_call_operand.vmem [shape: bf16[32,128], index: 0, kind: input, shape index: {}]   ;;  %s305_s2 = inlined_call_operand.vmem [shape: f32[1,128], index: 2, kind: input, shape index: {}]   ;;  %s306_s3 = inlined_call_operand.vmem [shape: f32[32,128], index: 3, kind: input, shape index: {}]   ;;  %s307_s4 = inlined_call_operand.vmem [shape: f32[32,128], index: 4, kind: output, shape index: {}]  }
   0x1   :  { %v211_v0 = vld [vmem:[%s303_s1] sm:$0xff]   ;;  %v212_v1 = vld [vmem:[%s303_s1 + $0x8] sm:$0xff]   ;;  %v213_v2 = vld [vmem:[%s303_s1 + $0x10] sm:$0xff]  }
   0x2   :  { %191 = vmatprep.subr.bf16.mxu0 %v211_v0  ;;  %v214_v3 = vld [vmem:[%s303_s1 + $0x18] sm:$0xff]   ;;  %v219_v4 = vld [vmem:[%s304_s0] sm:$0xff]   ;;  %v216_v6 = vld [vmem:[%s303_s1 + $0x28] sm:$0xff]  }
   0x3   :  { %192 = vmatpush3.bf16.msra.mxu0 %v211_v0  ;;  %207 = vmatprep.mubr.bf16.mxu0 %v219_v4  ;;  %v215_v5 = vld [vmem:[%s303_s1 + $0x20] sm:$0xff]   ;;  %v217_v7 = vld [vmem:[%s303_s1 + $0x30] sm:$0xff]   ;;  %v218_v8 = vld [vmem:[%s303_s1 + $0x38] sm:$0xff]  }
   0x4   :  { %193 = vmatprep.subr.bf16.mxu0 %v212_v1  ;;  %v220_v9 = vld [vmem:[%s304_s0 + $0x8] sm:$0xff]   ;;  %v170_v10 = vld [vmem:[%s305_s2] ss:$0 sm:$0xff]  ;;  %v156_v12 = vld [vmem:[%s306_s3 + $0x10] sm:$0xff] }
   0x5   :  { %v154_v15 = vld [vmem:[%s306_s3] sm:$0xff]  ;;  %v157_v18 = vld [vmem:[%s306_s3 + $0x18] sm:$0xff]  ;;  %v155_v22 = vld [vmem:[%s306_s3 + $0x8] sm:$0xff] }
   0x7   :  { %194 = vmatpush3.bf16.msra.mxu0 %v212_v1 }
   0x8   :  { %195 = vmatprep.subr.bf16.mxu0 %v213_v2 }
   0xb   :  { %196 = vmatpush3.bf16.msra.mxu0 %v213_v2 }
   0xc   :  { %197 = vmatprep.subr.bf16.mxu0 %v214_v3 }
   0xf   :  { %198 = vmatpush3.bf16.msra.mxu0 %v214_v3 }
  0x10   :  { %199 = vmatprep.subr.bf16.mxu0 %v215_v5 }
  0x13   :  { %200 = vmatpush3.bf16.msra.mxu0 %v215_v5 }
  0x14   :  { %201 = vmatprep.subr.bf16.mxu0 %v216_v6 }
  0x17   :  { %202 = vmatpush3.bf16.msra.mxu0 %v216_v6 }
  0x18   :  { %203 = vmatprep.subr.bf16.mxu0 %v217_v7 }
  0x1b   :  { %204 = vmatpush3.bf16.msra.mxu0 %v217_v7 }
  0x1c   :  { %205 = vmatprep.subr.bf16.mxu0 %v218_v8 }
  0x1f   :  { %206 = vmatpush3.bf16.msra.mxu0 %v218_v8 }
  0x22   :  { %208 = vmatmul.mubr.bf16.vlgmr.msra.gmra.mrb[0].mxu0 %v220_v9 }
  0xf5   :  { %v209_v11 = vpop.f32.mrb[0].mxu0 }
  0xf6   :  { %v148_v13 = vadd.f32 %v209_v11, %v170_v10  ;;  %v139_v14 = vpop.f32.mrb[1].mxu0 }
  0xf7   :  { %v140_v16 = vadd.f32 %v170_v10, %v139_v14  ;;  %v210_v17 = vpop.f32.mrb[2].mxu0 }
  0xf8   :  { %v160_v19 = vadd.f32 %v156_v12, %v148_v13  ;;  %v151_v20 = vadd.f32 %v210_v17, %v170_v10  ;;  %v142_v21 = vpop.f32.mrb[3].mxu0 }
  0xf9   :  { %v158_v23 = vadd.f32 %v154_v15, %v140_v16  ;;  %v143_v24 = vadd.f32 %v170_v10, %v142_v21 }
  0xfa   :  { %164 = vst [vmem:[%s307_s4 + $0x10] sm:$0xff] %v160_v19  ;;  %v161_v25 = vadd.f32 %v157_v18, %v151_v20 }
  0xfb   :  { %162 = vst [vmem:[%s307_s4] sm:$0xff] %v158_v23  ;;  %v159_v26 = vadd.f32 %v155_v22, %v143_v24 }
  0xfc   :  { %165 = vst [vmem:[%s307_s4 + $0x18] sm:$0xff] %v161_v25 }
  0xfd   :  { %163 = vst [vmem:[%s307_s4 + $0x8] sm:$0xff] %v159_v26 }

// kernel: image_encoder_vit.25
= control target key start
LH: loop header
LB: loop body
LE: loop exit
PB: predicated region body
PF: predicated region fallthrough
CT: control target
= control target key end

     0   :  { %v624_v1 = vmov 0   ;;  %v53_v35 = vlaneseq  ;;  %s822_s1 = inlined_call_operand.vmem [shape: bf16[128,512], index: 1, kind: input, shape index: {}]   ;;  %s823_s0 = inlined_call_operand.vmem [shape: bf16[32,128], index: 0, kind: input, shape index: {}]   ;;  %s824_s2 = inlined_call_operand.vmem [shape: f32[1,512], index: 2, kind: input, shape index: {}]   ;;  %s825_s3 = inlined_call_operand.vmem [shape: bf16[32,512], index: 3, kind: output, shape index: {}]  }
   0x1   :  { %v542_v0 = vld [vmem:[%s822_s1 + $0x4] ss:$16 sps:$4 sm:$0xff]   ;;  %277 = vmatprep.mubr.bf16.mxu0 %v624_v1  ;;  %330 = vmatprep.mubr.bf16.mxu1 %v624_v1  ;;  %v544_v2 = vld [vmem:[%s822_s1 + $0xc] ss:$16 sps:$4 sm:$0xff]   ;;  %v546_v3 = vld [vmem:[%s822_s1] ss:$16 sps:$4 sm:$0xff]  }
   0x2   :  { %245 = vmatprep.subr.bf16.mxu0 %v542_v0  ;;  %v547_v4 = vld [vmem:[%s822_s1 + $0x8] ss:$16 sps:$4 sm:$0xff]   ;;  %298 = vmatprep.subr.bf16.mxu1 %v544_v2  ;;  %v548_v5 = vld [vmem:[%s822_s1 + $0x24] ss:$16 sps:$4 sm:$0xff]   ;;  %v550_v6 = vld [vmem:[%s822_s1 + $0x2c] ss:$16 sps:$4 sm:$0xff]  }
   0x3   :  { %246 = vmatpush1.bf16.msra.mxu0 %v546_v3  ;;  %299 = vmatpush1.bf16.msra.mxu1 %v547_v4  ;;  %v552_v7 = vld [vmem:[%s822_s1 + $0x20] ss:$16 sps:$4 sm:$0xff]   ;;  %v553_v8 = vld [vmem:[%s822_s1 + $0x28] ss:$16 sps:$4 sm:$0xff]   ;;  %v554_v9 = vld [vmem:[%s822_s1 + $0x44] ss:$16 sps:$4 sm:$0xff]  }
   0x4   :  { %247 = vmatprep.subr.bf16.mxu0 %v548_v5  ;;  %300 = vmatprep.subr.bf16.mxu1 %v550_v6  ;;  %v556_v10 = vld [vmem:[%s822_s1 + $0x4c] ss:$16 sps:$4 sm:$0xff]   ;;  %v558_v11 = vld [vmem:[%s822_s1 + $0x40] ss:$16 sps:$4 sm:$0xff]   ;;  %v559_v12 = vld [vmem:[%s822_s1 + $0x48] ss:$16 sps:$4 sm:$0xff]  }
   0x5   :  { %v560_v13 = vld [vmem:[%s822_s1 + $0x64] ss:$16 sps:$4 sm:$0xff]   ;;  %v562_v14 = vld [vmem:[%s822_s1 + $0x6c] ss:$16 sps:$4 sm:$0xff]   ;;  %v564_v15 = vld [vmem:[%s822_s1 + $0x60] ss:$16 sps:$4 sm:$0xff]  }
   0x6   :  { %v565_v16 = vld [vmem:[%s822_s1 + $0x68] ss:$16 sps:$4 sm:$0xff]   ;;  %v566_v17 = vld [vmem:[%s822_s1 + $0x84] ss:$16 sps:$4 sm:$0xff]   ;;  %v568_v18 = vld [vmem:[%s822_s1 + $0x8c] ss:$16 sps:$4 sm:$0xff]  }
   0x7   :  { %248 = vmatpush1.bf16.msra.mxu0 %v552_v7  ;;  %301 = vmatpush1.bf16.msra.mxu1 %v553_v8  ;;  %v570_v19 = vld [vmem:[%s822_s1 + $0x80] ss:$16 sps:$4 sm:$0xff]   ;;  %v571_v20 = vld [vmem:[%s822_s1 + $0x88] ss:$16 sps:$4 sm:$0xff]   ;;  %v572_v21 = vld [vmem:[%s822_s1 + $0xa4] ss:$16 sps:$4 sm:$0xff]  }
   0x8   :  { %249 = vmatprep.subr.bf16.mxu0 %v554_v9  ;;  %302 = vmatprep.subr.bf16.mxu1 %v556_v10  ;;  %v574_v22 = vld [vmem:[%s822_s1 + $0xac] ss:$16 sps:$4 sm:$0xff]   ;;  %v576_v23 = vld [vmem:[%s822_s1 + $0xa0] ss:$16 sps:$4 sm:$0xff]   ;;  %v577_v24 = vld [vmem:[%s822_s1 + $0xa8] ss:$16 sps:$4 sm:$0xff]  }
   0x9   :  { %v578_v25 = vld [vmem:[%s822_s1 + $0xc4] ss:$16 sps:$4 sm:$0xff]   ;;  %v580_v26 = vld [vmem:[%s822_s1 + $0xcc] ss:$16 sps:$4 sm:$0xff]   ;;  %v582_v27 = vld [vmem:[%s822_s1 + $0xc0] ss:$16 sps:$4 sm:$0xff]  }
   0xa   :  { %v583_v28 = vld [vmem:[%s822_s1 + $0xc8] ss:$16 sps:$4 sm:$0xff]   ;;  %v584_v29 = vld [vmem:[%s822_s1 + $0xe4] ss:$16 sps:$4 sm:$0xff]   ;;  %v586_v30 = vld [vmem:[%s822_s1 + $0xec] ss:$16 sps:$4 sm:$0xff]  }
   0xb   :  { %250 = vmatpush1.bf16.msra.mxu0 %v558_v11  ;;  %303 = vmatpush1.bf16.msra.mxu1 %v559_v12  ;;  %v588_v31 = vld [vmem:[%s822_s1 + $0xe0] ss:$16 sps:$4 sm:$0xff]   ;;  %v589_v32 = vld [vmem:[%s822_s1 + $0xe8] ss:$16 sps:$4 sm:$0xff]   ;;  %v54_v36 = vshrl.u32 %v53_v35, 7 }
   0xc   :  { %251 = vmatprep.subr.bf16.mxu0 %v560_v13  ;;  %304 = vmatprep.subr.bf16.mxu1 %v562_v14  ;;  %v590_v33 = vld [vmem:[%s823_s0] sm:$0xff]   ;;  %v591_v34 = vld [vmem:[%s823_s0 + $0x8] sm:$0xff]  }
   0xd   :  { %v55_v37 = vsub.s32 0, %v54_v36  ;;  %v63_v38 = vsub.s32 2, %v54_v36  ;;  %v51_v39 = vld [vmem:[%s824_s2] sm:$0xf]  ;;  %v59_v40 = vsub.s32 1, %v54_v36  ;;  %v67_v41 = vsub.s32 3, %v54_v36 }
   0xf   :  { %252 = vmatpush1.bf16.msra.mxu0 %v564_v15  ;;  %305 = vmatpush1.bf16.msra.mxu1 %v565_v16  ;;  %v56_v42 = vrot.slane %v51_v39, %v55_v37  ;;  %v64_v43 = vrot.slane %v51_v39, %v63_v38  ;;  %v60_v44 = vrot.slane %v51_v39, %v59_v40 }
  0x10   :  { %253 = vmatprep.subr.bf16.mxu0 %v566_v17  ;;  %306 = vmatprep.subr.bf16.mxu1 %v568_v18  ;;  %v68_v45 = vrot.slane %v51_v39, %v67_v41 }
  0x13   :  { %254 = vmatpush1.bf16.msra.mxu0 %v570_v19  ;;  %307 = vmatpush1.bf16.msra.mxu1 %v571_v20 }
  0x14   :  { %255 = vmatprep.subr.bf16.mxu0 %v572_v21  ;;  %308 = vmatprep.subr.bf16.mxu1 %v574_v22 }
  0x17   :  { %256 = vmatpush1.bf16.msra.mxu0 %v576_v23  ;;  %309 = vmatpush1.bf16.msra.mxu1 %v577_v24 }
  0x18   :  { %257 = vmatprep.subr.bf16.mxu0 %v578_v25  ;;  %310 = vmatprep.subr.bf16.mxu1 %v580_v26 }
  0x1b   :  { %258 = vmatpush1.bf16.msra.mxu0 %v582_v27  ;;  %311 = vmatpush1.bf16.msra.mxu1 %v583_v28 }
  0x1c   :  { %259 = vmatprep.subr.bf16.mxu0 %v584_v29  ;;  %312 = vmatprep.subr.bf16.mxu1 %v586_v30 }
  0x1f   :  { %260 = vmatpush1.bf16.msra.mxu0 %v588_v31  ;;  %313 = vmatpush1.bf16.msra.mxu1 %v589_v32 }
  0x22   :  { %278 = vmatmul.mubr.bf16.vlgmr.msra.gmra.mrb[0].mxu0 %v590_v33  ;;  %331 = vmatmul.mubr.bf16.vlgmr.msra.gmra.mrb[0].mxu1 %v590_v33 }
  0x23   :  { %287 = vmatprep.mubr.bf16.mxu0 %v624_v1  ;;  %340 = vmatprep.mubr.bf16.mxu1 %v624_v1 }
  0x2a   :  { %288 = vmatmul.mubr.bf16.gmra.mrb[4].mxu0 %v591_v34  ;;  %341 = vmatmul.mubr.bf16.gmra.mrb[4].mxu1 %v591_v34 }
  0xf5   :  { %v279_v46 = vpop.f32.mrb[0].mxu0  ;;  %v332_v47 = vpop.f32.mrb[0].mxu1 }
  0xf6   :  { %v280_v48 = vadd.f32 %v279_v46, %v56_v42  ;;  %v333_v49 = vadd.f32 %v332_v47, %v64_v43  ;;  %v281_v50 = vpop.f32.mrb[1].mxu0  ;;  %v334_v51 = vpop.f32.mrb[1].mxu1 }
  0xf7   :  { %v282_v52 = vadd.f32 %v281_v50, %v60_v44  ;;  %v335_v53 = vadd.f32 %v334_v51, %v68_v45  ;;  %v283_v54 = vpop.f32.mrb[2].mxu0  ;;  %v336_v55 = vpop.f32.mrb[2].mxu1 }
  0xf8   :  { %v367_v56 = vmul.f32 0.70710677, %v280_v48  ;;  %v369_v57 = vmul.f32 0.70710677, %v333_v49  ;;  %v284_v60 = vadd.f32 %v283_v54, %v56_v42  ;;  %v754_v61 = vadd.f32 %v336_v55, %v64_v43  ;;  %v285_v62 = vpop.f32.mrb[3].mxu0  ;;  %v338_v63 = vpop.f32.mrb[3].mxu1 }
  0xf9   :  { %v368_v58 = vmul.f32 0.70710677, %v282_v52  ;;  %v370_v59 = vmul.f32 0.70710677, %v335_v53  ;;  %v756_v0 = vadd.f32 %v285_v62, %v60_v44  ;;  %v758_v1 = vadd.f32 %v338_v63, %v68_v45 }
  0xfa   :  { %592 = verf.f32 %v367_v56  ;;  %v371_v2 = vmul.f32 0.70710677, %v284_v60  ;;  %v373_v3 = vmul.f32 0.70710677, %v754_v61  ;;  %v351_v26 = vmul.f32 0.5, %v280_v48 }
  0xfb   :  { %594 = verf.f32 %v369_v57  ;;  %v372_v4 = vmul.f32 0.70710677, %v756_v0  ;;  %v374_v6 = vmul.f32 0.70710677, %v758_v1  ;;  %v353_v27 = vmul.f32 0.5, %v333_v49 }
  0xfc   :  { %596 = verf.f32 %v368_v58  ;;  %v352_v34 = vmul.f32 0.5, %v282_v52  ;;  %v354_v35 = vmul.f32 0.5, %v335_v53  ;;  %v357_v51 = vmul.f32 0.5, %v754_v61 }
  0xfd   :  { %598 = verf.f32 %v370_v59  ;;  %v289_v5 = vpop.f32.mrb[4].mxu0  ;;  %v342_v8 = vpop.f32.mrb[4].mxu1  ;;  %v356_v53 = vmul.f32 0.5, %v756_v0  ;;  %v358_v62 = vmul.f32 0.5, %v758_v1 }
  0xfe   :  { %600 = verf.f32 %v371_v2  ;;  %v763_v7 = vadd.f32 %v289_v5, %v56_v42  ;;  %v291_v9 = vpop.f32.mrb[5].mxu0  ;;  %v765_v10 = vadd.f32 %v342_v8, %v64_v43  ;;  %v344_v12 = vpop.f32.mrb[5].mxu1 }
  0xff   :  { %602 = verf.f32 %v373_v3  ;;  %v767_v11 = vadd.f32 %v291_v9, %v60_v44  ;;  %v293_v13 = vpop.f32.mrb[6].mxu0  ;;  %v770_v15 = vadd.f32 %v344_v12, %v68_v45  ;;  %v346_v16 = vpop.f32.mrb[6].mxu1 }
 0x100   :  { %604 = verf.f32 %v372_v4  ;;  %v375_v14 = vmul.f32 0.70710677, %v763_v7  ;;  %v295_v17 = vpop.f32.mrb[7].mxu0  ;;  %v377_v18 = vmul.f32 0.70710677, %v765_v10  ;;  %v348_v19 = vpop.f32.mrb[7].mxu1  ;;  %v775_v22 = vadd.f32 %v293_v13, %v56_v42 }
 0x101   :  { %606 = verf.f32 %v374_v6  ;;  %v376_v20 = vmul.f32 0.70710677, %v767_v11  ;;  %v378_v21 = vmul.f32 0.70710677, %v770_v15  ;;  %v777_v23 = vadd.f32 %v346_v16, %v64_v43 }
 0x102   :  { %608 = verf.f32 %v375_v14  ;;  %v779_v24 = vadd.f32 %v295_v17, %v60_v44  ;;  %v379_v30 = vmul.f32 0.70710677, %v775_v22  ;;  %v782_v31 = vadd.f32 %v348_v19, %v68_v45 }
 0x103   :  { %610 = verf.f32 %v377_v18  ;;  %v381_v36 = vmul.f32 0.70710677, %v777_v23  ;;  %v355_v44 = vmul.f32 0.5, %v284_v60  ;;  %v359_v3 = vmul.f32 0.5, %v763_v7 }
 0x104   :  { %v593_v25 = vpop.eup %592  ;;  %612 = verf.f32 %v376_v20  ;;  %v380_v40 = vmul.f32 0.70710677, %v779_v24  ;;  %v382_v48 = vmul.f32 0.70710677, %v782_v31  ;;  %v361_v6 = vmul.f32 0.5, %v765_v10 }
 0x105   :  { %v595_v28 = vpop.eup %594  ;;  %v399_v29 = vadd.f32 1.0, %v593_v25  ;;  %614 = verf.f32 %v378_v21  ;;  %v360_v13 = vmul.f32 0.5, %v767_v11  ;;  %v362_v7 = vmul.f32 0.5, %v770_v15 }
 0x106   :  { %v597_v32 = vpop.eup %596  ;;  %v401_v33 = vadd.f32 1.0, %v595_v28  ;;  %616 = verf.f32 %v379_v30  ;;  %v363_v11 = vmul.f32 0.5, %v775_v22  ;;  %v365_v15 = vmul.f32 0.5, %v777_v23 }
 0x107   :  { %v599_v37 = vpop.eup %598  ;;  %v415_v38 = vmul.f32 %v399_v29, %v351_v26  ;;  %v400_v39 = vadd.f32 1.0, %v597_v32  ;;  %618 = verf.f32 %v381_v36  ;;  %v364_v32 = vmul.f32 0.5, %v779_v24 }
 0x108   :  { %v601_v41 = vpop.eup %600  ;;  %v417_v42 = vmul.f32 %v401_v33, %v353_v27  ;;  %v402_v43 = vadd.f32 1.0, %v599_v37  ;;  %620 = verf.f32 %v380_v40  ;;  %v366_v36 = vmul.f32 0.5, %v782_v31 }
 0x109   :  { %v603_v46 = vpop.eup %602  ;;  %v416_v45 = vmul.f32 %v400_v39, %v352_v34  ;;  %v403_v47 = vadd.f32 1.0, %v601_v41  ;;  %622 = verf.f32 %v382_v48 }
 0x10a   :  { %v605_v49 = vpop.eup %604  ;;  %v418_v50 = vmul.f32 %v402_v43, %v354_v35  ;;  %v405_v52 = vadd.f32 1.0, %v603_v46 }
 0x10b   :  { %v607_v54 = vpop.eup %606  ;;  %v533_v55 = vpack.c.bf16 %v416_v45, %v415_v38  ;;  %v419_v56 = vmul.f32 %v403_v47, %v355_v44  ;;  %v404_v57 = vadd.f32 1.0, %v605_v49 }
 0x10c   :  { %v609_v58 = vpop.eup %608  ;;  %v534_v59 = vpack.c.bf16 %v418_v50, %v417_v42  ;;  %v421_v60 = vmul.f32 %v405_v52, %v357_v51  ;;  %v406_v63 = vadd.f32 1.0, %v607_v54 }
 0x10d   :  { %v611_v2 = vpop.eup %610  ;;  %479 = vst [vmem:[%s825_s3] sm:$0xff] %v533_v55  ;;  %v420_v61 = vmul.f32 %v404_v57, %v356_v53  ;;  %v407_v0 = vadd.f32 1.0, %v609_v58 }
 0x10e   :  { %v613_v4 = vpop.eup %612  ;;  %480 = vst [vmem:[%s825_s3 + $0x8] sm:$0xff] %v534_v59  ;;  %v422_v5 = vmul.f32 %v406_v63, %v358_v62  ;;  %v409_v8 = vadd.f32 1.0, %v611_v2 }
 0x10f   :  { %v615_v1 = vpop.eup %614  ;;  %v535_v9 = vpack.c.bf16 %v420_v61, %v419_v56  ;;  %v423_v12 = vmul.f32 %v407_v0, %v359_v3  ;;  %v408_v14 = vadd.f32 1.0, %v613_v4 }
 0x110   :  { %v536_v16 = vpack.c.bf16 %v422_v5, %v421_v60  ;;  %v425_v17 = vmul.f32 %v409_v8, %v361_v6  ;;  %v410_v18 = vadd.f32 1.0, %v615_v1  ;;  %v617_v19 = vpop.eup %616 }
 0x111   :  { %481 = vst [vmem:[%s825_s3 + $0x10] sm:$0xff] %v535_v9  ;;  %v424_v20 = vmul.f32 %v408_v14, %v360_v13  ;;  %v619_v21 = vpop.eup %618  ;;  %v411_v25 = vadd.f32 1.0, %v617_v19 }
 0x112   :  { %482 = vst [vmem:[%s825_s3 + $0x18] sm:$0xff] %v536_v16  ;;  %v426_v10 = vmul.f32 %v410_v18, %v362_v7  ;;  %v621_v26 = vpop.eup %620  ;;  %v413_v28 = vadd.f32 1.0, %v619_v21 }
 0x113   :  { %v537_v27 = vpack.c.bf16 %v424_v20, %v423_v12  ;;  %v427_v30 = vmul.f32 %v411_v25, %v363_v11  ;;  %v412_v33 = vadd.f32 1.0, %v621_v26  ;;  %v623_v34 = vpop.eup %622 }
 0x114   :  { %v538_v29 = vpack.c.bf16 %v426_v10, %v425_v17  ;;  %v429_v22 = vmul.f32 %v413_v28, %v365_v15  ;;  %v414_v23 = vadd.f32 1.0, %v623_v34 }
 0x115   :  { %483 = vst [vmem:[%s825_s3 + $0x20] sm:$0xff] %v537_v27  ;;  %v428_v35 = vmul.f32 %v412_v33, %v364_v32 }
 0x116   :  { %484 = vst [vmem:[%s825_s3 + $0x28] sm:$0xff] %v538_v29  ;;  %v430_v38 = vmul.f32 %v414_v23, %v366_v36 }
 0x117   :  { %v539_v37 = vpack.c.bf16 %v428_v35, %v427_v30 }
 0x118   :  { %v540_v24 = vpack.c.bf16 %v430_v38, %v429_v22 }
 0x119   :  { %485 = vst [vmem:[%s825_s3 + $0x30] sm:$0xff] %v539_v37 }
 0x11a   :  { %486 = vst [vmem:[%s825_s3 + $0x38] sm:$0xff] %v540_v24 }

// kernel: image_encoder_vit.26
= control target key start
LH: loop header
LB: loop body
LE: loop exit
PB: predicated region body
PF: predicated region fallthrough
CT: control target
= control target key end

     0   :  { %s756_s1 = inlined_call_operand.vmem [shape: bf16[512,128], index: 1, kind: input, shape index: {}]   ;;  %s757_s0 = inlined_call_operand.vmem [shape: bf16[32,512], index: 0, kind: input, shape index: {}]   ;;  %s758_s2 = inlined_call_operand.vmem [shape: f32[1,128], index: 2, kind: input, shape index: {}]   ;;  %s759_s3 = inlined_call_operand.vmem [shape: f32[32,128], index: 3, kind: input, shape index: {}]   ;;  %s760_s4 = inlined_call_operand.vmem [shape: f32[32,128], index: 4, kind: output, shape index: {}]  }
   0x1   :  { %v540_v0 = vld [vmem:[%s756_s1 + $0x40] sm:$0xff]   ;;  %v544_v4 = vld [vmem:[%s756_s1 + $0x48] sm:$0xff]   ;;  %v548_v8 = vld [vmem:[%s756_s1 + $0x50] sm:$0xff]  }
   0x2   :  { %v541_v1 = vld [vmem:[%s756_s1 + $0xc0] sm:$0xff]   ;;  %484 = vmatprep.subr.bf16.mxu0 %v540_v0  ;;  %v545_v5 = vld [vmem:[%s756_s1 + $0xc8] sm:$0xff]   ;;  %v549_v9 = vld [vmem:[%s756_s1 + $0xd0] sm:$0xff]  }
   0x3   :  { %v542_v2 = vld [vmem:[%s756_s1] sm:$0xff]   ;;  %512 = vmatprep.subr.bf16.mxu1 %v541_v1  ;;  %v546_v6 = vld [vmem:[%s756_s1 + $0x8] sm:$0xff]   ;;  %v550_v10 = vld [vmem:[%s756_s1 + $0x10] sm:$0xff]  }
   0x4   :  { %v543_v3 = vld [vmem:[%s756_s1 + $0x80] sm:$0xff]   ;;  %485 = vmatpush3.bf16.msra.mxu0 %v542_v2  ;;  %v547_v7 = vld [vmem:[%s756_s1 + $0x88] sm:$0xff]   ;;  %v551_v11 = vld [vmem:[%s756_s1 + $0x90] sm:$0xff]  }
   0x5   :  { %513 = vmatpush3.bf16.msra.mxu1 %v543_v3  ;;  %486 = vmatprep.subr.bf16.mxu0 %v544_v4  ;;  %v552_v12 = vld [vmem:[%s756_s1 + $0x58] sm:$0xff]   ;;  %v556_v16 = vld [vmem:[%s756_s1 + $0x60] sm:$0xff]   ;;  %v560_v20 = vld [vmem:[%s756_s1 + $0x68] sm:$0xff]  }
   0x6   :  { %514 = vmatprep.subr.bf16.mxu1 %v545_v5  ;;  %v553_v13 = vld [vmem:[%s756_s1 + $0xd8] sm:$0xff]   ;;  %v557_v17 = vld [vmem:[%s756_s1 + $0xe0] sm:$0xff]   ;;  %v561_v21 = vld [vmem:[%s756_s1 + $0xe8] sm:$0xff]  }
   0x7   :  { %v554_v14 = vld [vmem:[%s756_s1 + $0x18] sm:$0xff]   ;;  %v558_v18 = vld [vmem:[%s756_s1 + $0x20] sm:$0xff]   ;;  %v562_v22 = vld [vmem:[%s756_s1 + $0x28] sm:$0xff]  }
   0x8   :  { %487 = vmatpush3.bf16.msra.mxu0 %v546_v6  ;;  %v555_v15 = vld [vmem:[%s756_s1 + $0x98] sm:$0xff]   ;;  %v559_v19 = vld [vmem:[%s756_s1 + $0xa0] sm:$0xff]   ;;  %v563_v23 = vld [vmem:[%s756_s1 + $0xa8] sm:$0xff]  }
   0x9   :  { %515 = vmatpush3.bf16.msra.mxu1 %v547_v7  ;;  %488 = vmatprep.subr.bf16.mxu0 %v548_v8  ;;  %v564_v24 = vld [vmem:[%s756_s1 + $0x70] sm:$0xff]   ;;  %v568_v28 = vld [vmem:[%s756_s1 + $0x78] sm:$0xff]   ;;  %v443_v42 = vld [vmem:[%s758_s2] ss:$0 sm:$0xff] }
   0xa   :  { %516 = vmatprep.subr.bf16.mxu1 %v549_v9  ;;  %v565_v25 = vld [vmem:[%s756_s1 + $0xf0] sm:$0xff]   ;;  %v569_v29 = vld [vmem:[%s756_s1 + $0xf8] sm:$0xff]   ;;  %v427_v53 = vld [vmem:[%s759_s3] sm:$0xff] }
   0xb   :  { %v566_v26 = vld [vmem:[%s756_s1 + $0x30] sm:$0xff]   ;;  %v570_v30 = vld [vmem:[%s756_s1 + $0x38] sm:$0xff]   ;;  %v428_v57 = vld [vmem:[%s759_s3 + $0x8] sm:$0xff] }
   0xc   :  { %489 = vmatpush3.bf16.msra.mxu0 %v550_v10  ;;  %v567_v27 = vld [vmem:[%s756_s1 + $0xb0] sm:$0xff]   ;;  %v571_v31 = vld [vmem:[%s756_s1 + $0xb8] sm:$0xff]  }
   0xd   :  { %517 = vmatpush3.bf16.msra.mxu1 %v551_v11  ;;  %490 = vmatprep.subr.bf16.mxu0 %v552_v12  ;;  %v572_v32 = vld [vmem:[%s757_s0] ss:$16 sps:$4 sm:$0xff]   ;;  %v574_v33 = vld [vmem:[%s757_s0 + $0x4] ss:$16 sps:$4 sm:$0xff]   ;;  %v575_v34 = vld [vmem:[%s757_s0 + $0x8] ss:$16 sps:$4 sm:$0xff]  }
   0xe   :  { %518 = vmatprep.subr.bf16.mxu1 %v553_v13  ;;  %v577_v35 = vld [vmem:[%s757_s0 + $0xc] ss:$16 sps:$4 sm:$0xff]   ;;  %361 = vmatprep.mubr.bf16.mxu0 %v574_v33  ;;  %v578_v36 = vld [vmem:[%s757_s0 + $0x24] ss:$16 sps:$4 sm:$0xff]   ;;  %v582_v38 = vld [vmem:[%s757_s0 + $0x20] ss:$16 sps:$4 sm:$0xff]  }
   0xf   :  { %410 = vmatprep.mubr.bf16.mxu1 %v577_v35  ;;  %v580_v37 = vld [vmem:[%s757_s0 + $0x2c] ss:$16 sps:$4 sm:$0xff]   ;;  %v583_v39 = vld [vmem:[%s757_s0 + $0x28] ss:$16 sps:$4 sm:$0xff]   ;;  %v429_v9 = vld [vmem:[%s759_s3 + $0x10] sm:$0xff] }
  0x10   :  { %491 = vmatpush3.bf16.msra.mxu0 %v554_v14  ;;  %v430_v13 = vld [vmem:[%s759_s3 + $0x18] sm:$0xff] }
  0x11   :  { %519 = vmatpush3.bf16.msra.mxu1 %v555_v15  ;;  %492 = vmatprep.subr.bf16.mxu0 %v556_v16 }
  0x12   :  { %520 = vmatprep.subr.bf16.mxu1 %v557_v17 }
  0x14   :  { %493 = vmatpush3.bf16.msra.mxu0 %v558_v18 }
  0x15   :  { %521 = vmatpush3.bf16.msra.mxu1 %v559_v19  ;;  %494 = vmatprep.subr.bf16.mxu0 %v560_v20 }
  0x16   :  { %522 = vmatprep.subr.bf16.mxu1 %v561_v21 }
  0x18   :  { %495 = vmatpush3.bf16.msra.mxu0 %v562_v22 }
  0x19   :  { %523 = vmatpush3.bf16.msra.mxu1 %v563_v23  ;;  %496 = vmatprep.subr.bf16.mxu0 %v564_v24 }
  0x1a   :  { %524 = vmatprep.subr.bf16.mxu1 %v565_v25 }
  0x1c   :  { %497 = vmatpush3.bf16.msra.mxu0 %v566_v26 }
  0x1d   :  { %525 = vmatpush3.bf16.msra.mxu1 %v567_v27  ;;  %498 = vmatprep.subr.bf16.mxu0 %v568_v28 }
  0x1e   :  { %526 = vmatprep.subr.bf16.mxu1 %v569_v29 }
  0x20   :  { %499 = vmatpush3.bf16.msra.mxu0 %v570_v30 }
  0x21   :  { %527 = vmatpush3.bf16.msra.mxu1 %v571_v31 }
  0x23   :  { %362 = vmatmul.mubr.bf16.vlgmr.msra.gmra.mrb[0].mxu0 %v572_v32 }
  0x24   :  { %411 = vmatmul.mubr.bf16.vlgmr.msra.gmra.mrb[0].mxu1 %v575_v34  ;;  %369 = vmatprep.mubr.bf16.mxu0 %v578_v36 }
  0x25   :  { %418 = vmatprep.mubr.bf16.mxu1 %v580_v37 }
  0x2b   :  { %370 = vmatmul.mubr.bf16.gmra.mrb[4].mxu0 %v582_v38 }
  0x2c   :  { %419 = vmatmul.mubr.bf16.gmra.mrb[4].mxu1 %v583_v39 }
  0xf6   :  { %v500_v40 = vpop.f32.mrb[0].mxu0 }
  0xf7   :  { %v528_v41 = vpop.f32.mrb[0].mxu1  ;;  %v501_v43 = vpop.f32.mrb[1].mxu0 }
  0xf8   :  { %v502_v44 = vadd.f32 %v501_v43, %v500_v40  ;;  %v529_v45 = vpop.f32.mrb[1].mxu1  ;;  %v503_v46 = vpop.f32.mrb[2].mxu0 }
  0xf9   :  { %v530_v47 = vadd.f32 %v529_v45, %v528_v41  ;;  %v531_v48 = vpop.f32.mrb[2].mxu1  ;;  %v504_v49 = vpop.f32.mrb[3].mxu0 }
  0xfa   :  { %v364_v50 = vadd.f32 %v502_v44, %v443_v42  ;;  %v505_v51 = vadd.f32 %v504_v49, %v503_v46  ;;  %v532_v52 = vpop.f32.mrb[3].mxu1 }
  0xfb   :  { %v533_v54 = vadd.f32 %v532_v52, %v531_v48 }
  0xfc   :  { %v413_v55 = vadd.f32 %v530_v47, %v364_v50  ;;  %v367_v56 = vadd.f32 %v505_v51, %v443_v42 }
  0xfe   :  { %v431_v58 = vadd.f32 %v427_v53, %v413_v55  ;;  %v416_v59 = vadd.f32 %v533_v54, %v367_v56  ;;  %v506_v60 = vpop.f32.mrb[4].mxu0 }
  0xff   :  { %v534_v61 = vpop.f32.mrb[4].mxu1  ;;  %v507_v62 = vpop.f32.mrb[5].mxu0 }
 0x100   :  { %435 = vst [vmem:[%s760_s4] sm:$0xff] %v431_v58  ;;  %v432_v63 = vadd.f32 %v428_v57, %v416_v59  ;;  %v508_v0 = vadd.f32 %v507_v62, %v506_v60  ;;  %v535_v1 = vpop.f32.mrb[5].mxu1  ;;  %v509_v2 = vpop.f32.mrb[6].mxu0 }
 0x101   :  { %v536_v3 = vadd.f32 %v535_v1, %v534_v61  ;;  %v537_v4 = vpop.f32.mrb[6].mxu1  ;;  %v510_v5 = vpop.f32.mrb[7].mxu0 }
 0x102   :  { %436 = vst [vmem:[%s760_s4 + $0x8] sm:$0xff] %v432_v63  ;;  %v372_v6 = vadd.f32 %v508_v0, %v443_v42  ;;  %v511_v7 = vadd.f32 %v510_v5, %v509_v2  ;;  %v538_v8 = vpop.f32.mrb[7].mxu1 }
 0x103   :  { %v539_v10 = vadd.f32 %v538_v8, %v537_v4 }
 0x104   :  { %v421_v11 = vadd.f32 %v536_v3, %v372_v6  ;;  %v375_v12 = vadd.f32 %v511_v7, %v443_v42 }
 0x106   :  { %v433_v14 = vadd.f32 %v429_v9, %v421_v11  ;;  %v424_v15 = vadd.f32 %v539_v10, %v375_v12 }
 0x108   :  { %437 = vst [vmem:[%s760_s4 + $0x10] sm:$0xff] %v433_v14  ;;  %v434_v16 = vadd.f32 %v430_v13, %v424_v15 }
 0x10a   :  { %438 = vst [vmem:[%s760_s4 + $0x18] sm:$0xff] %v434_v16 }

// kernel: image_encoder_vit.34
= control target key start
LH: loop header
LB: loop body
LE: loop exit
PB: predicated region body
PF: predicated region fallthrough
CT: control target
= control target key end

     0   :  { %s267_s1 = inlined_call_operand.vmem [shape: bf16[128,128], index: 1, kind: input, shape index: {}]   ;;  %s268_s0 = inlined_call_operand.vmem [shape: f32[32,128], index: 0, kind: input, shape index: {}]   ;;  %s269_s2 = inlined_call_operand.vmem [shape: f32[1,128], index: 2, kind: input, shape index: {}]   ;;  %s270_s3 = inlined_call_operand.vmem [shape: f32[32,128], index: 3, kind: output, shape index: {}]  }
   0x1   :  { %v188_v0 = vld [vmem:[%s267_s1] sm:$0xff]   ;;  %v189_v1 = vld [vmem:[%s267_s1 + $0x8] sm:$0xff]   ;;  %v190_v2 = vld [vmem:[%s267_s1 + $0x10] sm:$0xff]  }
   0x2   :  { %168 = vmatprep.subr.bf16.mxu0 %v188_v0  ;;  %v191_v3 = vld [vmem:[%s267_s1 + $0x18] sm:$0xff]   ;;  %v15_v4 = vld [vmem:[%s268_s0] sm:$0xff]  ;;  %v16_v5 = vld [vmem:[%s268_s0 + $0x8] sm:$0xff] }
   0x3   :  { %169 = vmatpush3.bf16.msra.mxu0 %v188_v0  ;;  %v19_v6 = vpack.c.bf16 %v16_v5, %v15_v4  ;;  %v192_v7 = vld [vmem:[%s267_s1 + $0x20] sm:$0xff]   ;;  %v193_v8 = vld [vmem:[%s267_s1 + $0x28] sm:$0xff]   ;;  %v194_v9 = vld [vmem:[%s267_s1 + $0x30] sm:$0xff]  }
   0x4   :  { %170 = vmatprep.subr.bf16.mxu0 %v189_v1  ;;  %v195_v10 = vld [vmem:[%s267_s1 + $0x38] sm:$0xff]   ;;  %v17_v11 = vld [vmem:[%s268_s0 + $0x10] sm:$0xff]  ;;  %v149_v14 = vld [vmem:[%s269_s2] ss:$0 sm:$0xff] }
   0x5   :  { %184 = vmatprep.mubr.bf16.mxu0 %v19_v6  ;;  %v18_v12 = vld [vmem:[%s268_s0 + $0x18] sm:$0xff] }
   0x6   :  { %v20_v13 = vpack.c.bf16 %v18_v12, %v17_v11 }
   0x7   :  { %171 = vmatpush3.bf16.msra.mxu0 %v189_v1 }
   0x8   :  { %172 = vmatprep.subr.bf16.mxu0 %v190_v2 }
   0xb   :  { %173 = vmatpush3.bf16.msra.mxu0 %v190_v2 }
   0xc   :  { %174 = vmatprep.subr.bf16.mxu0 %v191_v3 }
   0xf   :  { %175 = vmatpush3.bf16.msra.mxu0 %v191_v3 }
  0x10   :  { %176 = vmatprep.subr.bf16.mxu0 %v192_v7 }
  0x13   :  { %177 = vmatpush3.bf16.msra.mxu0 %v192_v7 }
  0x14   :  { %178 = vmatprep.subr.bf16.mxu0 %v193_v8 }
  0x17   :  { %179 = vmatpush3.bf16.msra.mxu0 %v193_v8 }
  0x18   :  { %180 = vmatprep.subr.bf16.mxu0 %v194_v9 }
  0x1b   :  { %181 = vmatpush3.bf16.msra.mxu0 %v194_v9 }
  0x1c   :  { %182 = vmatprep.subr.bf16.mxu0 %v195_v10 }
  0x1f   :  { %183 = vmatpush3.bf16.msra.mxu0 %v195_v10 }
  0x22   :  { %185 = vmatmul.mubr.bf16.vlgmr.msra.gmra.mrb[0].mxu0 %v20_v13 }
  0xf5   :  { %v186_v15 = vpop.f32.mrb[0].mxu0 }
  0xf6   :  { %v135_v16 = vadd.f32 %v186_v15, %v149_v14  ;;  %v126_v17 = vpop.f32.mrb[1].mxu0 }
  0xf7   :  { %v127_v18 = vadd.f32 %v149_v14, %v126_v17  ;;  %v187_v19 = vpop.f32.mrb[2].mxu0 }
  0xf8   :  { %143 = vst [vmem:[%s270_s3 + $0x10] sm:$0xff] %v135_v16  ;;  %v138_v20 = vadd.f32 %v187_v19, %v149_v14  ;;  %v129_v21 = vpop.f32.mrb[3].mxu0 }
  0xf9   :  { %141 = vst [vmem:[%s270_s3] sm:$0xff] %v127_v18  ;;  %v130_v22 = vadd.f32 %v149_v14, %v129_v21 }
  0xfa   :  { %144 = vst [vmem:[%s270_s3 + $0x18] sm:$0xff] %v138_v20 }
  0xfb   :  { %142 = vst [vmem:[%s270_s3 + $0x8] sm:$0xff] %v130_v22 }

// kernel: image_encoder_vit.35
= control target key start
LH: loop header
LB: loop body
LE: loop exit
PB: predicated region body
PF: predicated region fallthrough
CT: control target
= control target key end

     0   :  { %s153_s0 = inlined_call_operand.vmem [shape: f32[32,128], index: 0, kind: input, shape index: {}]   ;;  %s154_s1 = inlined_call_operand.vmem [shape: f32[1,128], index: 1, kind: input, shape index: {}]   ;;  %s155_s2 = inlined_call_operand.vmem [shape: f32[1,128], index: 2, kind: input, shape index: {}]   ;;  %s156_s3 = inlined_call_operand.vmem [shape: f32[32,128], index: 3, kind: output, shape index: {}]  }
   0x1   :  { %v14_v0 = vld [vmem:[%s153_s0] sm:$0xff]  ;;  %v16_v1 = vld [vmem:[%s153_s0 + $0x10] sm:$0xff]  ;;  %v15_v2 = vld [vmem:[%s153_s0 + $0x8] sm:$0xff] }
   0x2   :  { %18 = vadd.xlane.f32.xlu0 %v14_v0  ;;  %22 = vadd.xlane.f32.xlu1 %v16_v1  ;;  %v17_v3 = vld [vmem:[%s153_s0 + $0x18] sm:$0xff]  ;;  %v93_v33 = vld [vmem:[%s154_s1] ss:$0 sm:$0xff] }
   0x3   :  { %v94_v35 = vld [vmem:[%s155_s2] ss:$0 sm:$0xff] }
   0x6   :  { %20 = vadd.xlane.f32.xlu0 %v15_v2  ;;  %24 = vadd.xlane.f32.xlu1 %v17_v3 }
  0x8f   :  { %v19_v4 = vpop.xlane.xlu0 %18  ;;  %v23_v5 = vpop.xlane.xlu1 %22 }
  0x90   :  { %v27_v6 = vmul.f32 0.0078125, %v19_v4  ;;  %v29_v7 = vmul.f32 0.0078125, %v23_v5 }
  0x92   :  { %v31_v8 = vsub.f32 %v14_v0, %v27_v6  ;;  %v33_v9 = vsub.f32 %v16_v1, %v29_v7 }
  0x93   :  { %v21_v10 = vpop.xlane.xlu0 %20  ;;  %v25_v11 = vpop.xlane.xlu1 %24 }
  0x94   :  { %v28_v12 = vmul.f32 0.0078125, %v21_v10  ;;  %v35_v13 = vmul.f32 %v31_v8, %v31_v8  ;;  %v30_v14 = vmul.f32 0.0078125, %v25_v11  ;;  %v37_v17 = vmul.f32 %v33_v9, %v33_v9 }
  0x96   :  { %v32_v15 = vsub.f32 %v15_v2, %v28_v12  ;;  %39 = vadd.xlane.f32.xlu0 %v35_v13  ;;  %v34_v16 = vsub.f32 %v17_v3, %v30_v14 }
  0x98   :  { %v36_v18 = vmul.f32 %v32_v15, %v32_v15  ;;  %v38_v19 = vmul.f32 %v34_v16, %v34_v16 }
  0x9a   :  { %43 = vadd.xlane.f32.xlu0 %v37_v17  ;;  %41 = vadd.xlane.f32.xlu1 %v36_v18 }
  0x9e   :  { %45 = vadd.xlane.f32.xlu1 %v38_v19 }
 0x123   :  { %v40_v20 = vpop.xlane.xlu0 %39 }
 0x124   :  { %v47_v21 = vmul.f32 0.0078125, %v40_v20 }
 0x126   :  { %v51_v22 = vadd.f32 1e-06, %v47_v21 }
 0x127   :  { %v42_v23 = vpop.xlane.xlu1 %41  ;;  %v44_v24 = vpop.xlane.xlu0 %43 }
 0x128   :  { %95 = vrsqrt.f32 %v51_v22  ;;  %v48_v25 = vmul.f32 0.0078125, %v42_v23  ;;  %v49_v26 = vmul.f32 0.0078125, %v44_v24 }
 0x12a   :  { %v52_v27 = vadd.f32 1e-06, %v48_v25  ;;  %v53_v28 = vadd.f32 1e-06, %v49_v26 }
 0x12b   :  { %v46_v29 = vpop.xlane.xlu1 %45 }
 0x12c   :  { %97 = vrsqrt.f32 %v52_v27  ;;  %v50_v30 = vmul.f32 0.0078125, %v46_v29 }
 0x12d   :  { %99 = vrsqrt.f32 %v53_v28 }
 0x12e   :  { %v54_v31 = vadd.f32 1e-06, %v50_v30 }
 0x130   :  { %101 = vrsqrt.f32 %v54_v31 }
 0x132   :  { %v96_v32 = vpop.eup %95 }
 0x133   :  { %v59_v34 = vmul.f32 %v96_v32, %v31_v8 }
 0x135   :  { %v70_v36 = vmul.f32 %v93_v33, %v59_v34 }
 0x136   :  { %v98_v37 = vpop.eup %97 }
 0x137   :  { %v100_v38 = vpop.eup %99  ;;  %v81_v39 = vadd.f32 %v94_v35, %v70_v36  ;;  %v60_v40 = vmul.f32 %v98_v37, %v32_v15 }
 0x138   :  { %v61_v41 = vmul.f32 %v100_v38, %v33_v9 }
 0x139   :  { %85 = vst [vmem:[%s156_s3] sm:$0xff] %v81_v39  ;;  %v71_v42 = vmul.f32 %v93_v33, %v60_v40 }
 0x13a   :  { %v102_v43 = vpop.eup %101  ;;  %v72_v44 = vmul.f32 %v93_v33, %v61_v41 }
 0x13b   :  { %v82_v45 = vadd.f32 %v94_v35, %v71_v42  ;;  %v62_v46 = vmul.f32 %v102_v43, %v34_v16 }
 0x13c   :  { %v83_v47 = vadd.f32 %v94_v35, %v72_v44 }
 0x13d   :  { %86 = vst [vmem:[%s156_s3 + $0x8] sm:$0xff] %v82_v45  ;;  %v73_v48 = vmul.f32 %v93_v33, %v62_v46 }
 0x13e   :  { %87 = vst [vmem:[%s156_s3 + $0x10] sm:$0xff] %v83_v47 }
 0x13f   :  { %v84_v49 = vadd.f32 %v94_v35, %v73_v48 }
 0x141   :  { %88 = vst [vmem:[%s156_s3 + $0x18] sm:$0xff] %v84_v49 }

// kernel: image_encoder_vit.37
= control target key start
LH: loop header
LB: loop body
LE: loop exit
PB: predicated region body
PF: predicated region fallthrough
CT: control target
= control target key end

     0   :  { %s196_s0 = inlined_call_operand.vmem [shape: f32[32,128], index: 0, kind: input, shape index: {}]   ;;  %s197_s1 = inlined_call_operand.vmem [shape: f32[1,128], index: 1, kind: input, shape index: {}]   ;;  %s198_s2 = inlined_call_operand.vmem [shape: f32[1,128], index: 2, kind: input, shape index: {}]   ;;  %s199_s3 = inlined_call_operand.hbm [shape: f32[32,128], index: 3, kind: output, shape index: {}]  }
   0x1   :  { %v15_v0 = vld [vmem:[%s196_s0] sm:$0xff]  ;;  %v17_v1 = vld [vmem:[%s196_s0 + $0x10] sm:$0xff] }
   0x2   :  { %19 = vadd.xlane.f32.xlu0 %v15_v0  ;;  %23 = vadd.xlane.f32.xlu1 %v17_v1 }
   0x3   :  { %8 = vsyncpa [#allocation3], 0  ;;  %v16_v2 = vld [vmem:[%s196_s0 + $0x8] sm:$0xff]  ;;  %v18_v3 = vld [vmem:[%s196_s0 + $0x18] sm:$0xff]  ;;  %s143_s23 = smov [#allocation2]  }
   0x4   :  { %v106_v33 = vld [vmem:[%s197_s1] ss:$0 sm:$0xff]  ;;  %s95_s1 = sshll.u32 %s143_s23, 4  ;;  %s96_s1 = int_to_ptr.vmem [resolvable:$true] %s95_s1 }
   0x5   :  { %v107_v35 = vld [vmem:[%s198_s2] ss:$0 sm:$0xff]  ;;  %s119_s2 = scalar_lea.vmem %s96_s1, 512  ;;  %p124_p1 = scmp.lt.s32.totalorder %s96_s1, %s96_s1 }
   0x6   :  { %21 = vadd.xlane.f32.xlu0 %v16_v2  ;;  %25 = vadd.xlane.f32.xlu1 %v18_v3  ;;  %p120_p0 = scmp.ne.s32.totalorder %s96_s1, %s119_s2  ;;  %p125_p2 = scmp.lt.s32.totalorder %s119_s2, %s119_s2 }
   0x8   :  { %p126_p3 = por %p125_p2, %p124_p1 }
   0xa   :  { %p127_p4 = pnand %p126_p3, %p120_p0 }
  0x8f   :  { %v20_v4 = vpop.xlane.xlu0 %19  ;;  %v24_v5 = vpop.xlane.xlu1 %23 }
  0x90   :  { %v28_v6 = vmul.f32 0.0078125, %v20_v4  ;;  %v30_v7 = vmul.f32 0.0078125, %v24_v5 }
  0x92   :  { %v32_v8 = vsub.f32 %v15_v0, %v28_v6  ;;  %v34_v9 = vsub.f32 %v17_v1, %v30_v7 }
  0x93   :  { %v22_v10 = vpop.xlane.xlu0 %21  ;;  %v26_v11 = vpop.xlane.xlu1 %25 }
  0x94   :  { %v29_v12 = vmul.f32 0.0078125, %v22_v10  ;;  %v36_v13 = vmul.f32 %v32_v8, %v32_v8  ;;  %v31_v14 = vmul.f32 0.0078125, %v26_v11  ;;  %v38_v17 = vmul.f32 %v34_v9, %v34_v9 }
  0x96   :  { %v33_v15 = vsub.f32 %v16_v2, %v29_v12  ;;  %40 = vadd.xlane.f32.xlu0 %v36_v13  ;;  %v35_v16 = vsub.f32 %v18_v3, %v31_v14 }
  0x98   :  { %v37_v18 = vmul.f32 %v33_v15, %v33_v15  ;;  %v39_v19 = vmul.f32 %v35_v16, %v35_v16 }
  0x9a   :  { %44 = vadd.xlane.f32.xlu0 %v38_v17  ;;  %42 = vadd.xlane.f32.xlu1 %v37_v18 }
  0x9e   :  { %46 = vadd.xlane.f32.xlu1 %v39_v19 }
 0x123   :  { %v41_v20 = vpop.xlane.xlu0 %40 }
 0x124   :  { %v48_v21 = vmul.f32 0.0078125, %v41_v20 }
 0x126   :  { %v52_v22 = vadd.f32 1e-06, %v48_v21 }
 0x127   :  { %v43_v23 = vpop.xlane.xlu1 %42  ;;  %v45_v24 = vpop.xlane.xlu0 %44 }
 0x128   :  { %111 = vrsqrt.f32 %v52_v22  ;;  %v49_v25 = vmul.f32 0.0078125, %v43_v23  ;;  %v50_v26 = vmul.f32 0.0078125, %v45_v24 }
 0x12a   :  { %v53_v27 = vadd.f32 1e-06, %v49_v25  ;;  %v54_v28 = vadd.f32 1e-06, %v50_v26 }
 0x12b   :  { %v47_v29 = vpop.xlane.xlu1 %46 }
 0x12c   :  { %113 = vrsqrt.f32 %v53_v27  ;;  %v51_v30 = vmul.f32 0.0078125, %v47_v29 }
 0x12d   :  { %115 = vrsqrt.f32 %v54_v28 }
 0x12e   :  { %v55_v31 = vadd.f32 1e-06, %v51_v30 }
 0x130   :  { %117 = vrsqrt.f32 %v55_v31 }
 0x132   :  { %v112_v32 = vpop.eup %111 }
 0x133   :  { %v60_v34 = vmul.f32 %v112_v32, %v32_v8 }
 0x135   :  { %v71_v36 = vmul.f32 %v106_v33, %v60_v34 }
 0x136   :  { %v114_v37 = vpop.eup %113 }
 0x137   :  { %v116_v38 = vpop.eup %115  ;;  %v61_v39 = vmul.f32 %v114_v37, %v33_v15  ;;  %v82_v40 = vadd.f32 %v107_v35, %v71_v36 }
 0x138   :  { %v62_v41 = vmul.f32 %v116_v38, %v34_v9 }
 0x139   :  { %v72_v42 = vmul.f32 %v106_v33, %v61_v39  ;;  %86 = vst [vmem:[#allocation2] sm:$0xff] %v82_v40 }
 0x13a   :  { %v118_v43 = vpop.eup %117  ;;  %v73_v44 = vmul.f32 %v106_v33, %v62_v41 }
 0x13b   :  { %v63_v45 = vmul.f32 %v118_v43, %v35_v16  ;;  %v83_v46 = vadd.f32 %v107_v35, %v72_v42 }
 0x13c   :  { %v84_v47 = vadd.f32 %v107_v35, %v73_v44 }
 0x13d   :  { %v74_v48 = vmul.f32 %v106_v33, %v63_v45  ;;  %87 = vst [vmem:[#allocation2 + $0x8] sm:$0xff] %v83_v46 }
 0x13e   :  { %88 = vst [vmem:[#allocation2 + $0x10] sm:$0xff] %v84_v47 }
 0x13f   :  { %v85_v49 = vadd.f32 %v107_v35, %v74_v48 }
 0x141   :  { %89 = vst [vmem:[#allocation2 + $0x18] sm:$0xff] %v85_v49 }
 0x142   :  { %130 = shalt.err (!%p127_p4)
}
 0x143   :  { %s131_s26 = scalar_lea.hbm %s199_s3, 512 }
 0x144   :  { %p132_p5 = scmp.ne.s32.totalorder %s199_s3, %s131_s26  ;;  %p135_p6 = scmp.lt.u32.totalorder %s131_s26, %s199_s3 }
 0x146   :  { %p137_p7 = pnand %p135_p6, %p132_p5 }
 0x148   :  { %140 = shalt.err (!%p137_p7)
}
 0x149   :  { %s144_s4 = smov 128   ;;  %s145_s5 = smov 8  }
 0x14a   :  { %101 = dma.vmem_to_hbm [thread:$0]  %s96_s1, 512, %s199_s3, [#allocation3], %s144_s4, %s144_s4, %s145_s5  }
 0x14b   :  { %141 = dma.done.wait [#allocation3], 512  }
 0x14c   :  { %142 = vsyncadd [#allocation3], 4294966784 }
 0x14d   :  { %105 = vsyncpa [#allocation3], 1 }

// kernel: image_encoder_vit.36
= control target key start
LH: loop header
LB: loop body
LE: loop exit
PB: predicated region body
PF: predicated region fallthrough
CT: control target
= control target key end

     0   :  { %s2601_s15 = smov 0   ;;  %s2603_s16 = smov 0   ;;  %s3244_s0 = inlined_call_operand.vmem [shape: bf16[2,4,6,128], index: 0, kind: input, shape index: {}]   ;;  %s3245_s1 = inlined_call_operand.vmem [shape: bf16[2,4,6,128], index: 1, kind: input, shape index: {}]   ;;  %s3246_s2 = inlined_call_operand.vmem [shape: bf16[2,4,6,128], index: 2, kind: input, shape index: {}]   ;;  %s3247_s3 = inlined_call_operand.vmem [shape: bf16[9,128,128], index: 3, kind: input, shape index: {}]   ;;  %s3248_s4 = inlined_call_operand.vmem [shape: f32[2,4,4,128], index: 4, kind: output, shape index: {}]  }
   0x1   :  { %s2605_s17 = smov 0  }
   0x2 LB: > { %s26_s18 = sadd.s32 1, %s2567_s16  ;;  %p1926_p0 = scmp.ge.s32.totalorder %s2571_s17, 1  ;;  %s2571_s17 = sphi %s2605_s17, %s14_s17   ;;  %s2567_s16 = sphi %s2603_s16, %s3256_s16   ;;  %s2563_s15 = sphi %s2601_s15, %s3255_s15  }
   0x3   : > { %p28_p1 = scmp.ge.s32.totalorder %s26_s18, 2  ;;  %p217_p2 = scmp.lt.s32.totalorder %s2571_s17, 3 }
   0x5   : > { %s3258_s18 = smov (%p28_p1, %s26_s18), 0  ;;  %p218_p3 = pnand %p1926_p0, %p217_p2 }
   0x6   : > { %v2471_v0 = vld [vmem:[%s3247_s3 + $0x40] sm:$0xff] (!%p218_p3)   ;;  %v2573_v1 = vmov (!%p218_p3), 0.0   ;;  %v2473_v3 = vld [vmem:[%s3247_s3 + $0x48] sm:$0xff] (!%p218_p3)   ;;  %vm2574_vm0 = vmmov (!%p218_p3), 0   ;;  %p270_p4 = scmp.lt.s32.totalorder (!%p218_p3), %s2563_s15, 1  ;;  %v2475_v5 = vld [vmem:[%s3247_s3 + $0x50] sm:$0xff] (!%p218_p3)   ;;  %v337_v10 = vlaneseq (!%p218_p3) }
   0x7   : > { %221 = sbr.rel (%p218_p3) target bundleno = 402 (0x192), region = 36  ;;  %2234 = vmatprep.subr.bf16.mxu1 (!%p218_p3), %v2573_v1  ;;  %2314 = vmatprep.subr.bf16.mxu0 (!%p218_p3), %v2573_v1  ;;  %v2472_v2 = vld [vmem:[%s3247_s3 + $0x100] sm:$0xff] (!%p218_p3)   ;;  %v2474_v4 = vld [vmem:[%s3247_s3 + $0x108] sm:$0xff] (!%p218_p3)   ;;  %v2476_v6 = vld [vmem:[%s3247_s3 + $0x110] sm:$0xff] (!%p218_p3)   ;;  %v2575_v14 = vmov (!%p218_p3), 1983009808  }
   0x8   : > { %2235 = vmatpush3.bf16.msra.mxu1 (!%p218_p3), %v2471_v0  ;;  %2250 = vmatprep.mubr.msk.bf16.mxu1 (!%p218_p3), %vm2574_vm0, %v2573_v1  ;;  %v2477_v7 = vld [vmem:[%s3247_s3 + $0x58] sm:$0xff] (!%p218_p3)   ;;  %v2479_v9 = vld [vmem:[%s3247_s3 + $0x60] sm:$0xff] (!%p218_p3)   ;;  %v2481_v12 = vld [vmem:[%s3247_s3 + $0x68] sm:$0xff] (!%p218_p3)   ;;  %v335_v15 = vunpack.c.l.s4 (!%p218_p3), %v2575_v14  ;;  %v338_v16 = vshrl.u32 (!%p218_p3), %v337_v10, 7  ;;  %vm366_vm1 = vsmask.f32 (!%p218_p3), 1280 }
   0x9   : > { %2315 = vmatpush3.bf16.msra.mxu0 (!%p218_p3), %v2472_v2  ;;  %2236 = vmatprep.subr.bf16.mxu1 (!%p218_p3), %v2573_v1  ;;  %v2478_v8 = vld [vmem:[%s3247_s3 + $0x118] sm:$0xff] (!%p218_p3)   ;;  %v2480_v11 = vld [vmem:[%s3247_s3 + $0x120] sm:$0xff] (!%p218_p3)   ;;  %v2482_v13 = vld [vmem:[%s3247_s3 + $0x128] sm:$0xff] (!%p218_p3)   ;;  %vm367_vm2 = vsmask.f32 (!%p218_p3), 3336  ;;  %vm660_vm8 = vcmask (!%p218_p3), 1040384  }
   0xa   : > { %2316 = vmatprep.subr.bf16.mxu0 (!%p218_p3), %v2573_v1  ;;  %2330 = vmatprep.mubr.msk.bf16.mxu0 (!%p218_p3), %vm2574_vm0, %v2573_v1  ;;  %v2483_v21 = vld [vmem:[%s3247_s3 + $0x70] sm:$0xff] (!%p218_p3)   ;;  %v336_v22 = vunpack.c.0.s8 (!%p218_p3), %v335_v15  ;;  %vm369_vm3 = vsmask.f32 (!%p218_p3), 5392  ;;  %vm371_vm4 = vsmask.f32 (!%p218_p3), 7448  ;;  %v2485_v35 = vld [vmem:[%s3247_s3 + $0x78] sm:$0xff] (!%p218_p3)   ;;  %vm368_vm5 = vmor (!%p218_p3), %vm366_vm1, %vm367_vm2 }
   0xb   : > { %v2484_v23 = vld [vmem:[%s3247_s3 + $0x130] sm:$0xff] (!%p218_p3)   ;;  %v2486_v44 = vld [vmem:[%s3247_s3 + $0x138] sm:$0xff] (!%p218_p3)   ;;  %vm2782_vm6 = vmor (!%p218_p3), %vm368_vm5, %vm369_vm3  ;;  %vm661_vm9 = vcmask (!%p218_p3), 1042434   ;;  %vm663_vm11 = vcmask (!%p218_p3), 1044484   ;;  %vm665_vm13 = vcmask (!%p218_p3), 1046534  }
   0xc   : > { %2237 = vmatpush3.bf16.msra.mxu1 (!%p218_p3), %v2473_v3  ;;  %v2705_v27 = vsub.s32 (!%p218_p3), %v336_v22, %v338_v16  ;;  %vm2793_vm7 = vmor (!%p218_p3), %vm2782_vm6, %vm371_vm4 }
   0xd   : > { %2317 = vmatpush3.bf16.msra.mxu0 (!%p218_p3), %v2474_v4  ;;  %2238 = vmatprep.subr.bf16.mxu1 (!%p218_p3), %v2573_v1  ;;  %vm662_vm10 = vmor (!%p218_p3), %vm660_vm8, %vm661_vm9 }
   0xe   : > { %2318 = vmatprep.subr.bf16.mxu0 %v2573_v1  ;;  %s3260_s15 = smov (!%p270_p4, %s2563_s15), 1  ;;  %vm664_vm12 = vmor %vm662_vm10, %vm663_vm11 }
   0xf   : > { %s2659_s9 = sshll.u32 %s3260_s15, 4  ;;  %vm2879_vm14 = vmor %vm664_vm12, %vm665_vm13 }
  0x10   : > { %2239 = vmatpush3.bf16.msra.mxu1 %v2475_v5  ;;  %s277_s19 = scalar_lea.vmem %s3244_s0, %s2659_s9  ;;  %s287_s26 = scalar_lea.vmem %s3245_s1, %s2659_s9 }
  0x11   : > { %2319 = vmatpush3.bf16.msra.mxu0 %v2476_v6  ;;  %2240 = vmatprep.subr.bf16.mxu1 %v2573_v1  ;;  %v2684_v17 = vld [vmem:[%s277_s19] sm:$0x7]  ;;  %v2686_v18 = vld [vmem:[%s277_s19 + $0x4] sm:$0x7]  ;;  %v2688_v19 = vld [vmem:[%s277_s19 + $0x8] sm:$0x7]  ;;  %s297_s27 = scalar_lea.vmem %s3246_s2, %s2659_s9  ;;  %s307_s20 = scalar_lea.vmem %s3248_s4, %s2659_s9 }
  0x12   : > { %2320 = vmatprep.subr.bf16.mxu0 %v2573_v1  ;;  %v2690_v20 = vld [vmem:[%s277_s19 + $0xc] sm:$0x7]  ;;  %v2699_v24 = vld [vmem:[%s287_s26] sm:$0x7]  ;;  %v2701_v25 = vld [vmem:[%s287_s26 + $0x4] sm:$0x7]  ;;  %v2717_v31 = vrot.slane %v2684_v17, %v2705_v27  ;;  %v2721_v32 = vrot.slane %v2686_v18, %v2705_v27  ;;  %v2725_v33 = vrot.slane %v2688_v19, %v2705_v27 }
  0x13   : > { %v2703_v26 = vld [vmem:[%s287_s26 + $0x8] sm:$0x7]  ;;  %v2707_v28 = vld [vmem:[%s287_s26 + $0xc] sm:$0x7]  ;;  %v834_v29 = vcombine.low %v2699_v24, %v2701_v25  ;;  %v2729_v34 = vrot.slane %v2690_v20, %v2705_v27  ;;  %v2736_v36 = vrot.slane %v2699_v24, %v2705_v27  ;;  %v2740_v37 = vrot.slane %v2701_v25, %v2705_v27  ;;  %v2488_v24 = vld [vmem:[%s3247_s3 + $0x140] sm:$0xff]  }
  0x14   : > { %2241 = vmatpush3.bf16.msra.mxu1 %v2477_v7  ;;  %v835_v30 = vcombine.low %v2703_v26, %v2707_v28  ;;  %v2744_v38 = vrot.slane %v2703_v26, %v2705_v27  ;;  %v2748_v39 = vrot.slane %v2707_v28, %v2705_v27  ;;  %v2752_v40 = vcombine.high %v2717_v31, %v2717_v31 }
  0x15   : > { %2321 = vmatpush3.bf16.msra.mxu0 %v2478_v8  ;;  %2242 = vmatprep.subr.bf16.mxu1 %v2573_v1  ;;  %v2756_v41 = vcombine.high %v2721_v32, %v2721_v32  ;;  %v2760_v42 = vcombine.high %v2725_v33, %v2725_v33  ;;  %v2764_v43 = vcombine.high %v2729_v34, %v2729_v34  ;;  %v374_v45 = vshrl.u32 %v2717_v31, 16 }
  0x16   : > { %2322 = vmatprep.subr.bf16.mxu0 %v2573_v1  ;;  %v377_v46 = vshll.u32 %v2717_v31, 16  ;;  %v388_v47 = vshrl.u32 %v2721_v32, 16  ;;  %v391_v48 = vshll.u32 %v2721_v32, 16  ;;  %v383_v49 = vshll.u32 %v2752_v40, 16 }
  0x17   : > { %v397_v50 = vshll.u32 %v2756_v41, 16  ;;  %v402_v51 = vshrl.u32 %v2725_v33, 16  ;;  %v405_v52 = vshll.u32 %v2725_v33, 16  ;;  %v376_v54 = vrot.slane %v374_v45, 6 }
  0x18   : > { %2243 = vmatpush3.bf16.msra.mxu1 %v2479_v9  ;;  %v379_v55 = vrot.slane %v377_v46, 7  ;;  %v390_v56 = vrot.slane %v388_v47, 6  ;;  %v393_v57 = vrot.slane %v391_v48, 7  ;;  %v385_v58 = vrot.slane %v383_v49, 7 }
  0x19   : > { %2323 = vmatpush3.bf16.msra.mxu0 %v2480_v11  ;;  %2244 = vmatprep.subr.bf16.mxu1 %v2573_v1  ;;  %v399_v59 = vrot.slane %v397_v50, 7  ;;  %v404_v60 = vrot.slane %v402_v51, 6  ;;  %v407_v61 = vrot.slane %v405_v52, 7  ;;  %v411_v0 = vshll.u32 %v2760_v42, 16 }
  0x1a   : > { %2324 = vmatprep.subr.bf16.mxu0 %v2573_v1  ;;  %v380_v62 = vor.u32 %v379_v55, %v376_v54  ;;  %v394_v63 = vor.u32 %v393_v57, %v390_v56  ;;  %v416_v2 = vshrl.u32 %v2729_v34, 16  ;;  %v419_v5 = vshll.u32 %v2729_v34, 16 }
  0x1b   : > { %v408_v4 = vor.u32 %v407_v61, %v404_v60  ;;  %v425_v6 = vshll.u32 %v2764_v43, 16  ;;  %v2801_v7 = vcombine.high %v2736_v36, %v2736_v36  ;;  %v413_v10 = vrot.slane %v411_v0, 7 }
  0x1c   : > { %2245 = vmatpush3.bf16.msra.mxu1 %v2481_v12  ;;  %v381_v8 = vrot.slane %v380_v62, 2  ;;  %v395_v9 = vrot.slane %v394_v63, 2  ;;  %v418_v11 = vrot.slane %v416_v2, 6  ;;  %v2805_v15 = vcombine.high %v2740_v37, %v2740_v37 }
  0x1d   : > { %2325 = vmatpush3.bf16.msra.mxu0 %v2482_v13  ;;  %2246 = vmatprep.subr.bf16.mxu1 %v2573_v1  ;;  %v409_v12 = vrot.slane %v408_v4, 2  ;;  %v421_v13 = vrot.slane %v419_v5, 7  ;;  %v427_v14 = vrot.slane %v425_v6, 7  ;;  %v2813_v22 = vcombine.high %v2744_v38, %v2744_v38 }
  0x1e   : > { %2326 = vmatprep.subr.bf16.mxu0 %v2573_v1  ;;  %v386_v16 = vsel %vm2793_vm7, %v381_v8, %v385_v58  ;;  %v976_v46 = vshrl.u32 %v2736_v36, 16  ;;  %v979_v47 = vshll.u32 %v2736_v36, 16  ;;  %v985_v48 = vshll.u32 %v2801_v7, 16 }
  0x1f   : > { %v990_v49 = vshrl.u32 %v2740_v37, 16  ;;  %v993_v50 = vshll.u32 %v2740_v37, 16  ;;  %v999_v54 = vshll.u32 %v2805_v15, 16  ;;  %v1004_v61 = vshrl.u32 %v2744_v38, 16 }
  0x20   : > { %2247 = vmatpush3.bf16.msra.mxu1 %v2483_v21  ;;  %v400_v21 = vsel %vm2793_vm7, %v395_v9, %v399_v59  ;;  %v978_v53 = vrot.slane %v976_v46, 6  ;;  %v981_v55 = vrot.slane %v979_v47, 7  ;;  %v987_v56 = vrot.slane %v985_v48, 7 }
  0x21   : > { %2327 = vmatpush3.bf16.msra.mxu0 %v2484_v23  ;;  %2248 = vmatprep.subr.bf16.mxu1 %v2573_v1  ;;  %v2817_v23 = vcombine.high %v2748_v39, %v2748_v39  ;;  %v446_v45 = vcombine.low %v386_v16, %v400_v21  ;;  %v992_v57 = vrot.slane %v990_v49, 6  ;;  %v995_v58 = vrot.slane %v993_v50, 7 }
  0x22   : > { %2328 = vmatprep.subr.bf16.mxu0 %v2573_v1  ;;  %v1001_v60 = vrot.slane %v999_v54, 7  ;;  %v1007_v62 = vshll.u32 %v2744_v38, 16  ;;  %v982_v0 = vor.u32 %v981_v55, %v978_v53  ;;  %v1013_v4 = vshll.u32 %v2813_v22, 16  ;;  %v2489_v54 = vld [vmem:[%s3247_s3 + $0x8] sm:$0xff]  }
  0x23   : > { %v454_v52 = vrot.slane %v446_v45, %v2705_v27  ;;  %v996_v2 = vor.u32 %v995_v58, %v992_v57  ;;  %v1006_v5 = vrot.slane %v1004_v61, 6  ;;  %v1018_v8 = vshrl.u32 %v2748_v39, 16 }
  0x24   : > { %2249 = vmatpush3.bf16.msra.mxu1 %v2485_v35  ;;  %v414_v35 = vsel %vm2793_vm7, %v409_v12, %v413_v10  ;;  %v1009_v6 = vrot.slane %v1007_v62, 7  ;;  %v1021_v9 = vshll.u32 %v2748_v39, 16  ;;  %v2861_v58 = vrot.slane %v834_v29, %v2705_v27  ;;  %v2548_v29 = vld [vmem:[%s3247_s3 + $0x238] sm:$0xff]  }
  0x25   : > { %2329 = vmatpush3.bf16.msra.mxu0 %v2486_v44  ;;  %2254 = vmatprep.subr.bf16.mxu1 %v2573_v1  ;;  %v422_v44 = vor.u32 %v421_v13, %v418_v11  ;;  %v983_v11 = vrot.slane %v982_v0, 2  ;;  %v997_v12 = vrot.slane %v996_v2, 2  ;;  %v1015_v13 = vrot.slane %v1013_v4, 7 }
  0x26   : > { %2334 = vmatprep.subr.bf16.mxu0 %v2573_v1  ;;  %v1010_v16 = vor.u32 %v1009_v6, %v1006_v5  ;;  %v1020_v21 = vrot.slane %v1018_v8, 6  ;;  %v2871_v61 = vrot.slane %v835_v30, %v2705_v27  ;;  %v669_v25 = vrot.slane %v2752_v40, 7  ;;  %v2493_v40 = vld [vmem:[%s3247_s3 + $0x18] sm:$0xff]  }
  0x27   : > { %v423_v51 = vrot.slane %v422_v44, 2  ;;  %v1027_v44 = vshll.u32 %v2817_v23, 16  ;;  %v988_v46 = vsel %vm2793_vm7, %v983_v11, %v987_v56  ;;  %v1002_v47 = vsel %vm2793_vm7, %v997_v12, %v1001_v60  ;;  %v2494_v12 = vld [vmem:[%s3247_s3 + $0x158] sm:$0xff]  }
  0x28   : > { %v1011_v48 = vrot.slane %v1010_v16, 2  ;;  %v1967_v60 = vrot.slane %v2717_v31, 9  ;;  %v1968_v31 = vrot.slane %v2721_v32, 9  ;;  %v850_v26 = vcombine.low %v2861_v58, %v2871_v61  ;;  %v2542_v58 = vld [vmem:[%s3247_s3 + $0x208] sm:$0xff]   ;;  %v2543_v61 = vld [vmem:[%s3247_s3 + $0x210] sm:$0xff]  }
  0x29   : > { %v428_v59 = vsel %vm2793_vm7, %v423_v51, %v427_v14  ;;  %v2487_v14 = vld [vmem:[%s3247_s3] sm:$0xff]   ;;  %v1029_v50 = vrot.slane %v1027_v44, 7  ;;  %v1048_v51 = vcombine.low %v988_v46, %v1002_v47  ;;  %v1969_v0 = vrot.slane %v2725_v33, 9 }
  0x2a   : > { %v447_v63 = vcombine.low %v414_v35, %v428_v59  ;;  %v1023_v35 = vrot.slane %v1021_v9, 7  ;;  %v1016_v53 = vsel %vm2793_vm7, %v1011_v48, %v1015_v13  ;;  %v2491_v59 = vld [vmem:[%s3247_s3 + $0x10] sm:$0xff]   ;;  %v670_v30 = vsel %vm2879_vm14, %v1967_v60, %v669_v25  ;;  %v2506_v60 = vld [vmem:[%s3247_s3 + $0x180] sm:$0xff]  }
  0x2b   : > { %v1056_v57 = vrot.slane %v1048_v51, %v2705_v27  ;;  %v677_v2 = vrot.slane %v2760_v42, 7  ;;  %v1970_v4 = vrot.slane %v2729_v34, 9  ;;  %v681_v6 = vrot.slane %v2764_v43, 7  ;;  %v2495_v42 = vld [vmem:[%s3247_s3 + $0x20] sm:$0xff]   ;;  %v2492_v34 = vld [vmem:[%s3247_s3 + $0x150] sm:$0xff]   ;;  %v2497_v43 = vld [vmem:[%s3247_s3 + $0x28] sm:$0xff]  }
  0x2c   : > { %v461_v10 = vrot.slane %v447_v63, %v2705_v27  ;;  %v1024_v49 = vor.u32 %v1023_v35, %v1020_v21  ;;  %v673_v63 = vrot.slane %v2756_v41, 7  ;;  %v2490_v41 = vld [vmem:[%s3247_s3 + $0x148] sm:$0xff]   ;;  %v2499_v13 = vld [vmem:[%s3247_s3 + $0x30] sm:$0xff]   ;;  %v553_v16 = vcombine.low %v2684_v17, %v2686_v18  ;;  %v2513_v25 = vld [vmem:[%s3247_s3 + $0xa0] sm:$0xff]  }
  0x2d   : > { %v678_v33 = vsel %vm2879_vm14, %v1969_v0, %v677_v2  ;;  %v682_v8 = vsel %vm2879_vm14, %v1970_v4, %v681_v6  ;;  %v554_v21 = vcombine.low %v2688_v19, %v2690_v20  ;;  %v2043_v35 = vrot.slane %v2736_v36, 9  ;;  %v2519_v0 = vld [vmem:[%s3247_s3 + $0xb8] sm:$0xff]   ;;  %v1299_v2 = vld [vmem:[%s297_s27] sm:$0x7]  ;;  %v1301_v4 = vld [vmem:[%s297_s27 + $0x8] sm:$0x7] }
  0x2e   : > { %v462_v45 = vcombine.low %v454_v52, %v461_v10  ;;  %v1025_v52 = vrot.slane %v1024_v49, 2  ;;  %v674_v32 = vsel %vm2879_vm14, %v1968_v31, %v673_v63  ;;  %v701_v9 = vcombine.low %v678_v33, %v682_v8  ;;  %v2505_v49 = vld [vmem:[%s3247_s3 + $0x80] sm:$0xff]   ;;  %v2510_v31 = vld [vmem:[%s3247_s3 + $0x190] sm:$0xff]  }
  0x2f   : > { %v700_v5 = vcombine.low %v670_v30, %v674_v32  ;;  %v1159_v44 = vrot.slane %v2801_v7, 7  ;;  %v2044_v46 = vrot.slane %v2740_v37, 9  ;;  %v1163_v47 = vrot.slane %v2805_v15, 7  ;;  %v2501_v37 = vld [vmem:[%s3247_s3 + $0x38] sm:$0xff]   ;;  %v2517_v63 = vld [vmem:[%s3247_s3 + $0xb0] sm:$0xff]   ;;  %v2516_v32 = vld [vmem:[%s3247_s3 + $0x1a8] sm:$0xff]  }
  0x30   : > { %2251 = vmatmul.mubr.bf16.vlgmr.msra.gmra.mrb[0].mxu1 %v462_v45  ;;  %v1030_v55 = vsel %vm2793_vm7, %v1025_v52, %v1029_v50  ;;  %v2924_v11 = vrot.slane %v701_v9, %v2705_v27  ;;  %v2496_v45 = vld [vmem:[%s3247_s3 + $0x160] sm:$0xff]   ;;  %v2045_v17 = vrot.slane %v2744_v38, 9  ;;  %v1167_v18 = vrot.slane %v2813_v22, 7  ;;  %v2498_v38 = vld [vmem:[%s3247_s3 + $0x168] sm:$0xff]   ;;  %v2512_v30 = vld [vmem:[%s3247_s3 + $0x198] sm:$0xff]  }
  0x31   : > { %2255 = vmatpush3.bf16.msra.mxu1 %v2487_v14  ;;  %2270 = vmatprep.mubr.msk.bf16.mxu1 %vm2574_vm0, %v2573_v1  ;;  %v1049_v56 = vcombine.low %v1016_v53, %v1030_v55  ;;  %v2917_v10 = vrot.slane %v700_v5, %v2705_v27  ;;  %v2046_v19 = vrot.slane %v2748_v39, 9  ;;  %v1171_v20 = vrot.slane %v2817_v23, 7  ;;  %v2500_v53 = vld [vmem:[%s3247_s3 + $0x170] sm:$0xff]   ;;  %v2507_v52 = vld [vmem:[%s3247_s3 + $0x88] sm:$0xff]   ;;  %v2521_v33 = vld [vmem:[%s3247_s3 + $0xc0] sm:$0xff]  }
  0x32   : > { %2256 = vmatprep.subr.bf16.mxu1 %v2573_v1  ;;  %v561_v36 = vrot.slane %v553_v16, %v2705_v27  ;;  %v568_v7 = vrot.slane %v554_v21, %v2705_v27  ;;  %v1160_v39 = vsel %vm2879_vm14, %v2043_v35, %v1159_v44  ;;  %v1164_v15 = vsel %vm2879_vm14, %v2044_v46, %v1163_v47  ;;  %v1302_v5 = vld [vmem:[%s297_s27 + $0xc] sm:$0x7]  ;;  %v2518_v8 = vld [vmem:[%s3247_s3 + $0x1b0] sm:$0xff]   ;;  %v2524_v35 = vld [vmem:[%s3247_s3 + $0x1c0] sm:$0xff]  }
  0x33   : > { %v1063_v62 = vrot.slane %v1049_v56, %v2705_v27  ;;  %v716_v14 = vcombine.low %v2917_v10, %v2924_v11  ;;  %v1168_v22 = vsel %vm2879_vm14, %v2045_v17, %v1167_v18  ;;  %v1172_v23 = vsel %vm2879_vm14, %v2046_v19, %v1171_v20  ;;  %v2502_v56 = vld [vmem:[%s3247_s3 + $0x178] sm:$0xff]   ;;  %v2527_v11 = vld [vmem:[%s3247_s3 + $0xd0] sm:$0xff]   ;;  %v2526_v18 = vld [vmem:[%s3247_s3 + $0x1c8] sm:$0xff]  }
  0x34   : > { %v569_v48 = vcombine.low %v561_v36, %v568_v7  ;;  %v1190_v50 = vcombine.low %v1160_v39, %v1164_v15  ;;  %v1191_v51 = vcombine.low %v1168_v22, %v1172_v23  ;;  %v2520_v10 = vld [vmem:[%s3247_s3 + $0x1b8] sm:$0xff]   ;;  %v3079_v16 = vrot.slane %v1301_v4, %v2705_v27 }
  0x35   : > { %2257 = vmatpush3.bf16.msra.mxu1 %v2489_v54  ;;  %v1064_v28 = vcombine.low %v1056_v57, %v1063_v62  ;;  %v2509_v57 = vld [vmem:[%s3247_s3 + $0x90] sm:$0xff]   ;;  %v2511_v62 = vld [vmem:[%s3247_s3 + $0x98] sm:$0xff]   ;;  %v3082_v21 = vrot.slane %v1302_v5, %v2705_v27 }
  0x36   : > { %2258 = vmatprep.subr.bf16.mxu1 %v2573_v1  ;;  %v1198_v54 = vrot.slane %v1190_v50, %v2705_v27  ;;  %v1205_v55 = vrot.slane %v1191_v51, %v2705_v27  ;;  %v2529_v44 = vld [vmem:[%s3247_s3 + $0xd8] sm:$0xff]   ;;  %v1494_v19 = vshrl.u32 %v3079_v16, 16  ;;  %v1497_v20 = vshll.u32 %v3079_v16, 16  ;;  %v2528_v51 = vld [vmem:[%s3247_s3 + $0x1d0] sm:$0xff]  }
  0x37   : > { %2331 = vmatmul.mubr.bf16.vlgmr.msra.gmra.mrb[0].mxu0 %v1064_v28  ;;  %v2515_v28 = vld [vmem:[%s3247_s3 + $0xa8] sm:$0xff]   ;;  %v1508_v36 = vshrl.u32 %v3082_v21, 16  ;;  %v1511_v7 = vshll.u32 %v3082_v21, 16  ;;  %v3119_v15 = vcombine.high %v3079_v16, %v3079_v16  ;;  %v3123_v22 = vcombine.high %v3082_v21, %v3082_v21 }
  0x38   : > { %2335 = vmatpush3.bf16.msra.mxu0 %v2488_v24  ;;  %2350 = vmatprep.mubr.msk.bf16.mxu0 %vm2574_vm0, %v2573_v1  ;;  %v2508_v24 = vld [vmem:[%s3247_s3 + $0x188] sm:$0xff]  }
  0x39   : > { %2259 = vmatpush3.bf16.msra.mxu1 %v2491_v59  ;;  %2336 = vmatprep.subr.bf16.mxu0 %v2573_v1  ;;  %v1206_v59 = vcombine.low %v1198_v54, %v1205_v55  ;;  %v1510_v54 = vrot.slane %v1508_v36, 6  ;;  %v1513_v55 = vrot.slane %v1511_v7, 7  ;;  %v2545_v36 = vld [vmem:[%s3247_s3 + $0x220] sm:$0xff]   ;;  %v2121_v7 = vrot.slane %v3079_v16, 9 }
  0x3a   : > { %2260 = vmatprep.subr.bf16.mxu1 %v2573_v1 }
  0x3c   : > { %2337 = vmatpush3.bf16.msra.mxu0 %v2490_v41  ;;  %v1300_v41 = vld [vmem:[%s297_s27 + $0x4] sm:$0x7] }
  0x3d   : > { %2261 = vmatpush3.bf16.msra.mxu1 %v2493_v40  ;;  %2338 = vmatprep.subr.bf16.mxu0 %v2573_v1  ;;  %v2514_v40 = vld [vmem:[%s3247_s3 + $0x1a0] sm:$0xff]   ;;  %v1324_v6 = vcombine.low %v1299_v2, %v1300_v41 }
  0x3e   : > { %2262 = vmatprep.subr.bf16.mxu1 %v2573_v1 }
  0x3f   : > { %v1332_v9 = vrot.slane %v1324_v6, %v2705_v27 }
  0x40   : > { %2339 = vmatpush3.bf16.msra.mxu0 %v2492_v34  ;;  %v2525_v34 = vld [vmem:[%s3247_s3 + $0xc8] sm:$0xff]  }
  0x41   : > { %2263 = vmatpush3.bf16.msra.mxu1 %v2495_v42  ;;  %2340 = vmatprep.subr.bf16.mxu0 %v2573_v1  ;;  %v1325_v42 = vcombine.low %v1301_v4, %v1302_v5 }
  0x42   : > { %2264 = vmatprep.subr.bf16.mxu1 %v2573_v1 }
  0x44   : > { %2341 = vmatpush3.bf16.msra.mxu0 %v2494_v12 }
  0x45   : > { %2265 = vmatpush3.bf16.msra.mxu1 %v2497_v43  ;;  %2342 = vmatprep.subr.bf16.mxu0 %v2573_v1  ;;  %v1339_v43 = vrot.slane %v1325_v42, %v2705_v27  ;;  %v2537_v42 = vld [vmem:[%s3247_s3 + $0xf8] sm:$0xff]  }
  0x46   : > { %2266 = vmatprep.subr.bf16.mxu1 %v2573_v1 }
  0x47   : > { %v1340_v12 = vcombine.low %v1332_v9, %v1339_v43 }
  0x48   : > { %2343 = vmatpush3.bf16.msra.mxu0 %v2496_v45 }
  0x49   : > { %2267 = vmatpush3.bf16.msra.mxu1 %v2499_v13  ;;  %2344 = vmatprep.subr.bf16.mxu0 %v2573_v1  ;;  %v3072_v13 = vrot.slane %v1299_v2, %v2705_v27 }
  0x4a   : > { %2268 = vmatprep.subr.bf16.mxu1 %v2573_v1 }
  0x4b   : > { %v1466_v45 = vshrl.u32 %v3072_v13, 16  ;;  %v1469_v46 = vshll.u32 %v3072_v13, 16 }
  0x4c   : > { %2345 = vmatpush3.bf16.msra.mxu0 %v2498_v38  ;;  %v3111_v38 = vcombine.high %v3072_v13, %v3072_v13 }
  0x4d   : > { %2269 = vmatpush3.bf16.msra.mxu1 %v2501_v37  ;;  %2346 = vmatprep.subr.bf16.mxu0 %v2573_v1  ;;  %v2531_v37 = vld [vmem:[%s3247_s3 + $0xe0] sm:$0xff]   ;;  %v1468_v23 = vrot.slane %v1466_v45, 6  ;;  %v2538_v45 = vld [vmem:[%s3247_s3 + $0x1f8] sm:$0xff]  }
  0x4e   : > { %2274 = vmatprep.subr.bf16.mxu1 %v2573_v1 }
  0x50   : > { %2271 = vmatmul.mubr.bf16.vlgmr.msra.gmra.mrb[0].mxu1 %v569_v48  ;;  %2347 = vmatpush3.bf16.msra.mxu0 %v2500_v53  ;;  %v1471_v48 = vrot.slane %v1469_v46, 7  ;;  %v1496_v53 = vrot.slane %v1494_v19, 6 }
  0x51   : > { %2275 = vmatpush3.bf16.msra.mxu1 %v2505_v49  ;;  %2290 = vmatprep.mubr.msk.bf16.mxu1 %vm2574_vm0, %v2573_v1 }
  0x52   : > { %2276 = vmatprep.subr.bf16.mxu1 %v2573_v1  ;;  %2348 = vmatprep.subr.bf16.mxu0 %v2573_v1 }
  0x54   : > { %2349 = vmatpush3.bf16.msra.mxu0 %v2502_v56  ;;  %v2533_v56 = vld [vmem:[%s3247_s3 + $0xe8] sm:$0xff]  }
  0x55   : > { %2277 = vmatpush3.bf16.msra.mxu1 %v2507_v52  ;;  %2354 = vmatprep.subr.bf16.mxu0 %v2573_v1  ;;  %v1499_v52 = vrot.slane %v1497_v20, 7 }
  0x56   : > { %2278 = vmatprep.subr.bf16.mxu1 %v2573_v1 }
  0x57   : > { %2351 = vmatmul.mubr.bf16.vlgmr.msra.gmra.mrb[0].mxu0 %v1206_v59  ;;  %v1475_v59 = vshll.u32 %v3111_v38, 16 }
  0x58   : > { %2355 = vmatpush3.bf16.msra.mxu0 %v2506_v60  ;;  %2370 = vmatprep.mubr.msk.bf16.mxu0 %vm2574_vm0, %v2573_v1 }
  0x59   : > { %2279 = vmatpush3.bf16.msra.mxu1 %v2509_v57  ;;  %2356 = vmatprep.subr.bf16.mxu0 %v2573_v1  ;;  %v1472_v57 = vor.u32 %v1471_v48, %v1468_v23  ;;  %v2122_v23 = vrot.slane %v3082_v21, 9  ;;  %v1661_v48 = vrot.slane %v3123_v22, 7 }
  0x5a   : > { %2280 = vmatprep.subr.bf16.mxu1 %v2573_v1 }
  0x5b   : > { %v1662_v21 = vsel %vm2879_vm14, %v2122_v23, %v1661_v48 }
  0x5c   : > { %2357 = vmatpush3.bf16.msra.mxu0 %v2508_v24  ;;  %v2530_v24 = vld [vmem:[%s3247_s3 + $0x1d8] sm:$0xff]  }
  0x5d   : > { %2281 = vmatpush3.bf16.msra.mxu1 %v2511_v62  ;;  %2358 = vmatprep.subr.bf16.mxu0 %v2573_v1 }
  0x5e   : > { %2282 = vmatprep.subr.bf16.mxu1 %v2573_v1 }
  0x60   : > { %2359 = vmatpush3.bf16.msra.mxu0 %v2510_v31  ;;  %v1503_v31 = vshll.u32 %v3119_v15, 16 }
  0x61   : > { %2283 = vmatpush3.bf16.msra.mxu1 %v2513_v25  ;;  %2360 = vmatprep.subr.bf16.mxu0 %v2573_v1  ;;  %v1500_v25 = vor.u32 %v1499_v52, %v1496_v53 }
  0x62   : > { %2284 = vmatprep.subr.bf16.mxu1 %v2573_v1  ;;  %v1505_v5 = vrot.slane %v1503_v31, 7 }
  0x63   : > { %v1501_v4 = vrot.slane %v1500_v25, 2 }
  0x64   : > { %2361 = vmatpush3.bf16.msra.mxu0 %v2512_v30  ;;  %v1517_v30 = vshll.u32 %v3123_v22, 16  ;;  %v2547_v22 = vld [vmem:[%s3247_s3 + $0x230] sm:$0xff]  }
  0x65   : > { %2285 = vmatpush3.bf16.msra.mxu1 %v2515_v28  ;;  %2362 = vmatprep.subr.bf16.mxu0 %v2573_v1  ;;  %v1514_v28 = vor.u32 %v1513_v55, %v1510_v54  ;;  %v1506_v43 = vsel %vm2793_vm7, %v1501_v4, %v1505_v5 }
  0x66   : > { %2286 = vmatprep.subr.bf16.mxu1 %v2573_v1  ;;  %v1519_v6 = vrot.slane %v1517_v30, 7 }
  0x68   : > { %2363 = vmatpush3.bf16.msra.mxu0 %v2514_v40  ;;  %v1473_v40 = vrot.slane %v1472_v57, 2 }
  0x69   : > { %2287 = vmatpush3.bf16.msra.mxu1 %v2517_v63  ;;  %2364 = vmatprep.subr.bf16.mxu0 %v2573_v1  ;;  %v2535_v63 = vld [vmem:[%s3247_s3 + $0xf0] sm:$0xff]  }
  0x6a   : > { %2288 = vmatprep.subr.bf16.mxu1 %v2573_v1 }
  0x6c   : > { %2365 = vmatpush3.bf16.msra.mxu0 %v2516_v32 }
  0x6d   : > { %2289 = vmatpush3.bf16.msra.mxu1 %v2519_v0  ;;  %2366 = vmatprep.subr.bf16.mxu0 %v2573_v1  ;;  %v1477_v0 = vrot.slane %v1475_v59, 7 }
  0x6e   : > { %2294 = vmatprep.subr.bf16.mxu1 %v2573_v1 }
  0x70   : > { %2291 = vmatmul.mubr.bf16.vlgmr.msra.gmra.mrb[0].mxu1 %v716_v14  ;;  %2367 = vmatpush3.bf16.msra.mxu0 %v2518_v8  ;;  %v3075_v14 = vrot.slane %v1300_v41, %v2705_v27  ;;  %v2532_v41 = vld [vmem:[%s3247_s3 + $0x1e0] sm:$0xff]   ;;  %v2534_v8 = vld [vmem:[%s3247_s3 + $0x1e8] sm:$0xff]  }
  0x71   : > { %2295 = vmatpush3.bf16.msra.mxu1 %v2521_v33  ;;  %2310 = vmatprep.mubr.msk.bf16.mxu1 %vm2574_vm0, %v2573_v1  ;;  %v1515_v33 = vrot.slane %v1514_v28, 2 }
  0x72   : > { %2296 = vmatprep.subr.bf16.mxu1 %v2573_v1  ;;  %2368 = vmatprep.subr.bf16.mxu0 %v2573_v1  ;;  %v1480_v47 = vshrl.u32 %v3075_v14, 16  ;;  %v1483_v17 = vshll.u32 %v3075_v14, 16  ;;  %v3115_v39 = vcombine.high %v3075_v14, %v3075_v14  ;;  %v2120_v19 = vrot.slane %v3075_v14, 9 }
  0x74   : > { %2369 = vmatpush3.bf16.msra.mxu0 %v2520_v10  ;;  %v1482_v49 = vrot.slane %v1480_v47, 6  ;;  %v1485_v50 = vrot.slane %v1483_v17, 7  ;;  %v1489_v62 = vshll.u32 %v3115_v39, 16  ;;  %v1520_v10 = vsel %vm2793_vm7, %v1515_v33, %v1519_v6  ;;  %v2541_v47 = vld [vmem:[%s3247_s3 + $0x200] sm:$0xff]  }
  0x75   : > { %2297 = vmatpush3.bf16.msra.mxu1 %v2525_v34  ;;  %2374 = vmatprep.subr.bf16.mxu0 %v2573_v1  ;;  %v1478_v34 = vsel %vm2793_vm7, %v1473_v40, %v1477_v0  ;;  %v2119_v17 = vrot.slane %v3072_v13, 9  ;;  %v1653_v20 = vrot.slane %v3115_v39, 7  ;;  %v2546_v13 = vld [vmem:[%s3247_s3 + $0x228] sm:$0xff]  }
  0x76   : > { %2298 = vmatprep.subr.bf16.mxu1 %v2573_v1  ;;  %v1486_v60 = vor.u32 %v1485_v50, %v1482_v49  ;;  %v1491_v2 = vrot.slane %v1489_v62, 7 }
  0x77   : > { %2371 = vmatmul.mubr.bf16.vlgmr.msra.gmra.mrb[0].mxu0 %v1340_v12  ;;  %v1539_v12 = vcombine.low %v1506_v43, %v1520_v10 }
  0x78   : > { %2375 = vmatpush3.bf16.msra.mxu0 %v2524_v35  ;;  %2390 = vmatprep.mubr.msk.bf16.mxu0 %vm2574_vm0, %v2573_v1  ;;  %v1487_v32 = vrot.slane %v1486_v60, 2  ;;  %v2536_v35 = vld [vmem:[%s3247_s3 + $0x1f0] sm:$0xff]  }
  0x79   : > { %2299 = vmatpush3.bf16.msra.mxu1 %v2527_v11  ;;  %2376 = vmatprep.subr.bf16.mxu0 %v2573_v1  ;;  %v1553_v3 = vrot.slane %v1539_v12, %v2705_v27 }
  0x7a   : > { %2300 = vmatprep.subr.bf16.mxu1 %v2573_v1  ;;  %v1492_v9 = vsel %vm2793_vm7, %v1487_v32, %v1491_v2 }
  0x7b   : > { %v1538_v11 = vcombine.low %v1478_v34, %v1492_v9 }
  0x7c   : > { %2377 = vmatpush3.bf16.msra.mxu0 %v2526_v18  ;;  %v1649_v18 = vrot.slane %v3111_v38, 7  ;;  %v1654_v38 = vsel %vm2879_vm14, %v2120_v19, %v1653_v20 }
  0x7d   : > { %2301 = vmatpush3.bf16.msra.mxu1 %v2529_v44  ;;  %2378 = vmatprep.subr.bf16.mxu0 %v2573_v1  ;;  %v1546_v44 = vrot.slane %v1538_v11, %v2705_v27 }
  0x7e   : > { %2302 = vmatprep.subr.bf16.mxu1 %v2573_v1  ;;  %v1650_v14 = vsel %vm2879_vm14, %v2119_v17, %v1649_v18 }
  0x7f   : > { %v1554_v46 = vcombine.low %v1546_v44, %v1553_v3  ;;  %v1680_v39 = vcombine.low %v1650_v14, %v1654_v38 }
  0x80   : > { %2379 = vmatpush3.bf16.msra.mxu0 %v2528_v51 }
  0x81   : > { %2303 = vmatpush3.bf16.msra.mxu1 %v2531_v37  ;;  %2380 = vmatprep.subr.bf16.mxu0 %v2573_v1  ;;  %v1657_v37 = vrot.slane %v3119_v15, 7  ;;  %v1688_v49 = vrot.slane %v1680_v39, %v2705_v27 }
  0x82   : > { %2304 = vmatprep.subr.bf16.mxu1 %v2573_v1 }
  0x83   : > { %v1658_v16 = vsel %vm2879_vm14, %v2121_v7, %v1657_v37 }
  0x84   : > { %2381 = vmatpush3.bf16.msra.mxu0 %v2530_v24  ;;  %v1681_v15 = vcombine.low %v1658_v16, %v1662_v21 }
  0x85   : > { %2305 = vmatpush3.bf16.msra.mxu1 %v2533_v56  ;;  %2382 = vmatprep.subr.bf16.mxu0 %v2573_v1 }
  0x86   : > { %2306 = vmatprep.subr.bf16.mxu1 %v2573_v1  ;;  %v1695_v50 = vrot.slane %v1681_v15, %v2705_v27 }
  0x88   : > { %2383 = vmatpush3.bf16.msra.mxu0 %v2532_v41  ;;  %v1696_v51 = vcombine.low %v1688_v49, %v1695_v50 }
  0x89   : > { %2307 = vmatpush3.bf16.msra.mxu1 %v2535_v63  ;;  %2384 = vmatprep.subr.bf16.mxu0 %v2573_v1 }
  0x8a   : > { %2308 = vmatprep.subr.bf16.mxu1 %v2573_v1 }
  0x8c   : > { %2385 = vmatpush3.bf16.msra.mxu0 %v2534_v8 }
  0x8d   : > { %2309 = vmatpush3.bf16.msra.mxu1 %v2537_v42  ;;  %2386 = vmatprep.subr.bf16.mxu0 %v2573_v1 }
  0x90   : > { %2311 = vmatmul.mubr.bf16.vlgmr.msra.gmra.mrb[0].mxu1 %v850_v26  ;;  %2387 = vmatpush3.bf16.msra.mxu0 %v2536_v35  ;;  %v2544_v26 = vld [vmem:[%s3247_s3 + $0x218] sm:$0xff]  }
  0x91   : > { %2388 = vmatprep.subr.bf16.mxu0 %v2573_v1 }
  0x94   : > { %2389 = vmatpush3.bf16.msra.mxu0 %v2538_v45 }
  0x95   : > { %2394 = vmatprep.subr.bf16.mxu0 %v2573_v1 }
  0x97   : > { %2391 = vmatmul.mubr.bf16.vlgmr.msra.gmra.mrb[0].mxu0 %v1554_v46 }
  0x98   : > { %2395 = vmatpush3.bf16.msra.mxu0 %v2541_v47  ;;  %2410 = vmatprep.mubr.msk.bf16.mxu0 %vm2574_vm0, %v2573_v1 }
  0x99   : > { %2396 = vmatprep.subr.bf16.mxu0 %v2573_v1 }
  0x9c   : > { %2397 = vmatpush3.bf16.msra.mxu0 %v2542_v58 }
  0x9d   : > { %2398 = vmatprep.subr.bf16.mxu0 %v2573_v1 }
  0xa0   : > { %2399 = vmatpush3.bf16.msra.mxu0 %v2543_v61 }
  0xa1   : > { %2400 = vmatprep.subr.bf16.mxu0 %v2573_v1 }
  0xa4   : > { %2401 = vmatpush3.bf16.msra.mxu0 %v2544_v26 }
  0xa5   : > { %2402 = vmatprep.subr.bf16.mxu0 %v2573_v1 }
  0xa8   : > { %2403 = vmatpush3.bf16.msra.mxu0 %v2545_v36 }
  0xa9   : > { %2404 = vmatprep.subr.bf16.mxu0 %v2573_v1 }
  0xac   : > { %2405 = vmatpush3.bf16.msra.mxu0 %v2546_v13 }
  0xad   : > { %2406 = vmatprep.subr.bf16.mxu0 %v2573_v1 }
  0xb0   : > { %2407 = vmatpush3.bf16.msra.mxu0 %v2547_v22 }
  0xb1   : > { %2408 = vmatprep.subr.bf16.mxu0 %v2573_v1 }
  0xb4   : > { %2409 = vmatpush3.bf16.msra.mxu0 %v2548_v29 }
  0xb7   : > { %2411 = vmatmul.mubr.bf16.vlgmr.msra.gmra.mrb[0].mxu0 %v1696_v51 }
 0x163   : > { %v934_v53 = vpop.f32.mrb[0].mxu1 }
 0x164   : > { %v2312_v52 = vpop.f32.mrb[1].mxu1 }
 0x165   : > { %v937_v54 = vpop.f32.mrb[2].mxu1 }
 0x166   : > { %v2313_v55 = vpop.f32.mrb[3].mxu1 }
 0x18a   : > { %v1780_v56 = vpop.f32.mrb[0].mxu0 }
 0x18b   : > { %v2414_v27 = vadd.f32 %v1780_v56, %v934_v53  ;;  %v2412_v57 = vpop.f32.mrb[1].mxu0 }
 0x18c   : > { %v1783_v59 = vpop.f32.mrb[2].mxu0 }
 0x18d   : > { %v1791_v60 = vcombine.high %v2414_v27, %v2414_v27  ;;  %1795 = vst [vmem:[%s307_s20] sm:$0xf] %v2414_v27  ;;  %v2415_v62 = vadd.f32 %v1783_v59, %v937_v54  ;;  %v2413_v24 = vpop.f32.mrb[3].mxu0 }
 0x18f   : > { %1796 = vst [vmem:[%s307_s20 + $0x4] sm:$0xf] %v1791_v60  ;;  %v1792_v1 = vcombine.high %v2415_v62, %v2415_v62  ;;  %1797 = vst [vmem:[%s307_s20 + $0x8] sm:$0xf] %v2415_v62 }
 0x191   : > { %1798 = vst [vmem:[%s307_s20 + $0xc] sm:$0xf] %v1792_v1 }
 0x192 PF: > { %s14_s17 = sadd.s32 1, %s2571_s17   ;;  %s3255_s15 = smov %s2567_s16 }
 0x193   : > { %p11_p5 = scmp.ge.s32.totalorder %s14_s17, 4   ;;  %s3256_s16 = smov %s3258_s18 }
 0x195   :  { %13 = sbr.rel (!%p11_p5) target bundleno = 2 (0x2), region = 80 }

</bundles_post_ra>
